<compile_context>
chip_gen: v6e
topology: v6e:2x2x1
jax: 0.10.0
libtpu: 0.0.40
codegen_flags: <defaults>
</compile_context>

<pallas_src>
import functools

import jax
import jax.numpy as jnp
from jax import lax
from jax.experimental import pallas as pl
from jax.experimental.pallas import tpu as pltpu

LANES = 128


def _chip_tuning():
    """Per-generation tile size / core split / VMEM budget (perf only)."""
    kind = ""
    try:
        kind = jax.devices()[0].device_kind.lower()
    except Exception:
        pass
    if "v7" in kind:
        # 2 TensorCores per chip, 64 MiB physical VMEM per TC.
        return {"tm_max": 4096, "nsplit": 2, "vmem_limit": 48 << 20}
    if "v6" in kind:
        return {"tm_max": 4096, "nsplit": 1, "vmem_limit": 64 << 20}
    if "v5" in kind:
        # 16 MiB default scoped VMEM: tm=2048 f32 blocks fit without a bump.
        return {"tm_max": 2048, "nsplit": 1, "vmem_limit": None}
    # Unknown chip: stay conservative.
    return {"tm_max": 1024, "nsplit": 1, "vmem_limit": None}


def _smape_kernel(pred_ref, target_ref, out_ref, *, epsilon, tm, last_rows,
                  has_partial):
    j = pl.program_id(1)                      # reduction axis over row tiles

    @pl.when(j == 0)
    def _init():
        out_ref[...] = jnp.zeros_like(out_ref)

    p = pred_ref[...].astype(jnp.float32)     # (tm, 128), native-dtype streamed
    t = target_ref[...].astype(jnp.float32)
    num = jnp.abs(p - t)                      # factor of 2 hoisted to wrapper
    den = jnp.abs(p) + jnp.abs(t) + jnp.float32(epsilon)
    r = pl.reciprocal(den, approx=True)       # EUP slot
    r = r * (2.0 - den * r)                   # one Newton-Raphson step
    term = num * r

    def _fold(x):
        # (tm, 128) -> (8, 128): pure VPU adds over the major axis.
        return jnp.sum(x.reshape(tm // 8, 8, LANES), axis=0)

    if has_partial:
        # Only the very last global tile is ragged; mask it in a cold branch.
        c = pl.program_id(0)
        is_partial = jnp.logical_and(c == pl.num_programs(0) - 1,
                                     j == pl.num_programs(1) - 1)

        @pl.when(jnp.logical_not(is_partial))
        def _hot():
            out_ref[0] += _fold(term)

        @pl.when(is_partial)
        def _cold():
            # Rows past the array end hold unspecified DMA'd data -> mask them.
            row = lax.broadcasted_iota(jnp.int32, (tm, LANES), 0)
            out_ref[0] += _fold(jnp.where(row < last_rows, term, 0.0))
    else:
        out_ref[0] += _fold(term)


def smape_loss(pred, target, epsilon=1e-08):
    pred = jnp.asarray(pred)
    target = jnp.asarray(target)
    assert pred.shape == target.shape, "pred/target must have the same shape"
    n = int(pred.size)
    assert n > 0

    tune = _chip_tuning()
    tm = int(tune["tm_max"])
    nsplit = int(tune["nsplit"])

    flat_p = pred.reshape(-1)                 # native dtype, no wrapper cast
    flat_t = target.reshape(-1)

    # Small-n fast path: kernel launch / pipeline fixed costs dominate there.
    if n < tm * LANES:
        p32 = flat_p.astype(jnp.float32)
        t32 = flat_t.astype(jnp.float32)
        s = jnp.sum(jnp.abs(p32 - t32) /
                    (jnp.abs(p32) + jnp.abs(t32) + jnp.float32(epsilon)))
        return jnp.float32(200.0) * s / jnp.float32(n)

    # Lane alignment.  Pad value 1.0 contributes exactly 0 to the SMAPE sum
    # (num = 0, den = 2 + eps), so no in-kernel mask is needed for padding.
    # Only taken when the flat length is not already a multiple of 128.
    # TODO(synk): for n % 128 != 0 this still copies the array once; avoiding it
    # entirely would require manual DMA from a flat pl.ANY ref.
    rem = n % LANES
    if rem:
        pad = LANES - rem
        flat_p = jnp.pad(flat_p, (0, pad), constant_values=1)
        flat_t = jnp.pad(flat_t, (0, pad), constant_values=1)
    rows = flat_p.size // LANES
    p2 = flat_p.reshape(rows, LANES)          # free reshape when rem == 0
    t2 = flat_t.reshape(rows, LANES)

    nbt = pl.cdiv(rows, tm)                   # total row tiles
    has_partial = (rows % tm) != 0
    last_rows = rows - (nbt - 1) * tm         # valid rows in the final tile
    if nsplit > 1 and nbt % nsplit != 0:
        nsplit = 1                            # keep every grid tile in-bounds
    nbj = nbt // nsplit

    kernel = functools.partial(
        _smape_kernel, epsilon=float(epsilon), tm=tm,
        last_rows=int(last_rows), has_partial=bool(has_partial))

    bytes_in = n * (jnp.dtype(pred.dtype).itemsize +
                    jnp.dtype(target.dtype).itemsize)
    cost = pl.CostEstimate(flops=10 * n, transcendentals=n,
                           bytes_accessed=bytes_in + nsplit * 8 * LANES * 4)

    cp_kwargs = dict(dimension_semantics=("parallel", "arbitrary"))
    if tune["vmem_limit"] is not None:
        cp_kwargs["vmem_limit_bytes"] = int(tune["vmem_limit"])

    partials = pl.pallas_call(
        kernel,
        out_shape=jax.ShapeDtypeStruct((nsplit, 8, LANES), jnp.float32),
        grid_spec=pltpu.PrefetchScalarGridSpec(
            num_scalar_prefetch=0,
            grid=(nsplit, nbj),
            in_specs=[
                pl.BlockSpec((tm, LANES), lambda c, j: (c * nbj + j, 0)),
                pl.BlockSpec((tm, LANES), lambda c, j: (c * nbj + j, 0)),
            ],
            out_specs=pl.BlockSpec((1, 8, LANES), lambda c, j: (c, 0, 0)),
        ),
        compiler_params=pltpu.CompilerParams(**cp_kwargs),
        cost_estimate=cost,
    )(p2, t2)

    return jnp.float32(200.0) * jnp.sum(partials) / jnp.float32(n)


def _ref_smape(pred, target, eps):
    p = pred.astype(jnp.float32)
    t = target.astype(jnp.float32)
    return 100.0 * jnp.mean(2.0 * jnp.abs(p - t) / (jnp.abs(p) + jnp.abs(t) + eps))


if __name__ == "__main__":
    eps = 1e-08
    keys = jax.random.split(jax.random.PRNGKey(0), 10)

    def check(pred, target, tag, rtol=1e-4, atol=1e-4):
        loss = smape_loss(pred, target, epsilon=eps)
        jax.block_until_ready(loss)
        ref = _ref_smape(pred, target, eps)
        assert jnp.allclose(loss, ref, rtol=rtol, atol=atol), (tag, loss, ref)

    # Module-typical small shape -> plain-JAX fast path.
    check(jax.random.normal(keys[0], (2, 4, 16, 16), jnp.float32),
          jax.random.normal(keys[1], (2, 4, 16, 16), jnp.float32), "small_f32")

    # Ragged small shape -> fast path.
    check(jax.random.normal(keys[2], (3, 5, 7), jnp.float32),
          jax.random.normal(keys[3], (3, 5, 7), jnp.float32), "small_ragged")

    # Larger, lane-aligned input -> Pallas kernel path (full tiles, no mask).
    big = (8, 16, 64, 128)  # 1,048,576 elements
    check(jax.random.normal(keys[4], big, jnp.float32),
          jax.random.normal(keys[5], big, jnp.float32), "kernel_f32")

    # Ragged flat length -> kernel path exercising the cold partial-tile branch
    # and the ones-padding for lane alignment.
    check(jax.random.normal(keys[6], (600_037,), jnp.float32),
          jax.random.normal(keys[7], (600_037,), jnp.float32), "kernel_ragged")

    # bf16 inputs streamed natively (half the HBM traffic), cast in-kernel.
    check(jax.random.normal(keys[8], big, jnp.bfloat16),
          jax.random.normal(keys[9], big, jnp.bfloat16), "kernel_bf16")

    print("KERNEL_OK")
</pallas_src>

<mosaic_0001>
module attributes {stable_mosaic.version = 11 : i64} {
  func.func @_smape_kernel(%arg0: i32, %arg1: i32, %arg2: memref<1024x128xf32, #tpu.memory_space<vmem>>, %arg3: memref<1024x128xf32, #tpu.memory_space<vmem>>, %arg4: memref<1x8x128xf32, #tpu.memory_space<vmem>>) attributes {dimension_semantics = [#tpu.dimension_semantics<parallel>, #tpu.dimension_semantics<arbitrary>], iteration_bounds = array<i64: 1, 8>, scalar_prefetch = 0 : i64, scratch_operands = 0 : i64, tpu.core_type = #tpu.core_type<tc>, window_params = [{transform_indices = @transform_0, window_bounds = array<i64: 1024, 128>}, {transform_indices = @transform_1, window_bounds = array<i64: 1024, 128>}, {transform_indices = @transform_2, window_bounds = array<i64: 1, 8, 128>}]} {
    %c0_i32 = arith.constant 0 : i32
    %0 = arith.cmpi eq, %arg1, %c0_i32 : i32
    %1 = arith.extui %0 : i1 to i32
    %c0_i32_0 = arith.constant 0 : i32
    %2 = arith.cmpi ne, %1, %c0_i32_0 : i32
    scf.if %2 {
      %cst_12 = arith.constant 0.000000e+00 : f32
      %26 = vector.broadcast %cst_12 : f32 to vector<1x8x128xf32>
      %c0_13 = arith.constant 0 : index
      %c0_14 = arith.constant 0 : index
      %c0_15 = arith.constant 0 : index
      %27 = vector.load %arg4[%c0_13, %c0_14, %c0_15] : memref<1x8x128xf32, #tpu.memory_space<vmem>>, vector<1x8x128xf32>
      tpu.vector_store %arg4[%c0_13, %c0_14, %c0_15], %26 {strides = array<i32>} : memref<1x8x128xf32, #tpu.memory_space<vmem>>, vector<1x8x128xf32>,
    } else {
    }
    %c0 = arith.constant 0 : index
    %c0_1 = arith.constant 0 : index
    %3 = vector.load %arg2[%c0, %c0_1] : memref<1024x128xf32, #tpu.memory_space<vmem>>, vector<1024x128xf32>
    %c0_2 = arith.constant 0 : index
    %c0_3 = arith.constant 0 : index
    %4 = vector.load %arg3[%c0_2, %c0_3] : memref<1024x128xf32, #tpu.memory_space<vmem>>, vector<1024x128xf32>
    %5 = arith.subf %3, %4 : vector<1024x128xf32>
    %6 = math.absf %5 : vector<1024x128xf32>
    %7 = math.absf %3 : vector<1024x128xf32>
    %8 = math.absf %4 : vector<1024x128xf32>
    %9 = arith.addf %7, %8 : vector<1024x128xf32>
    %cst = arith.constant 9.99999993E-9 : f32
    %10 = vector.broadcast %cst : f32 to vector<1024x128xf32>
    %11 = arith.addf %9, %10 : vector<1024x128xf32>
    %12 = tpu.reciprocal %11 {approx = true} : vector<1024x128xf32> -> vector<1024x128xf32>
    %13 = arith.mulf %11, %12 : vector<1024x128xf32>
    %cst_4 = arith.constant 2.000000e+00 : f32
    %14 = vector.broadcast %cst_4 : f32 to vector<1024x128xf32>
    %15 = arith.subf %14, %13 : vector<1024x128xf32>
    %16 = arith.mulf %12, %15 : vector<1024x128xf32>
    %17 = arith.mulf %6, %16 : vector<1024x128xf32>
    %c0_5 = arith.constant 0 : index
    %c0_6 = arith.constant 0 : index
    %c0_7 = arith.constant 0 : index
    %18 = vector.load %arg4[%c0_5, %c0_6, %c0_7] : memref<1x8x128xf32, #tpu.memory_space<vmem>>, vector<1x8x128xf32>
    %19 = vector.shape_cast %18 : vector<1x8x128xf32> to vector<8x128xf32>
    %20 = vector.shape_cast %17 : vector<1024x128xf32> to vector<128x8x128xf32>
    %cst_8 = arith.constant dense<0.000000e+00> : vector<8x128xf32>
    %21 = vector.multi_reduction <add>, %20, %cst_8 [0] : vector<128x8x128xf32> to vector<8x128xf32>
    %22 = arith.addf %19, %21 : vector<8x128xf32>
    %c0_9 = arith.constant 0 : index
    %c0_10 = arith.constant 0 : index
    %c0_11 = arith.constant 0 : index
    %23 = vector.load %arg4[%c0_9, %c0_10, %c0_11] : memref<1x8x128xf32, #tpu.memory_space<vmem>>, vector<1x8x128xf32>
    %24 = vector.shape_cast %23 : vector<1x8x128xf32> to vector<8x128xf32>
    %25 = vector.shape_cast %22 : vector<8x128xf32> to vector<1x8x128xf32>
    tpu.vector_store %arg4[%c0_9, %c0_10, %c0_11], %25 {strides = array<i32>} : memref<1x8x128xf32, #tpu.memory_space<vmem>>, vector<1x8x128xf32>,
    return
  }
  func.func @transform_0(%arg0: i32, %arg1: i32) -> (i32, i32) {
    %c8_i32 = arith.constant 8 : i32
    %0 = arith.muli %arg0, %c8_i32 : i32
    %1 = arith.addi %0, %arg1 : i32
    %c0_i32 = arith.constant 0 : i32
    %c0_i32_0 = arith.constant 0 : i32
    return %1, %c0_i32 : i32, i32
  }
  func.func @transform_1(%arg0: i32, %arg1: i32) -> (i32, i32) {
    %c8_i32 = arith.constant 8 : i32
    %0 = arith.muli %arg0, %c8_i32 : i32
    %1 = arith.addi %0, %arg1 : i32
    %c0_i32 = arith.constant 0 : i32
    %c0_i32_0 = arith.constant 0 : i32
    return %1, %c0_i32 : i32, i32
  }
  func.func @transform_2(%arg0: i32, %arg1: i32) -> (i32, i32, i32) {
    %c0_i32 = arith.constant 0 : i32
    %c0_i32_0 = arith.constant 0 : i32
    %c0_i32_1 = arith.constant 0 : i32
    return %arg0, %c0_i32, %c0_i32_0 : i32, i32, i32
  }
}

</mosaic_0001>

<bundles_post_ra>
// kernel: tpu_custom_call.1
= control target key start
LH: loop header
LB: loop body
LE: loop exit
PB: predicated region body
PF: predicated region fallthrough
CT: control target
= control target key end

     0   :  { %7 = vsyncpa [#allocation3], 0  ;;  %s5794_s0 = inlined_call_operand.hbm [shape: f32[8192,128], index: 0, kind: input, shape index: {}]   ;;  %s5795_s1 = inlined_call_operand.hbm [shape: f32[8192,128], index: 1, kind: input, shape index: {}]   ;;  %s5796_s2 = inlined_call_operand.hbm [shape: f32[1,8,128], index: 2, kind: output, shape index: {}]  }
   0x1   :  { %9 = vsyncpa [#allocation3 + $0x1], 0 }
   0x2   :  { %10 = vsyncpa [#allocation6], 0 }
   0x3   :  { %12 = vsyncpa [#allocation6 + $0x1], 0 }
   0x4   :  { %13 = vsyncpa [#allocation4], 0  ;;  %s2655_s9 = smov 0   ;;  %s2657_s10 = smov 0  }
   0x5   :  { %s2659_s11 = smov 0   ;;  %s2661_s12 = smov 0  }
   0x6   :  { %s2663_s13 = smov 0   ;;  %s2665_s14 = smov 0  }
   0x7 LB: > { %s2121_s15 = sadd.s32 4294967295, %s2632_s14   ;;  %s28_s16 = sadd.s32 1, %s2628_s13  ;;  %s2632_s14 = sphi %s2665_s14, %s19_s14   ;;  %s2628_s13 = sphi %s2663_s13, %s7407_s13   ;;  %s2624_s12 = sphi %s2661_s12, %s7406_s12   ;;  %s2620_s11 = sphi %s2659_s11, %s7405_s11   ;;  %s2616_s10 = sphi %s2657_s10, %s7404_s10   ;;  %s2612_s9 = sphi %s2655_s9, %s7403_s9  }
   0x8   : > { %p29_p0 = scmp.ge.s32.totalorder %s28_s16, 8  ;;  %s42_s17 = sadd.s32 1, %s2620_s11 }
   0x9   : > { %p49_p1 = scmp.ne.s32.totalorder %s2620_s11, %s2616_s10  ;;  %p50_p2 = scmp.eq.s32.totalorder %s2632_s14, 0 }
   0xa   : > { %s7409_s16 = smov (%p29_p0, %s28_s16), 0  ;;  %p55_p4 = scmp.ne.s32.totalorder %s2616_s10, %s2612_s9 }
   0xb   : > { %p2691_p3 = por %p50_p2, %p49_p1  ;;  %s39_s19 = ssub.s32 %s2628_s13, %s7409_s16 }
   0xc   : > { %p56_p5 = scmp.eq.s32.totalorder %s2121_s15, 0  ;;  %p40_p6 = scmp.eq.s32.totalorder %s39_s19, 0 }
   0xd   : > { %p2155_p8 = scmp.lt.s32.totalorder %s2632_s14, 8  ;;  %s2709_s22 = sand.u32 1, %s2620_s11  }
   0xe   : > { %p2700_p7 = por %p56_p5, %p55_p4  ;;  %s2138_s23 = sshll.u32 %s2628_s13, 14 }
   0xf   : > { %s2706_s21 = scalar_select %p40_p6, %s2620_s11, %s42_s17  }
  0x10   : > { %s2124_s24 = sshll.u32 %s2709_s22, 10  ;;  %s147_s27 = scalar_lea.hbm %s5794_s0, %s2138_s23 }
  0x11   : > { %s139_s28 = scalar_lea.vmem [#allocation2], %s2124_s24  ;;  %p2720_p9 = pnand %p2155_p8, %p2691_p3 }
  0x12   : > { %s148_s29 = sshll.u32 %s139_s28, 4  ;;  %s136_s3 = scalar_lea.sflag [#allocation3], %s2709_s22  ;;  %s149_s29 = int_to_ptr.vmem [resolvable:$true] %s148_s29 }
  0x13   : > { %p2496_p10 = pneg %p2720_p9  ;;  %s2507_s4 = scalar_lea.vmem %s149_s29, 16384 }
  0x14   : > { %p2508_p11 = scmp.ne.s32.totalorder %s149_s29, %s2507_s4  ;;  %s2634_s5 = smov [#allocation2]  }
  0x15   : > { %s2512_s6 = sshll.u32 %s2634_s5, 4  ;;  %s2513_s6 = int_to_ptr.vmem [resolvable:$false] %s2512_s6 }
  0x16   : > { %p2510_p12 = pnand %p2508_p11, %p2496_p10  ;;  %s2514_s7 = scalar_lea.vmem %s2513_s6, 32768 }
  0x17   : > { %p2515_p0 = scmp.lt.s32.totalorder %s149_s29, %s2513_s6  ;;  %p2516_p1 = scmp.lt.s32.totalorder %s2514_s7, %s2507_s4 }
  0x18   : > { %p2511_p13 = pneg %p2510_p12 }
  0x19   : > { %p2517_p2 = por %p2516_p1, %p2515_p0 }
  0x1b   : > { %p2518_p3 = pnand %p2517_p2, %p2511_p13 }
  0x1d   : > { %2521 = shalt.err (!%p2518_p3)
}
  0x1e   : > { %s2635_s8 = smov 128   ;;  %s2636_s9 = smov 8  }
  0x1f   : > { %2151 = dma.hbm_to_vmem [thread:$0]  (!%p2720_p9), %s147_s27, 16384, %s149_s29, %s136_s3, %s2635_s8, %s2635_s8, %s2636_s9  }
  0x20   : > { %p2130_p4 = scmp.ge.s32.totalorder %s2632_s14, 1  ;;  %p179_p5 = scmp.lt.s32.totalorder %s2632_s14, 9 }
  0x21   : > { %s170_s25 = scalar_lea.hbm %s5795_s1, %s2138_s23  ;;  %s162_s26 = scalar_lea.vmem [#allocation5], %s2124_s24 }
  0x22   : > { %p2734_p6 = pnand %p2130_p4, %p179_p5  ;;  %s171_s28 = sshll.u32 %s162_s26, 4  ;;  %s172_s28 = int_to_ptr.vmem [resolvable:$true] %s171_s28 }
  0x23   : > { %s159_s4 = scalar_lea.sflag [#allocation6], %s2709_s22  ;;  %s2535_s5 = scalar_lea.vmem %s172_s28, 16384 }
  0x24   : > { %p2536_p8 = scmp.ne.s32.totalorder %s172_s28, %s2535_s5  ;;  %s2637_s27 = smov [#allocation5]  }
  0x25   : > { %s2540_s29 = sshll.u32 %s2637_s27, 4  ;;  %s2541_s29 = int_to_ptr.vmem [resolvable:$false] %s2540_s29 }
  0x26   : > { %p2538_p11 = pnand %p2536_p8, %p2496_p10  ;;  %s2542_s3 = scalar_lea.vmem %s2541_s29, 32768 }
  0x27   : > { %p2543_p13 = scmp.lt.s32.totalorder %s172_s28, %s2541_s29  ;;  %p2544_p0 = scmp.lt.s32.totalorder %s2542_s3, %s2535_s5 }
  0x28   : > { %p2539_p12 = pneg %p2538_p11 }
  0x29   : > { %p2545_p1 = por %p2544_p0, %p2543_p13 }
  0x2b   : > { %p2546_p2 = pnand %p2545_p1, %p2539_p12 }
  0x2d   : > { %2549 = shalt.err (!%p2546_p2)
}
  0x2e   : > { %2154 = dma.hbm_to_vmem [thread:$0]  (!%p2720_p9), %s170_s25, 16384, %s172_s28, %s159_s4, %s2635_s8, %s2635_s8, %s2636_s9  }
  0x2f   : > { %183 = sbr.rel (%p2734_p6) target bundleno = 634 (0x27a), region = 28 }
  0x34   : > { %s185_s22 = sand.u32 1, %s2616_s10  }
  0x35   : > { %s2131_s23 = sshll.u32 %s185_s22, 10  ;;  %s186_s24 = scalar_lea.sflag [#allocation3], %s185_s22 }
  0x36   : > { %s2752_s6 = scalar_lea.vmem [#allocation2], %s2131_s23 }
  0x37   : > { %2599 = dma.done.wait (%p2700_p7), %s186_s24, 16384  }
  0x38   : > { %2601 = vsyncadd (%p2700_p7), %s186_s24, 4294950912  ;;  %s195_s7 = scalar_lea.sflag [#allocation6], %s185_s22  ;;  %s2758_s18 = scalar_lea.vmem [#allocation5], %s2131_s23 }
  0x39   : > { %2603 = dma.done.wait (%p2700_p7), %s195_s7, 16384  }
  0x3a   : > { %2605 = vsyncadd (%p2700_p7), %s195_s7, 4294950912  ;;  %p2133_p9 = scmp.ne.s32.totalorder %s2624_s12, 0 }
  0x3c   : > { %228 = sbr.rel (%p2133_p9) target bundleno = 67 (0x43), region = 40 }
  0x41   : > { %v2638_v0 = vmov 0.0  }
  0x42   : > { %229 = vst [vmem:[#allocation7] sm:$0xff] %v2638_v0 }
  0x43 PF: > { %v2766_v1 = vld [vmem:[%s2752_s6] sm:$0xff]  ;;  %v2769_v2 = vld [vmem:[%s2752_s6 + $0x8] sm:$0xff]  ;;  %v2772_v3 = vld [vmem:[%s2752_s6 + $0x10] sm:$0xff]  ;;  %s2639_s12 = smov [#allocation7]   ;;  %p5761_p7 = scmp.eq.s32.totalorder %s2121_s15, 7 }
  0x44   : > { %6187 = vst [vmem:[#allocation11_spill] sm:$0xff] %v2766_v1  ;;  %6188 = vst [vmem:[#allocation12_spill] sm:$0xff] %v2769_v2  ;;  %v2775_v4 = vld [vmem:[%s2752_s6 + $0x18] sm:$0xff]  ;;  %v2778_v5 = vld [vmem:[%s2752_s6 + $0x20] sm:$0xff]  ;;  %s2033_s20 = sshll.u32 %s2639_s12, 4  ;;  %s2034_s20 = int_to_ptr.vmem [resolvable:$true] %s2033_s20 }
  0x45   : > { %6189 = vst [vmem:[#allocation13_spill] sm:$0xff] %v2772_v3  ;;  %6190 = vst [vmem:[#allocation14_spill] sm:$0xff] %v2775_v4  ;;  %v2781_v6 = vld [vmem:[%s2752_s6 + $0x28] sm:$0xff]  ;;  %v2784_v7 = vld [vmem:[%s2752_s6 + $0x30] sm:$0xff]  ;;  %s2550_s8 = scalar_lea.vmem %s2034_s20, 128  ;;  %p2557_p5 = scmp.lt.s32.totalorder %s2034_s20, %s2034_s20 }
  0x46   : > { %6191 = vst [vmem:[#allocation15_spill] sm:$0xff] %v2778_v5  ;;  %6192 = vst [vmem:[#allocation16_spill] sm:$0xff] %v2781_v6  ;;  %v2787_v8 = vld [vmem:[%s2752_s6 + $0x38] sm:$0xff]  ;;  %v2791_v10 = vld [vmem:[%s2752_s6 + $0x40] sm:$0xff]  ;;  %p2551_p10 = scmp.ne.s32.totalorder %s2034_s20, %s2550_s8  ;;  %p2558_p6 = scmp.lt.s32.totalorder %s2550_s8, %s2550_s8 }
  0x47   : > { %6193 = vst [vmem:[#allocation17_spill] sm:$0xff] %v2784_v7  ;;  %6194 = vst [vmem:[#allocation18_spill] sm:$0xff] %v2787_v8  ;;  %v2794_v11 = vld [vmem:[%s2752_s6 + $0x48] sm:$0xff]  ;;  %v2797_v12 = vld [vmem:[%s2752_s6 + $0x50] sm:$0xff] }
  0x48   : > { %6195 = vst [vmem:[#allocation19_spill] sm:$0xff] %v2791_v10  ;;  %6196 = vst [vmem:[#allocation20_spill] sm:$0xff] %v2794_v11  ;;  %v2801_v14 = vld [vmem:[%s2752_s6 + $0x58] sm:$0xff]  ;;  %v2804_v15 = vld [vmem:[%s2752_s6 + $0x60] sm:$0xff]  ;;  %p2552_p3 = pnand %p2551_p10, %p5761_p7  ;;  %p2559_p8 = por %p2558_p6, %p2557_p5 }
  0x49   : > { %6197 = vst [vmem:[#allocation21_spill] sm:$0xff] %v2797_v12  ;;  %6198 = vst [vmem:[#allocation22_spill] sm:$0xff] %v2801_v14  ;;  %v2807_v16 = vld [vmem:[%s2752_s6 + $0x68] sm:$0xff]  ;;  %v2811_v18 = vld [vmem:[%s2752_s6 + $0x70] sm:$0xff] }
  0x4a   : > { %6199 = vst [vmem:[#allocation23_spill] sm:$0xff] %v2804_v15  ;;  %6200 = vst [vmem:[#allocation24_spill] sm:$0xff] %v2807_v16  ;;  %v2814_v19 = vld [vmem:[%s2752_s6 + $0x78] sm:$0xff]  ;;  %v2817_v20 = vld [vmem:[%s2752_s6 + $0x80] sm:$0xff]  ;;  %p2553_p4 = pneg %p2552_p3 }
  0x4b   : > { %6201 = vst [vmem:[#allocation25_spill] sm:$0xff] %v2811_v18  ;;  %6202 = vst [vmem:[#allocation26_spill] sm:$0xff] %v2814_v19  ;;  %v2821_v22 = vld [vmem:[%s2752_s6 + $0x88] sm:$0xff]  ;;  %v2824_v23 = vld [vmem:[%s2752_s6 + $0x90] sm:$0xff] }
  0x4c   : > { %6203 = vst [vmem:[#allocation27_spill] sm:$0xff] %v2817_v20  ;;  %6204 = vst [vmem:[#allocation28_spill] sm:$0xff] %v2821_v22  ;;  %v2827_v24 = vld [vmem:[%s2752_s6 + $0x98] sm:$0xff]  ;;  %v2832_v27 = vld [vmem:[%s2752_s6 + $0xa0] sm:$0xff]  ;;  %p2560_p11 = pnand %p2559_p8, %p2553_p4 }
  0x4d   : > { %6205 = vst [vmem:[#allocation29_spill] sm:$0xff] %v2824_v23  ;;  %6206 = vst [vmem:[#allocation30_spill] sm:$0xff] %v2827_v24  ;;  %v2835_v28 = vld [vmem:[%s2752_s6 + $0xa8] sm:$0xff]  ;;  %v2838_v29 = vld [vmem:[%s2752_s6 + $0xb0] sm:$0xff] }
  0x4e   : > { %6207 = vst [vmem:[#allocation31_spill] sm:$0xff] %v2832_v27  ;;  %6208 = vst [vmem:[#allocation32_spill] sm:$0xff] %v2835_v28  ;;  %v2843_v32 = vld [vmem:[%s2752_s6 + $0xb8] sm:$0xff]  ;;  %v2846_v33 = vld [vmem:[%s2752_s6 + $0xc0] sm:$0xff] }
  0x4f   : > { %6209 = vst [vmem:[#allocation33_spill] sm:$0xff] %v2838_v29  ;;  %6210 = vst [vmem:[#allocation34_spill] sm:$0xff] %v2843_v32  ;;  %v2849_v34 = vld [vmem:[%s2752_s6 + $0xc8] sm:$0xff]  ;;  %v2855_v38 = vld [vmem:[%s2752_s6 + $0xd0] sm:$0xff] }
  0x50   : > { %6211 = vst [vmem:[#allocation35_spill] sm:$0xff] %v2846_v33  ;;  %6212 = vst [vmem:[#allocation36_spill] sm:$0xff] %v2849_v34  ;;  %v2858_v39 = vld [vmem:[%s2752_s6 + $0xd8] sm:$0xff]  ;;  %v2861_v40 = vld [vmem:[%s2752_s6 + $0xe0] sm:$0xff] }
  0x51   : > { %6213 = vst [vmem:[#allocation37_spill] sm:$0xff] %v2855_v38  ;;  %6214 = vst [vmem:[#allocation38_spill] sm:$0xff] %v2858_v39  ;;  %v2867_v44 = vld [vmem:[%s2752_s6 + $0xe8] sm:$0xff]  ;;  %v2870_v45 = vld [vmem:[%s2752_s6 + $0xf0] sm:$0xff] }
  0x52   : > { %6215 = vst [vmem:[#allocation39_spill] sm:$0xff] %v2861_v40  ;;  %6216 = vst [vmem:[#allocation40_spill] sm:$0xff] %v2867_v44  ;;  %v2873_v46 = vld [vmem:[%s2752_s6 + $0xf8] sm:$0xff]  ;;  %v2879_v50 = vld [vmem:[%s2752_s6 + $0x100] sm:$0xff] }
  0x53   : > { %6217 = vst [vmem:[#allocation41_spill] sm:$0xff] %v2870_v45  ;;  %6218 = vst [vmem:[#allocation42_spill] sm:$0xff] %v2873_v46  ;;  %v2882_v51 = vld [vmem:[%s2752_s6 + $0x108] sm:$0xff]  ;;  %v2885_v52 = vld [vmem:[%s2752_s6 + $0x110] sm:$0xff] }
  0x54   : > { %6219 = vst [vmem:[#allocation43_spill] sm:$0xff] %v2879_v50  ;;  %6220 = vst [vmem:[#allocation44_spill] sm:$0xff] %v2882_v51  ;;  %v2891_v56 = vld [vmem:[%s2752_s6 + $0x118] sm:$0xff]  ;;  %v2894_v57 = vld [vmem:[%s2752_s6 + $0x120] sm:$0xff] }
  0x55   : > { %6221 = vst [vmem:[#allocation45_spill] sm:$0xff] %v2885_v52  ;;  %6222 = vst [vmem:[#allocation46_spill] sm:$0xff] %v2891_v56  ;;  %v2900_v61 = vld [vmem:[%s2752_s6 + $0x128] sm:$0xff]  ;;  %v2903_v62 = vld [vmem:[%s2752_s6 + $0x130] sm:$0xff] }
  0x56   : > { %6223 = vst [vmem:[#allocation47_spill] sm:$0xff] %v2894_v57  ;;  %6224 = vst [vmem:[#allocation48_spill] sm:$0xff] %v2900_v61  ;;  %v2909_v54 = vld [vmem:[%s2752_s6 + $0x138] sm:$0xff]  ;;  %v2912_v58 = vld [vmem:[%s2752_s6 + $0x140] sm:$0xff] }
  0x57   : > { %6225 = vst [vmem:[#allocation49_spill] sm:$0xff] %v2903_v62  ;;  %6226 = vst [vmem:[#allocation50_spill] sm:$0xff] %v2909_v54  ;;  %v2918_v49 = vld [vmem:[%s2752_s6 + $0x148] sm:$0xff]  ;;  %v2927_v43 = vld [vmem:[%s2752_s6 + $0x150] sm:$0xff] }
  0x58   : > { %6227 = vst [vmem:[#allocation51_spill] sm:$0xff] %v2912_v58  ;;  %6228 = vst [vmem:[#allocation52_spill] sm:$0xff] %v2918_v49  ;;  %v358_v59 = vld [vmem:[%s2758_s18] sm:$0xff]  ;;  %v2933_v0 = vld [vmem:[%s2752_s6 + $0x158] sm:$0xff] }
  0x59   : > { %6229 = vst [vmem:[#allocation53_spill] sm:$0xff] %v2927_v43  ;;  %6230 = vst [vmem:[#allocation54_spill] sm:$0xff] %v2933_v0  ;;  %v359_v55 = vld [vmem:[%s2758_s18 + $0x8] sm:$0xff]  ;;  %v486_v48 = vsub.f32 %v2766_v1, %v358_v59  ;;  %v360_v42 = vld [vmem:[%s2758_s18 + $0x10] sm:$0xff] }
  0x5a   : > { %v487_v41 = vsub.f32 %v2769_v2, %v359_v55  ;;  %v361_v37 = vld [vmem:[%s2758_s18 + $0x18] sm:$0xff]  ;;  %v488_v36 = vsub.f32 %v2772_v3, %v360_v42  ;;  %v2948_v35 = vld [vmem:[%s2758_s18 + $0x20] sm:$0xff]  ;;  %v2951_v60 = vld [vmem:[%s2758_s18 + $0x28] sm:$0xff] }
  0x5b   : > { %6231 = vst [vmem:[#allocation55_spill] sm:$0xff] %v2948_v35  ;;  %6232 = vst [vmem:[#allocation56_spill] sm:$0xff] %v2951_v60  ;;  %v2954_v31 = vld [vmem:[%s2758_s18 + $0x30] sm:$0xff]  ;;  %v489_v55 = vsub.f32 %v2775_v4, %v361_v37  ;;  %v2959_v53 = vld [vmem:[%s2758_s18 + $0x38] sm:$0xff]  ;;  %v490_v47 = vsub.f32 %v2778_v5, %v2948_v35  ;;  %v491_v30 = vsub.f32 %v2781_v6, %v2951_v60  ;;  %v2973_v26 = vand.u32 2147483647, %v486_v48 }
  0x5c   : > { %6233 = vst [vmem:[#allocation57_spill] sm:$0xff] %v2954_v31  ;;  %6234 = vst [vmem:[#allocation58_spill] sm:$0xff] %v2959_v53  ;;  %v2962_v42 = vld [vmem:[%s2758_s18 + $0x40] sm:$0xff]  ;;  %v2965_v59 = vld [vmem:[%s2758_s18 + $0x48] sm:$0xff]  ;;  %v492_v37 = vsub.f32 %v2784_v7, %v2954_v31  ;;  %v493_v17 = vsub.f32 %v2787_v8, %v2959_v53  ;;  %v2990_v48 = vand.u32 2147483647, %v487_v41 }
  0x5d   : > { %6235 = vst [vmem:[#allocation59_spill] sm:$0xff] %v2962_v42  ;;  %6236 = vst [vmem:[#allocation60_spill] sm:$0xff] %v2965_v59  ;;  %v2976_v63 = vld [vmem:[%s2758_s18 + $0x50] sm:$0xff]  ;;  %v2979_v25 = vld [vmem:[%s2758_s18 + $0x58] sm:$0xff]  ;;  %v494_v13 = vsub.f32 %v2791_v10, %v2962_v42  ;;  %v495_v9 = vsub.f32 %v2794_v11, %v2965_v59  ;;  %v3007_v41 = vand.u32 2147483647, %v488_v36 }
  0x5e   : > { %6237 = vst [vmem:[#allocation61_spill] sm:$0xff] %v2973_v26  ;;  %6238 = vst [vmem:[#allocation62_spill] sm:$0xff] %v2976_v63  ;;  %v2982_v21 = vld [vmem:[%s2758_s18 + $0x60] sm:$0xff]  ;;  %v2993_v26 = vld [vmem:[%s2758_s18 + $0x68] sm:$0xff]  ;;  %v496_v8 = vsub.f32 %v2797_v12, %v2976_v63  ;;  %v3024_v36 = vand.u32 2147483647, %v489_v55 }
  0x5f   : > { %6239 = vst [vmem:[#allocation63_spill] sm:$0xff] %v2979_v25  ;;  %6240 = vst [vmem:[#allocation64_spill] sm:$0xff] %v2982_v21  ;;  %v2996_v7 = vld [vmem:[%s2758_s18 + $0x70] sm:$0xff]  ;;  %v2999_v6 = vld [vmem:[%s2758_s18 + $0x78] sm:$0xff]  ;;  %v3041_v55 = vand.u32 2147483647, %v490_v47 }
  0x60   : > { %6241 = vst [vmem:[#allocation65_spill] sm:$0xff] %v2990_v48  ;;  %6242 = vst [vmem:[#allocation66_spill] sm:$0xff] %v2993_v26  ;;  %v3010_v48 = vld [vmem:[%s2758_s18 + $0x80] sm:$0xff]  ;;  %v3013_v5 = vld [vmem:[%s2758_s18 + $0x88] sm:$0xff]  ;;  %v3058_v47 = vand.u32 2147483647, %v491_v30 }
  0x61   : > { %6243 = vst [vmem:[#allocation67_spill] sm:$0xff] %v2996_v7  ;;  %6244 = vst [vmem:[#allocation68_spill] sm:$0xff] %v2999_v6  ;;  %v3016_v4 = vld [vmem:[%s2758_s18 + $0x90] sm:$0xff]  ;;  %v3030_v3 = vld [vmem:[%s2758_s18 + $0xa0] sm:$0xff]  ;;  %v3075_v30 = vand.u32 2147483647, %v492_v37 }
  0x62   : > { %6245 = vst [vmem:[#allocation69_spill] sm:$0xff] %v3007_v41  ;;  %6246 = vst [vmem:[#allocation70_spill] sm:$0xff] %v3010_v48  ;;  %v3027_v41 = vld [vmem:[%s2758_s18 + $0x98] sm:$0xff]  ;;  %v3033_v2 = vld [vmem:[%s2758_s18 + $0xa8] sm:$0xff]  ;;  %v3092_v37 = vand.u32 2147483647, %v493_v17 }
  0x63   : > { %6247 = vst [vmem:[#allocation71_spill] sm:$0xff] %v3013_v5  ;;  %6248 = vst [vmem:[#allocation72_spill] sm:$0xff] %v3016_v4  ;;  %v3047_v1 = vld [vmem:[%s2758_s18 + $0xb8] sm:$0xff]  ;;  %v3050_v63 = vld [vmem:[%s2758_s18 + $0xc0] sm:$0xff]  ;;  %v3109_v11 = vand.u32 2147483647, %v494_v13 }
  0x64   : > { %6249 = vst [vmem:[#allocation73_spill] sm:$0xff] %v3024_v36  ;;  %6250 = vst [vmem:[#allocation74_spill] sm:$0xff] %v3027_v41  ;;  %v3044_v36 = vld [vmem:[%s2758_s18 + $0xb0] sm:$0xff]  ;;  %v3067_v42 = vld [vmem:[%s2758_s18 + $0xd8] sm:$0xff]  ;;  %v3126_v17 = vand.u32 2147483647, %v495_v9 }
  0x65   : > { %6251 = vst [vmem:[#allocation75_spill] sm:$0xff] %v3030_v3  ;;  %6252 = vst [vmem:[#allocation76_spill] sm:$0xff] %v3033_v2  ;;  %v3064_v59 = vld [vmem:[%s2758_s18 + $0xd0] sm:$0xff]  ;;  %v3081_v53 = vld [vmem:[%s2758_s18 + $0xe8] sm:$0xff] }
  0x66   : > { %6253 = vst [vmem:[#allocation77_spill] sm:$0xff] %v3041_v55  ;;  %6254 = vst [vmem:[#allocation78_spill] sm:$0xff] %v3044_v36  ;;  %v3061_v55 = vld [vmem:[%s2758_s18 + $0xc8] sm:$0xff]  ;;  %v3084_v31 = vld [vmem:[%s2758_s18 + $0xf0] sm:$0xff] }
  0x67   : > { %6255 = vst [vmem:[#allocation79_spill] sm:$0xff] %v3047_v1  ;;  %6256 = vst [vmem:[#allocation80_spill] sm:$0xff] %v3050_v63  ;;  %v3098_v60 = vld [vmem:[%s2758_s18 + $0x100] sm:$0xff]  ;;  %v3101_v35 = vld [vmem:[%s2758_s18 + $0x108] sm:$0xff] }
  0x68   : > { %6257 = vst [vmem:[#allocation81_spill] sm:$0xff] %v3058_v47  ;;  %6258 = vst [vmem:[#allocation82_spill] sm:$0xff] %v3061_v55  ;;  %v3078_v47 = vld [vmem:[%s2758_s18 + $0xe0] sm:$0xff]  ;;  %v3135_v45 = vld [vmem:[%s2758_s18 + $0x128] sm:$0xff] }
  0x69   : > { %6259 = vst [vmem:[#allocation83_spill] sm:$0xff] %v3064_v59  ;;  %6260 = vst [vmem:[#allocation84_spill] sm:$0xff] %v3067_v42  ;;  %v3115_v42 = vld [vmem:[%s2758_s18 + $0x118] sm:$0xff]  ;;  %v3118_v39 = vld [vmem:[%s2758_s18 + $0x120] sm:$0xff] }
  0x6a   : > { %6261 = vst [vmem:[#allocation85_spill] sm:$0xff] %v3075_v30  ;;  %6262 = vst [vmem:[#allocation86_spill] sm:$0xff] %v3078_v47  ;;  %v3095_v30 = vld [vmem:[%s2758_s18 + $0xf8] sm:$0xff]  ;;  %v3161_v50 = vld [vmem:[%s2758_s18 + $0x140] sm:$0xff] }
  0x6b   : > { %6263 = vst [vmem:[#allocation87_spill] sm:$0xff] %v3081_v53  ;;  %6264 = vst [vmem:[#allocation88_spill] sm:$0xff] %v3084_v31  ;;  %v3132_v31 = vld [vmem:[%s2752_s6 + $0x168] sm:$0xff]  ;;  %v3138_v53 = vld [vmem:[%s2758_s18 + $0x130] sm:$0xff] }
  0x6c   : > { %6265 = vst [vmem:[#allocation89_spill] sm:$0xff] %v3092_v37  ;;  %6266 = vst [vmem:[#allocation90_spill] sm:$0xff] %v3095_v30  ;;  %v3112_v37 = vld [vmem:[%s2758_s18 + $0x110] sm:$0xff]  ;;  %v3141_v12 = vld [vmem:[%s2758_s18 + $0x138] sm:$0xff] }
  0x6d   : > { %6267 = vst [vmem:[#allocation91_spill] sm:$0xff] %v3098_v60  ;;  %6268 = vst [vmem:[#allocation92_spill] sm:$0xff] %v3101_v35  ;;  %v3152_v35 = vld [vmem:[%s2752_s6 + $0x170] sm:$0xff]  ;;  %v3155_v51 = vld [vmem:[%s2752_s6 + $0x178] sm:$0xff] }
  0x6e   : > { %6269 = vst [vmem:[#allocation93_spill] sm:$0xff] %v3109_v11  ;;  %6270 = vst [vmem:[#allocation94_spill] sm:$0xff] %v3112_v37  ;;  %v3129_v11 = vld [vmem:[%s2752_s6 + $0x160] sm:$0xff]  ;;  %v3164_v10 = vld [vmem:[%s2758_s18 + $0x148] sm:$0xff] }
  0x6f   : > { %6271 = vst [vmem:[#allocation95_spill] sm:$0xff] %v3115_v42  ;;  %6272 = vst [vmem:[#allocation96_spill] sm:$0xff] %v3118_v39  ;;  %v3158_v60 = vld [vmem:[%s2752_s6 + $0x180] sm:$0xff]  ;;  %v3167_v9 = vld [vmem:[%s2758_s18 + $0x150] sm:$0xff]  ;;  %v6286_v39 = vsub.f32 %v2801_v14, %v2979_v25  ;;  %v6294_v14 = vsub.f32 %v2804_v15, %v2982_v21  ;;  %v6302_v15 = vsub.f32 %v2807_v16, %v2993_v26 }
  0x70   : > { %6273 = vst [vmem:[#allocation97_spill] sm:$0xff] %v3126_v17  ;;  %6274 = vst [vmem:[#allocation98_spill] sm:$0xff] %v3129_v11  ;;  %v3149_v17 = vand.u32 2147483647, %v496_v8  ;;  %v3181_v42 = vld [vmem:[%s2752_s6 + $0x188] sm:$0xff]  ;;  %v3184_v56 = vld [vmem:[%s2752_s6 + $0x190] sm:$0xff]  ;;  %v6310_v16 = vsub.f32 %v2811_v18, %v2996_v7  ;;  %v6318_v18 = vsub.f32 %v2814_v19, %v2999_v6  ;;  %v6326_v19 = vsub.f32 %v2817_v20, %v3010_v48 }
  0x71   : > { %6275 = vst [vmem:[#allocation99_spill] sm:$0xff] %v3132_v31  ;;  %6276 = vst [vmem:[#allocation100_spill] sm:$0xff] %v3135_v45  ;;  %v3178_v57 = vand.u32 2147483647, %v6286_v39  ;;  %v3187_v13 = vld [vmem:[%s2752_s6 + $0x198] sm:$0xff]  ;;  %v3193_v8 = vld [vmem:[%s2758_s18 + $0x160] sm:$0xff]  ;;  %v6334_v20 = vsub.f32 %v2821_v22, %v3013_v5  ;;  %v6342_v22 = vsub.f32 %v2824_v23, %v3016_v4  ;;  %v6350_v23 = vsub.f32 %v2827_v24, %v3027_v41 }
  0x72   : > { %6277 = vst [vmem:[#allocation101_spill] sm:$0xff] %v3138_v53  ;;  %6278 = vst [vmem:[#allocation102_spill] sm:$0xff] %v3141_v12  ;;  %v3190_v45 = vld [vmem:[%s2758_s18 + $0x158] sm:$0xff]  ;;  %v3196_v53 = vld [vmem:[%s2758_s18 + $0x168] sm:$0xff]  ;;  %v3207_v25 = vand.u32 2147483647, %v6294_v14  ;;  %v6358_v24 = vsub.f32 %v2832_v27, %v3030_v3  ;;  %v6366_v27 = vsub.f32 %v2835_v28, %v3033_v2  ;;  %v6374_v28 = vsub.f32 %v2838_v29, %v3044_v36 }
  0x73   : > { %6279 = vst [vmem:[#allocation103_spill] sm:$0xff] %v3149_v17  ;;  %6280 = vst [vmem:[#allocation104_spill] sm:$0xff] %v3152_v35  ;;  %v3210_v12 = vld [vmem:[%s2752_s6 + $0x1a0] sm:$0xff]  ;;  %v3213_v54 = vld [vmem:[%s2752_s6 + $0x1a8] sm:$0xff]  ;;  %v3236_v21 = vand.u32 2147483647, %v6302_v15  ;;  %v6382_v29 = vsub.f32 %v2843_v32, %v3047_v1  ;;  %v6390_v32 = vsub.f32 %v2846_v33, %v3050_v63 }
  0x74   : > { %6281 = vst [vmem:[#allocation105_spill] sm:$0xff] %v3155_v51  ;;  %6282 = vst [vmem:[#allocation106_spill] sm:$0xff] %v3158_v60  ;;  %v3216_v17 = vld [vmem:[%s2752_s6 + $0x1b0] sm:$0xff]  ;;  %v3222_v39 = vld [vmem:[%s2758_s18 + $0x178] sm:$0xff]  ;;  %v3265_v26 = vand.u32 2147483647, %v6310_v16 }
  0x75   : > { %6283 = vst [vmem:[#allocation107_spill] sm:$0xff] %v3161_v50  ;;  %6284 = vst [vmem:[#allocation108_spill] sm:$0xff] %v3164_v10  ;;  %v3219_v50 = vld [vmem:[%s2758_s18 + $0x170] sm:$0xff]  ;;  %v3225_v10 = vld [vmem:[%s2758_s18 + $0x180] sm:$0xff]  ;;  %v3294_v7 = vand.u32 2147483647, %v6318_v18 }
  0x76   : > { %6285 = vst [vmem:[#allocation109_spill] sm:$0xff] %v3167_v9  ;;  %6287 = vst [vmem:[#allocation110_spill] sm:$0xff] %v3178_v57  ;;  %v3239_v9 = vld [vmem:[%s2752_s6 + $0x1b8] sm:$0xff]  ;;  %v3242_v43 = vld [vmem:[%s2752_s6 + $0x1c0] sm:$0xff]  ;;  %v3323_v6 = vand.u32 2147483647, %v6326_v19 }
  0x77   : > { %6288 = vst [vmem:[#allocation111_spill] sm:$0xff] %v3181_v42  ;;  %6289 = vst [vmem:[#allocation112_spill] sm:$0xff] %v3184_v56  ;;  %v3245_v57 = vld [vmem:[%s2752_s6 + $0x1c8] sm:$0xff]  ;;  %v3251_v14 = vld [vmem:[%s2758_s18 + $0x190] sm:$0xff]  ;;  %v3352_v48 = vand.u32 2147483647, %v6334_v20 }
  0x78   : > { %6290 = vst [vmem:[#allocation113_spill] sm:$0xff] %v3187_v13  ;;  %6291 = vst [vmem:[#allocation114_spill] sm:$0xff] %v3190_v45  ;;  %v3248_v45 = vld [vmem:[%s2758_s18 + $0x188] sm:$0xff]  ;;  %v3271_v31 = vld [vmem:[%s2752_s6 + $0x1d8] sm:$0xff]  ;;  %v3381_v5 = vand.u32 2147483647, %v6342_v22 }
  0x79   : > { %6292 = vst [vmem:[#allocation115_spill] sm:$0xff] %v3193_v8  ;;  %6293 = vst [vmem:[#allocation116_spill] sm:$0xff] %v3196_v53  ;;  %v3254_v8 = vld [vmem:[%s2758_s18 + $0x198] sm:$0xff]  ;;  %v3268_v53 = vld [vmem:[%s2752_s6 + $0x1d0] sm:$0xff]  ;;  %v3410_v4 = vand.u32 2147483647, %v6350_v23 }
  0x7a   : > { %6295 = vst [vmem:[#allocation117_spill] sm:$0xff] %v3207_v25  ;;  %6296 = vst [vmem:[#allocation118_spill] sm:$0xff] %v3210_v12  ;;  %v3274_v25 = vld [vmem:[%s2752_s6 + $0x1e0] sm:$0xff]  ;;  %v3280_v15 = vld [vmem:[%s2758_s18 + $0x1a8] sm:$0xff]  ;;  %v3439_v41 = vand.u32 2147483647, %v6358_v24 }
  0x7b   : > { %6297 = vst [vmem:[#allocation119_spill] sm:$0xff] %v3213_v54  ;;  %6298 = vst [vmem:[#allocation120_spill] sm:$0xff] %v3216_v17  ;;  %v3300_v60 = vld [vmem:[%s2752_s6 + $0x1f0] sm:$0xff]  ;;  %v3309_v16 = vld [vmem:[%s2758_s18 + $0x1c0] sm:$0xff]  ;;  %v3468_v3 = vand.u32 2147483647, %v6366_v27 }
  0x7c   : > { %6299 = vst [vmem:[#allocation121_spill] sm:$0xff] %v3219_v50  ;;  %6300 = vst [vmem:[#allocation122_spill] sm:$0xff] %v3222_v39  ;;  %v3277_v50 = vld [vmem:[%s2758_s18 + $0x1a0] sm:$0xff]  ;;  %v3283_v39 = vld [vmem:[%s2758_s18 + $0x1b0] sm:$0xff]  ;;  %v3497_v2 = vand.u32 2147483647, %v6374_v28 }
  0x7d   : > { %6301 = vst [vmem:[#allocation123_spill] sm:$0xff] %v3225_v10  ;;  %6303 = vst [vmem:[#allocation124_spill] sm:$0xff] %v3236_v21  ;;  %v3297_v10 = vld [vmem:[%s2752_s6 + $0x1e8] sm:$0xff]  ;;  %v3303_v21 = vld [vmem:[%s2752_s6 + $0x1f8] sm:$0xff]  ;;  %v3526_v36 = vand.u32 2147483647, %v6382_v29 }
  0x7e   : > { %6304 = vst [vmem:[#allocation125_spill] sm:$0xff] %v3239_v9  ;;  %6305 = vst [vmem:[#allocation126_spill] sm:$0xff] %v3242_v43  ;;  %v3329_v13 = vld [vmem:[%s2752_s6 + $0x208] sm:$0xff]  ;;  %v3338_v18 = vld [vmem:[%s2758_s18 + $0x1d8] sm:$0xff]  ;;  %v3555_v1 = vand.u32 2147483647, %v6390_v32 }
  0x7f   : > { %6306 = vst [vmem:[#allocation127_spill] sm:$0xff] %v3245_v57  ;;  %6307 = vst [vmem:[#allocation128_spill] sm:$0xff] %v3248_v45  ;;  %v3306_v45 = vld [vmem:[%s2758_s18 + $0x1b8] sm:$0xff]  ;;  %v3358_v17 = vld [vmem:[%s2752_s6 + $0x220] sm:$0xff] }
  0x80   : > { %6308 = vst [vmem:[#allocation129_spill] sm:$0xff] %v3251_v14  ;;  %6309 = vst [vmem:[#allocation130_spill] sm:$0xff] %v3254_v8  ;;  %v3312_v14 = vld [vmem:[%s2758_s18 + $0x1c8] sm:$0xff]  ;;  %v3326_v8 = vld [vmem:[%s2752_s6 + $0x200] sm:$0xff] }
  0x81   : > { %6311 = vst [vmem:[#allocation131_spill] sm:$0xff] %v3265_v26  ;;  %6312 = vst [vmem:[#allocation132_spill] sm:$0xff] %v3268_v53  ;;  %v3332_v26 = vld [vmem:[%s2752_s6 + $0x210] sm:$0xff]  ;;  %v3387_v57 = vld [vmem:[%s2752_s6 + $0x238] sm:$0xff] }
  0x82   : > { %6313 = vst [vmem:[#allocation133_spill] sm:$0xff] %v3271_v31  ;;  %6314 = vst [vmem:[#allocation134_spill] sm:$0xff] %v3274_v25  ;;  %v3367_v19 = vld [vmem:[%s2758_s18 + $0x1f0] sm:$0xff]  ;;  %v3396_v20 = vld [vmem:[%s2758_s18 + $0x208] sm:$0xff] }
  0x83   : > { %6315 = vst [vmem:[#allocation135_spill] sm:$0xff] %v3277_v50  ;;  %6316 = vst [vmem:[#allocation136_spill] sm:$0xff] %v3280_v15  ;;  %v3335_v50 = vld [vmem:[%s2758_s18 + $0x1d0] sm:$0xff]  ;;  %v3341_v15 = vld [vmem:[%s2758_s18 + $0x1e0] sm:$0xff] }
  0x84   : > { %6317 = vst [vmem:[#allocation137_spill] sm:$0xff] %v3283_v39  ;;  %6319 = vst [vmem:[#allocation138_spill] sm:$0xff] %v3294_v7  ;;  %v3355_v39 = vld [vmem:[%s2752_s6 + $0x218] sm:$0xff]  ;;  %v3361_v7 = vld [vmem:[%s2752_s6 + $0x228] sm:$0xff] }
  0x85   : > { %6320 = vst [vmem:[#allocation139_spill] sm:$0xff] %v3297_v10  ;;  %6321 = vst [vmem:[#allocation140_spill] sm:$0xff] %v3300_v60  ;;  %v3416_v25 = vld [vmem:[%s2752_s6 + $0x250] sm:$0xff]  ;;  %v3425_v22 = vld [vmem:[%s2758_s18 + $0x220] sm:$0xff] }
  0x86   : > { %6322 = vst [vmem:[#allocation141_spill] sm:$0xff] %v3303_v21  ;;  %6323 = vst [vmem:[#allocation142_spill] sm:$0xff] %v3306_v45  ;;  %v3364_v45 = vld [vmem:[%s2758_s18 + $0x1e8] sm:$0xff]  ;;  %v3454_v23 = vld [vmem:[%s2758_s18 + $0x238] sm:$0xff] }
  0x87   : > { %6324 = vst [vmem:[#allocation143_spill] sm:$0xff] %v3309_v16  ;;  %6325 = vst [vmem:[#allocation144_spill] sm:$0xff] %v3312_v14  ;;  %v3370_v16 = vld [vmem:[%s2758_s18 + $0x1f8] sm:$0xff]  ;;  %v3384_v14 = vld [vmem:[%s2752_s6 + $0x230] sm:$0xff] }
  0x88   : > { %6327 = vst [vmem:[#allocation145_spill] sm:$0xff] %v3323_v6  ;;  %6328 = vst [vmem:[#allocation146_spill] sm:$0xff] %v3326_v8  ;;  %v3390_v6 = vld [vmem:[%s2752_s6 + $0x240] sm:$0xff]  ;;  %v3445_v21 = vld [vmem:[%s2752_s6 + $0x268] sm:$0xff] }
  0x89   : > { %6329 = vst [vmem:[#allocation147_spill] sm:$0xff] %v3329_v13  ;;  %6330 = vst [vmem:[#allocation148_spill] sm:$0xff] %v3332_v26  ;;  %v3474_v26 = vld [vmem:[%s2752_s6 + $0x280] sm:$0xff]  ;;  %v3483_v24 = vld [vmem:[%s2758_s18 + $0x250] sm:$0xff] }
  0x8a   : > { %6331 = vst [vmem:[#allocation149_spill] sm:$0xff] %v3335_v50  ;;  %6332 = vst [vmem:[#allocation150_spill] sm:$0xff] %v3338_v18  ;;  %v3393_v50 = vld [vmem:[%s2758_s18 + $0x200] sm:$0xff]  ;;  %v3399_v18 = vld [vmem:[%s2758_s18 + $0x210] sm:$0xff] }
  0x8b   : > { %6333 = vst [vmem:[#allocation151_spill] sm:$0xff] %v3341_v15  ;;  %6335 = vst [vmem:[#allocation152_spill] sm:$0xff] %v3352_v48  ;;  %v3413_v15 = vld [vmem:[%s2752_s6 + $0x248] sm:$0xff]  ;;  %v3419_v48 = vld [vmem:[%s2752_s6 + $0x258] sm:$0xff] }
  0x8c   : > { %6336 = vst [vmem:[#allocation153_spill] sm:$0xff] %v3355_v39  ;;  %6337 = vst [vmem:[#allocation154_spill] sm:$0xff] %v3358_v17  ;;  %v3512_v27 = vld [vmem:[%s2758_s18 + $0x268] sm:$0xff]  ;;  %v3541_v28 = vld [vmem:[%s2758_s18 + $0x280] sm:$0xff] }
  0x8d   : > { %6338 = vst [vmem:[#allocation155_spill] sm:$0xff] %v3361_v7  ;;  %6339 = vst [vmem:[#allocation156_spill] sm:$0xff] %v3364_v45  ;;  %v3422_v45 = vld [vmem:[%s2758_s18 + $0x218] sm:$0xff]  ;;  %v3567_v29 = vld [vmem:[%s2758_s18 + $0x2a0] sm:$0xff] }
  0x8e   : > { %6340 = vst [vmem:[#allocation157_spill] sm:$0xff] %v3367_v19  ;;  %6341 = vst [vmem:[#allocation158_spill] sm:$0xff] %v3370_v16  ;;  %v3428_v19 = vld [vmem:[%s2758_s18 + $0x228] sm:$0xff]  ;;  %v3442_v16 = vld [vmem:[%s2752_s6 + $0x260] sm:$0xff] }
  0x8f   : > { %6343 = vst [vmem:[#allocation159_spill] sm:$0xff] %v3381_v5  ;;  %6344 = vst [vmem:[#allocation160_spill] sm:$0xff] %v3384_v14  ;;  %v3448_v5 = vld [vmem:[%s2752_s6 + $0x270] sm:$0xff]  ;;  %v3503_v7 = vld [vmem:[%s2752_s6 + $0x298] sm:$0xff] }
  0x90   : > { %6345 = vst [vmem:[#allocation161_spill] sm:$0xff] %v3387_v57  ;;  %6346 = vst [vmem:[#allocation162_spill] sm:$0xff] %v3390_v6  ;;  %v3532_v6 = vld [vmem:[%s2752_s6 + $0x2b0] sm:$0xff]  ;;  %v3535_v57 = vld [vmem:[%s2752_s6 + $0x2b8] sm:$0xff] }
  0x91   : > { %6347 = vst [vmem:[#allocation163_spill] sm:$0xff] %v3393_v50  ;;  %6348 = vst [vmem:[#allocation164_spill] sm:$0xff] %v3396_v20  ;;  %v3451_v50 = vld [vmem:[%s2758_s18 + $0x230] sm:$0xff]  ;;  %v3457_v20 = vld [vmem:[%s2758_s18 + $0x240] sm:$0xff] }
  0x92   : > { %6349 = vst [vmem:[#allocation165_spill] sm:$0xff] %v3399_v18  ;;  %6351 = vst [vmem:[#allocation166_spill] sm:$0xff] %v3410_v4  ;;  %v3471_v18 = vld [vmem:[%s2752_s6 + $0x278] sm:$0xff]  ;;  %v3477_v4 = vld [vmem:[%s2752_s6 + $0x288] sm:$0xff] }
  0x93   : > { %6352 = vst [vmem:[#allocation167_spill] sm:$0xff] %v3413_v15  ;;  %6353 = vst [vmem:[#allocation168_spill] sm:$0xff] %v3416_v25  ;;  %v3564_v25 = vld [vmem:[%s2758_s18 + $0x298] sm:$0xff]  ;;  %v3581_v63 = vld [vmem:[%s2752_s6 + $0x2c8] sm:$0xff] }
  0x94   : > { %6354 = vst [vmem:[#allocation169_spill] sm:$0xff] %v3419_v48  ;;  %6355 = vst [vmem:[#allocation170_spill] sm:$0xff] %v3422_v45  ;;  %v3480_v45 = vld [vmem:[%s2758_s18 + $0x248] sm:$0xff]  ;;  %v3561_v48 = vld [vmem:[%s2758_s18 + $0x290] sm:$0xff] }
  0x95   : > { %6356 = vst [vmem:[#allocation171_spill] sm:$0xff] %v3425_v22  ;;  %6357 = vst [vmem:[#allocation172_spill] sm:$0xff] %v3428_v19  ;;  %v3486_v22 = vld [vmem:[%s2758_s18 + $0x258] sm:$0xff]  ;;  %v3500_v19 = vld [vmem:[%s2752_s6 + $0x290] sm:$0xff] }
  0x96   : > { %6359 = vst [vmem:[#allocation173_spill] sm:$0xff] %v3439_v41  ;;  %6360 = vst [vmem:[#allocation174_spill] sm:$0xff] %v3442_v16  ;;  %v3506_v41 = vld [vmem:[%s2752_s6 + $0x2a0] sm:$0xff] }
  0x97   : > { %6361 = vst [vmem:[#allocation175_spill] sm:$0xff] %v3445_v21  ;;  %6362 = vst [vmem:[#allocation176_spill] sm:$0xff] %v3448_v5  ;;  %v3587_v5 = vld [vmem:[%s2758_s18 + $0x2b0] sm:$0xff]  ;;  %v3653_v32 = vld [vmem:[%s2758_s18 + $0x2e0] sm:$0xff] }
  0x98   : > { %6363 = vst [vmem:[#allocation177_spill] sm:$0xff] %v3451_v50  ;;  %6364 = vst [vmem:[#allocation178_spill] sm:$0xff] %v3454_v23  ;;  %v3509_v50 = vld [vmem:[%s2758_s18 + $0x260] sm:$0xff]  ;;  %v3515_v23 = vld [vmem:[%s2758_s18 + $0x270] sm:$0xff] }
  0x99   : > { %6365 = vst [vmem:[#allocation179_spill] sm:$0xff] %v3457_v20  ;;  %6367 = vst [vmem:[#allocation180_spill] sm:$0xff] %v3468_v3  ;;  %v3529_v20 = vld [vmem:[%s2752_s6 + $0x2a8] sm:$0xff]  ;;  %v3538_v3 = vld [vmem:[%s2758_s18 + $0x278] sm:$0xff] }
  0x9a   : > { %6368 = vst [vmem:[#allocation181_spill] sm:$0xff] %v3471_v18  ;;  %6369 = vst [vmem:[#allocation182_spill] sm:$0xff] %v3474_v26 }
  0x9b   : > { %6370 = vst [vmem:[#allocation183_spill] sm:$0xff] %v3477_v4  ;;  %6371 = vst [vmem:[#allocation184_spill] sm:$0xff] %v3480_v45  ;;  %v3610_v4 = vld [vmem:[%s2758_s18 + $0x2c8] sm:$0xff] }
  0x9c   : > { %6372 = vst [vmem:[#allocation185_spill] sm:$0xff] %v3483_v24  ;;  %6373 = vst [vmem:[#allocation186_spill] sm:$0xff] %v3486_v22  ;;  %v3544_v24 = vld [vmem:[%s2758_s18 + $0x288] sm:$0xff]  ;;  %v3558_v22 = vld [vmem:[%s2752_s6 + $0x2c0] sm:$0xff] }
  0x9d   : > { %6375 = vst [vmem:[#allocation187_spill] sm:$0xff] %v3497_v2  ;;  %6376 = vst [vmem:[#allocation188_spill] sm:$0xff] %v3500_v19  ;;  %v3613_v2 = vld [vmem:[%s2758_s18 + $0x2d0] sm:$0xff] }
  0x9e   : > { %6377 = vst [vmem:[#allocation189_spill] sm:$0xff] %v3503_v7  ;;  %6378 = vst [vmem:[#allocation190_spill] sm:$0xff] %v3506_v41  ;;  %v3627_v41 = vld [vmem:[%s2752_s6 + $0x2d8] sm:$0xff] }
  0x9f   : > { %6379 = vst [vmem:[#allocation191_spill] sm:$0xff] %v3509_v50  ;;  %6380 = vst [vmem:[#allocation192_spill] sm:$0xff] %v3512_v27 }
  0xa0   : > { %6381 = vst [vmem:[#allocation193_spill] sm:$0xff] %v3515_v23  ;;  %6383 = vst [vmem:[#allocation194_spill] sm:$0xff] %v3526_v36  ;;  %v3584_v23 = vld [vmem:[%s2758_s18 + $0x2a8] sm:$0xff]  ;;  %v3590_v36 = vld [vmem:[%s2758_s18 + $0x2b8] sm:$0xff] }
  0xa1   : > { %6384 = vst [vmem:[#allocation195_spill] sm:$0xff] %v3529_v20  ;;  %6385 = vst [vmem:[#allocation196_spill] sm:$0xff] %v3532_v6 }
  0xa2   : > { %6386 = vst [vmem:[#allocation197_spill] sm:$0xff] %v3535_v57  ;;  %6387 = vst [vmem:[#allocation198_spill] sm:$0xff] %v3538_v3 }
  0xa3   : > { %6388 = vst [vmem:[#allocation199_spill] sm:$0xff] %v3541_v28  ;;  %6389 = vst [vmem:[#allocation200_spill] sm:$0xff] %v3544_v24  ;;  %v3607_v24 = vld [vmem:[%s2758_s18 + $0x2c0] sm:$0xff] }
  0xa4   : > { %6391 = vst [vmem:[#allocation201_spill] sm:$0xff] %v3555_v1  ;;  %6392 = vst [vmem:[#allocation202_spill] sm:$0xff] %v3558_v22  ;;  %v6396_v1 = vsub.f32 %v2849_v34, %v3061_v55  ;;  %v3604_v55 = vld [vmem:[%s2752_s6 + $0x2d0] sm:$0xff] }
  0xa5   : > { %6393 = vst [vmem:[#allocation203_spill] sm:$0xff] %v3561_v48  ;;  %6394 = vst [vmem:[#allocation204_spill] sm:$0xff] %v3564_v25  ;;  %v3630_v25 = vld [vmem:[%s2758_s18 + $0x2d8] sm:$0xff] }
  0xa6   : > { %6395 = vst [vmem:[#allocation205_spill] sm:$0xff] %v3567_v29  ;;  %v3578_v33 = vand.u32 2147483647, %v6396_v1  ;;  %6398 = vst [vmem:[#allocation207_spill] sm:$0xff] %v3581_v63 }
  0xa7   : > { %6399 = vst [vmem:[#allocation208_spill] sm:$0xff] %v3584_v23  ;;  %6400 = vst [vmem:[#allocation209_spill] sm:$0xff] %v3587_v5  ;;  %v6413_v23 = vsub.f32 %v2861_v40, %v3078_v47  ;;  %v3650_v5 = vld [vmem:[%s2752_s6 + $0x2e0] sm:$0xff]  ;;  %v3673_v47 = vld [vmem:[%s2752_s6 + $0x2e8] sm:$0xff] }
  0xa8   : > { %6397 = vst [vmem:[#allocation206_spill] sm:$0xff] %v3578_v33  ;;  %6401 = vst [vmem:[#allocation210_spill] sm:$0xff] %v3590_v36  ;;  %v6402_v33 = vsub.f32 %v2855_v38, %v3064_v59  ;;  %v6408_v38 = vld [vmem:[#allocation84_spill] sm:$0xff]  ;;  %v3676_v40 = vld [vmem:[%s2758_s18 + $0x2e8] sm:$0xff] }
  0xa9   : > { %6404 = vst [vmem:[#allocation212_spill] sm:$0xff] %v3604_v55  ;;  %6405 = vst [vmem:[#allocation213_spill] sm:$0xff] %v3610_v4  ;;  %v3637_v1 = vand.u32 2147483647, %v6413_v23  ;;  %v6424_v23 = vsub.f32 %v2873_v46, %v3095_v30  ;;  %v3696_v30 = vld [vmem:[%s2752_s6 + $0x2f0] sm:$0xff] }
  0xaa   : > { %v3601_v34 = vand.u32 2147483647, %v6402_v33  ;;  %6406 = vst [vmem:[#allocation214_spill] sm:$0xff] %v3613_v2  ;;  %6411 = vst [vmem:[#allocation216_spill] sm:$0xff] %v3627_v41  ;;  %v6415_v33 = vld [vmem:[#allocation87_spill] sm:$0xff]  ;;  %v3699_v46 = vld [vmem:[%s2758_s18 + $0x2f0] sm:$0xff] }
  0xab   : > { %6412 = vst [vmem:[#allocation217_spill] sm:$0xff] %v3630_v25  ;;  %6414 = vst [vmem:[#allocation218_spill] sm:$0xff] %v3637_v1  ;;  %v6416_v36 = vsub.f32 %v2867_v44, %v6415_v33  ;;  %v3660_v1 = vand.u32 2147483647, %v6424_v23  ;;  %v6436_v23 = vsub.f32 %v2885_v52, %v3112_v37  ;;  %v3719_v37 = vld [vmem:[%s2752_s6 + $0x2f8] sm:$0xff] }
  0xac   : > { %6403 = vst [vmem:[#allocation211_spill] sm:$0xff] %v3601_v34  ;;  %v6407_v34 = vld [vmem:[#allocation38_spill] sm:$0xff]  ;;  %6422 = vst [vmem:[#allocation221_spill] sm:$0xff] %v3650_v5  ;;  %v3722_v52 = vld [vmem:[%s2758_s18 + $0x2f8] sm:$0xff] }
  0xad   : > { %v6409_v59 = vsub.f32 %v6407_v34, %v6408_v38  ;;  %v3642_v34 = vand.u32 2147483647, %v6416_v36  ;;  %6423 = vst [vmem:[#allocation222_spill] sm:$0xff] %v3653_v32  ;;  %6425 = vst [vmem:[#allocation223_spill] sm:$0xff] %v3660_v1  ;;  %v6426_v36 = vld [vmem:[#allocation43_spill] sm:$0xff] }
  0xae   : > { %6434 = vst [vmem:[#allocation226_spill] sm:$0xff] %v3673_v47  ;;  %6435 = vst [vmem:[#allocation227_spill] sm:$0xff] %v3676_v40  ;;  %v3683_v1 = vand.u32 2147483647, %v6436_v23  ;;  %v6448_v23 = vld [vmem:[#allocation100_spill] sm:$0xff] }
  0xaf   : > { %v3624_v29 = vand.u32 2147483647, %v6409_v59  ;;  %6417 = vst [vmem:[#allocation219_spill] sm:$0xff] %v3642_v34  ;;  %v6418_v59 = vld [vmem:[#allocation41_spill] sm:$0xff]  ;;  %v6427_v34 = vld [vmem:[#allocation91_spill] sm:$0xff]  ;;  %6446 = vst [vmem:[#allocation231_spill] sm:$0xff] %v3696_v30 }
  0xb0   : > { %v6428_v44 = vsub.f32 %v6426_v36, %v6427_v34  ;;  %6437 = vst [vmem:[#allocation228_spill] sm:$0xff] %v3683_v1  ;;  %6447 = vst [vmem:[#allocation232_spill] sm:$0xff] %v3699_v46  ;;  %v6449_v1 = vsub.f32 %v2900_v61, %v6448_v23  ;;  %v3742_v23 = vld [vmem:[%s2752_s6 + $0x300] sm:$0xff] }
  0xb1   : > { %6410 = vst [vmem:[#allocation215_spill] sm:$0xff] %v3624_v29  ;;  %v6419_v29 = vld [vmem:[#allocation88_spill] sm:$0xff]  ;;  %6458 = vst [vmem:[#allocation236_spill] sm:$0xff] %v3719_v37  ;;  %v3745_v61 = vld [vmem:[%s2758_s18 + $0x300] sm:$0xff] }
  0xb2   : > { %v6420_v38 = vsub.f32 %v6418_v59, %v6419_v29  ;;  %v3665_v59 = vand.u32 2147483647, %v6428_v44  ;;  %v6438_v44 = vld [vmem:[#allocation46_spill] sm:$0xff]  ;;  %6459 = vst [vmem:[#allocation237_spill] sm:$0xff] %v3722_v52  ;;  %6470 = vst [vmem:[#allocation241_spill] sm:$0xff] %v3742_v23 }
  0xb3   : > { %6471 = vst [vmem:[#allocation242_spill] sm:$0xff] %v3745_v61 }
  0xb4   : > { %v3647_v57 = vand.u32 2147483647, %v6420_v38  ;;  %6429 = vst [vmem:[#allocation224_spill] sm:$0xff] %v3665_v59  ;;  %v6430_v38 = vld [vmem:[#allocation44_spill] sm:$0xff]  ;;  %v6439_v59 = vld [vmem:[#allocation95_spill] sm:$0xff] }
  0xb5   : > { %v6440_v36 = vsub.f32 %v6438_v44, %v6439_v59  ;;  %v3706_v44 = vand.u32 2147483647, %v6449_v1  ;;  %v6460_v1 = vld [vmem:[#allocation107_spill] sm:$0xff] }
  0xb6   : > { %6421 = vst [vmem:[#allocation220_spill] sm:$0xff] %v3647_v57  ;;  %v6431_v57 = vld [vmem:[#allocation92_spill] sm:$0xff] }
  0xb7   : > { %v6432_v29 = vsub.f32 %v6430_v38, %v6431_v57  ;;  %v3688_v38 = vand.u32 2147483647, %v6440_v36  ;;  %6450 = vst [vmem:[#allocation233_spill] sm:$0xff] %v3706_v44  ;;  %v6451_v36 = vld [vmem:[#allocation101_spill] sm:$0xff]  ;;  %v6461_v44 = vsub.f32 %v2912_v58, %v6460_v1  ;;  %v3765_v1 = vld [vmem:[%s2752_s6 + $0x308] sm:$0xff] }
  0xb8   : > { %6482 = vst [vmem:[#allocation246_spill] sm:$0xff] %v3765_v1  ;;  %v3768_v58 = vld [vmem:[%s2758_s18 + $0x308] sm:$0xff] }
  0xb9   : > { %v3670_v33 = vand.u32 2147483647, %v6432_v29  ;;  %6441 = vst [vmem:[#allocation229_spill] sm:$0xff] %v3688_v38  ;;  %v6442_v29 = vld [vmem:[#allocation47_spill] sm:$0xff]  ;;  %v6452_v38 = vsub.f32 %v2903_v62, %v6451_v36  ;;  %v3729_v62 = vand.u32 2147483647, %v6461_v44 }
  0xba   : > { %v6472_v44 = vld [vmem:[#allocation114_spill] sm:$0xff]  ;;  %6483 = vst [vmem:[#allocation247_spill] sm:$0xff] %v3768_v58 }
  0xbb   : > { %6433 = vst [vmem:[#allocation225_spill] sm:$0xff] %v3670_v33  ;;  %v6443_v33 = vld [vmem:[#allocation96_spill] sm:$0xff]  ;;  %6462 = vst [vmem:[#allocation238_spill] sm:$0xff] %v3729_v62  ;;  %v6473_v62 = vsub.f32 %v2933_v0, %v6472_v44 }
  0xbc   : > { %v6444_v57 = vsub.f32 %v6442_v29, %v6443_v33  ;;  %v3711_v29 = vand.u32 2147483647, %v6452_v38  ;;  %v6463_v38 = vld [vmem:[#allocation108_spill] sm:$0xff] }
  0xbd   : > { %v3791_v0 = vld [vmem:[%s2758_s18 + $0x310] sm:$0xff] }
  0xbe   : > { %v3693_v34 = vand.u32 2147483647, %v6444_v57  ;;  %6453 = vst [vmem:[#allocation234_spill] sm:$0xff] %v3711_v29  ;;  %v6454_v57 = vld [vmem:[#allocation50_spill] sm:$0xff]  ;;  %v6464_v29 = vsub.f32 %v2918_v49, %v6463_v38  ;;  %v3752_v49 = vand.u32 2147483647, %v6473_v62 }
  0xbf   : > { %v6484_v62 = vld [vmem:[#allocation121_spill] sm:$0xff]  ;;  %6495 = vst [vmem:[#allocation252_spill] sm:$0xff] %v3791_v0 }
  0xc0   : > { %6445 = vst [vmem:[#allocation230_spill] sm:$0xff] %v3693_v34  ;;  %v6455_v34 = vld [vmem:[#allocation102_spill] sm:$0xff]  ;;  %6474 = vst [vmem:[#allocation243_spill] sm:$0xff] %v3752_v49  ;;  %v6485_v49 = vsub.f32 %v3152_v35, %v6484_v62  ;;  %v3811_v35 = vld [vmem:[%s2752_s6 + $0x318] sm:$0xff] }
  0xc1   : > { %v6456_v33 = vsub.f32 %v6454_v57, %v6455_v34  ;;  %v3734_v57 = vand.u32 2147483647, %v6464_v29  ;;  %v6475_v29 = vld [vmem:[#allocation115_spill] sm:$0xff]  ;;  %6506 = vst [vmem:[#allocation256_spill] sm:$0xff] %v3811_v35  ;;  %v3814_v62 = vld [vmem:[%s2758_s18 + $0x318] sm:$0xff] }
  0xc2   : > { %6507 = vst [vmem:[#allocation257_spill] sm:$0xff] %v3814_v62 }
  0xc3   : > { %v3716_v59 = vand.u32 2147483647, %v6456_v33  ;;  %6465 = vst [vmem:[#allocation239_spill] sm:$0xff] %v3734_v57  ;;  %v6466_v33 = vld [vmem:[#allocation53_spill] sm:$0xff]  ;;  %v6476_v57 = vsub.f32 %v3129_v11, %v6475_v29  ;;  %v3775_v29 = vand.u32 2147483647, %v6485_v49 }
  0xc4   : > { %v3788_v11 = vld [vmem:[%s2752_s6 + $0x310] sm:$0xff] }
  0xc5   : > { %6457 = vst [vmem:[#allocation235_spill] sm:$0xff] %v3716_v59  ;;  %v6467_v59 = vld [vmem:[#allocation109_spill] sm:$0xff]  ;;  %6486 = vst [vmem:[#allocation248_spill] sm:$0xff] %v3775_v29  ;;  %v6496_v49 = vld [vmem:[#allocation128_spill] sm:$0xff] }
  0xc6   : > { %v6468_v34 = vsub.f32 %v6466_v33, %v6467_v59  ;;  %v3757_v33 = vand.u32 2147483647, %v6476_v57  ;;  %v6487_v57 = vld [vmem:[#allocation122_spill] sm:$0xff]  ;;  %6494 = vst [vmem:[#allocation251_spill] sm:$0xff] %v3788_v11  ;;  %v6497_v29 = vsub.f32 %v3181_v42, %v6496_v49 }
  0xc7   : > { %v3834_v42 = vld [vmem:[%s2752_s6 + $0x320] sm:$0xff] }
  0xc8   : > { %v3739_v36 = vand.u32 2147483647, %v6468_v34  ;;  %6477 = vst [vmem:[#allocation244_spill] sm:$0xff] %v3757_v33  ;;  %v6478_v34 = vld [vmem:[#allocation99_spill] sm:$0xff]  ;;  %v6488_v33 = vsub.f32 %v3155_v51, %v6487_v57  ;;  %v3798_v57 = vand.u32 2147483647, %v6497_v29 }
  0xc9   : > { %v6508_v29 = vld [vmem:[#allocation135_spill] sm:$0xff]  ;;  %6518 = vst [vmem:[#allocation261_spill] sm:$0xff] %v3834_v42  ;;  %v3837_v49 = vld [vmem:[%s2758_s18 + $0x320] sm:$0xff] }
  0xca   : > { %6469 = vst [vmem:[#allocation240_spill] sm:$0xff] %v3739_v36  ;;  %v6479_v36 = vld [vmem:[#allocation116_spill] sm:$0xff]  ;;  %6498 = vst [vmem:[#allocation253_spill] sm:$0xff] %v3798_v57  ;;  %v6509_v57 = vsub.f32 %v3210_v12, %v6508_v29  ;;  %v3857_v12 = vld [vmem:[%s2752_s6 + $0x328] sm:$0xff] }
  0xcb   : > { %v6480_v59 = vsub.f32 %v6478_v34, %v6479_v36  ;;  %v3780_v36 = vand.u32 2147483647, %v6488_v33  ;;  %v6499_v33 = vld [vmem:[#allocation129_spill] sm:$0xff]  ;;  %6519 = vst [vmem:[#allocation262_spill] sm:$0xff] %v3837_v49  ;;  %6530 = vst [vmem:[#allocation266_spill] sm:$0xff] %v3857_v12  ;;  %v3860_v29 = vld [vmem:[%s2758_s18 + $0x328] sm:$0xff] }
  0xcc   : > { %6531 = vst [vmem:[#allocation267_spill] sm:$0xff] %v3860_v29 }
  0xcd   : > { %v3762_v38 = vand.u32 2147483647, %v6480_v59  ;;  %6489 = vst [vmem:[#allocation249_spill] sm:$0xff] %v3780_v36  ;;  %v6490_v59 = vld [vmem:[#allocation106_spill] sm:$0xff]  ;;  %v6500_v36 = vsub.f32 %v3184_v56, %v6499_v33  ;;  %v3821_v33 = vand.u32 2147483647, %v6509_v57 }
  0xce   : > { %v6520_v57 = vld [vmem:[#allocation142_spill] sm:$0xff] }
  0xcf   : > { %6481 = vst [vmem:[#allocation245_spill] sm:$0xff] %v3762_v38  ;;  %v6491_v38 = vld [vmem:[#allocation123_spill] sm:$0xff]  ;;  %6510 = vst [vmem:[#allocation258_spill] sm:$0xff] %v3821_v33  ;;  %v6521_v33 = vsub.f32 %v3239_v9, %v6520_v57  ;;  %v3880_v9 = vld [vmem:[%s2752_s6 + $0x330] sm:$0xff] }
  0xd0   : > { %v6492_v44 = vsub.f32 %v6490_v59, %v6491_v38  ;;  %v3803_v38 = vand.u32 2147483647, %v6500_v36  ;;  %v6511_v36 = vld [vmem:[#allocation136_spill] sm:$0xff]  ;;  %6542 = vst [vmem:[#allocation271_spill] sm:$0xff] %v3880_v9 }
  0xd1   : > { %v3883_v57 = vld [vmem:[%s2758_s18 + $0x330] sm:$0xff] }
  0xd2   : > { %v3785_v34 = vand.u32 2147483647, %v6492_v44  ;;  %6501 = vst [vmem:[#allocation254_spill] sm:$0xff] %v3803_v38  ;;  %v6502_v44 = vld [vmem:[#allocation113_spill] sm:$0xff]  ;;  %v6512_v38 = vsub.f32 %v3213_v54, %v6511_v36  ;;  %v3844_v36 = vand.u32 2147483647, %v6521_v33 }
  0xd3   : > { %v6532_v33 = vld [vmem:[#allocation149_spill] sm:$0xff]  ;;  %6543 = vst [vmem:[#allocation272_spill] sm:$0xff] %v3883_v57 }
  0xd4   : > { %6493 = vst [vmem:[#allocation250_spill] sm:$0xff] %v3785_v34  ;;  %v6503_v34 = vld [vmem:[#allocation130_spill] sm:$0xff]  ;;  %6522 = vst [vmem:[#allocation263_spill] sm:$0xff] %v3844_v36  ;;  %v6533_v36 = vsub.f32 %v3268_v53, %v6532_v33  ;;  %v3903_v53 = vld [vmem:[%s2752_s6 + $0x338] sm:$0xff] }
  0xd5   : > { %v6504_v59 = vsub.f32 %v6502_v44, %v6503_v34  ;;  %v3826_v34 = vand.u32 2147483647, %v6512_v38  ;;  %v6523_v38 = vld [vmem:[#allocation143_spill] sm:$0xff]  ;;  %6554 = vst [vmem:[#allocation276_spill] sm:$0xff] %v3903_v53  ;;  %v3906_v33 = vld [vmem:[%s2758_s18 + $0x338] sm:$0xff] }
  0xd6   : > { %6555 = vst [vmem:[#allocation277_spill] sm:$0xff] %v3906_v33 }
  0xd7   : > { %v3808_v51 = vand.u32 2147483647, %v6504_v59  ;;  %6513 = vst [vmem:[#allocation259_spill] sm:$0xff] %v3826_v34  ;;  %v6514_v59 = vld [vmem:[#allocation120_spill] sm:$0xff]  ;;  %v6524_v34 = vsub.f32 %v3242_v43, %v6523_v38  ;;  %v3867_v38 = vand.u32 2147483647, %v6533_v36 }
  0xd8   : > { %v6544_v36 = vld [vmem:[#allocation156_spill] sm:$0xff] }
  0xd9   : > { %6505 = vst [vmem:[#allocation255_spill] sm:$0xff] %v3808_v51  ;;  %v6515_v51 = vld [vmem:[#allocation137_spill] sm:$0xff]  ;;  %6534 = vst [vmem:[#allocation268_spill] sm:$0xff] %v3867_v38  ;;  %v6545_v38 = vsub.f32 %v3297_v10, %v6544_v36  ;;  %v3926_v10 = vld [vmem:[%s2752_s6 + $0x340] sm:$0xff] }
  0xda   : > { %v6516_v44 = vsub.f32 %v6514_v59, %v6515_v51  ;;  %v3849_v51 = vand.u32 2147483647, %v6524_v34  ;;  %v6535_v34 = vld [vmem:[#allocation150_spill] sm:$0xff]  ;;  %6566 = vst [vmem:[#allocation281_spill] sm:$0xff] %v3926_v10 }
  0xdb   : > { %v3929_v36 = vld [vmem:[%s2758_s18 + $0x340] sm:$0xff] }
  0xdc   : > { %v3831_v56 = vand.u32 2147483647, %v6516_v44  ;;  %6525 = vst [vmem:[#allocation264_spill] sm:$0xff] %v3849_v51  ;;  %v6526_v44 = vld [vmem:[#allocation127_spill] sm:$0xff]  ;;  %v6536_v51 = vsub.f32 %v3271_v31, %v6535_v34  ;;  %v3890_v34 = vand.u32 2147483647, %v6545_v38 }
  0xdd   : > { %v6556_v38 = vld [vmem:[#allocation163_spill] sm:$0xff]  ;;  %6567 = vst [vmem:[#allocation282_spill] sm:$0xff] %v3929_v36 }
  0xde   : > { %6517 = vst [vmem:[#allocation260_spill] sm:$0xff] %v3831_v56  ;;  %v6527_v56 = vld [vmem:[#allocation144_spill] sm:$0xff]  ;;  %6546 = vst [vmem:[#allocation273_spill] sm:$0xff] %v3890_v34  ;;  %v6557_v34 = vsub.f32 %v3326_v8, %v6556_v38  ;;  %v587_v38 = vsub.f32 %v3857_v12, %v3860_v29  ;;  %v3949_v8 = vld [vmem:[%s2752_s6 + $0x348] sm:$0xff] }
  0xdf   : > { %v6528_v59 = vsub.f32 %v6526_v44, %v6527_v56  ;;  %v3872_v56 = vand.u32 2147483647, %v6536_v51  ;;  %v6547_v51 = vld [vmem:[#allocation157_spill] sm:$0xff]  ;;  %6578 = vst [vmem:[#allocation286_spill] sm:$0xff] %v3949_v8  ;;  %v3952_v29 = vld [vmem:[%s2758_s18 + $0x348] sm:$0xff] }
  0xe0   : > { %6579 = vst [vmem:[#allocation287_spill] sm:$0xff] %v3952_v29 }
  0xe1   : > { %v3854_v54 = vand.u32 2147483647, %v6528_v59  ;;  %6537 = vst [vmem:[#allocation269_spill] sm:$0xff] %v3872_v56  ;;  %v6538_v59 = vld [vmem:[#allocation134_spill] sm:$0xff]  ;;  %v6548_v56 = vsub.f32 %v3300_v60, %v6547_v51  ;;  %v3913_v51 = vand.u32 2147483647, %v6557_v34 }
  0xe2   : > { %v6568_v34 = vld [vmem:[#allocation170_spill] sm:$0xff] }
  0xe3   : > { %6529 = vst [vmem:[#allocation265_spill] sm:$0xff] %v3854_v54  ;;  %v6539_v54 = vld [vmem:[#allocation151_spill] sm:$0xff]  ;;  %6558 = vst [vmem:[#allocation278_spill] sm:$0xff] %v3913_v51  ;;  %v6569_v51 = vsub.f32 %v3355_v39, %v6568_v34  ;;  %v588_v34 = vsub.f32 %v3880_v9, %v3883_v57  ;;  %v3972_v39 = vld [vmem:[%s2752_s6 + $0x350] sm:$0xff] }
  0xe4   : > { %v6540_v44 = vsub.f32 %v6538_v59, %v6539_v54  ;;  %v3895_v54 = vand.u32 2147483647, %v6548_v56  ;;  %v6559_v56 = vld [vmem:[#allocation164_spill] sm:$0xff]  ;;  %6591 = vst [vmem:[#allocation291_spill] sm:$0xff] %v3972_v39 }
  0xe5   : > { %v3975_v57 = vld [vmem:[%s2758_s18 + $0x350] sm:$0xff] }
  0xe6   : > { %v3877_v43 = vand.u32 2147483647, %v6540_v44  ;;  %6549 = vst [vmem:[#allocation274_spill] sm:$0xff] %v3895_v54  ;;  %v6550_v44 = vld [vmem:[#allocation141_spill] sm:$0xff]  ;;  %v6560_v54 = vsub.f32 %v3329_v13, %v6559_v56  ;;  %v3936_v56 = vand.u32 2147483647, %v6569_v51 }
  0xe7   : > { %v6580_v51 = vld [vmem:[#allocation177_spill] sm:$0xff]  ;;  %6592 = vst [vmem:[#allocation292_spill] sm:$0xff] %v3975_v57 }
  0xe8   : > { %6541 = vst [vmem:[#allocation270_spill] sm:$0xff] %v3877_v43  ;;  %v6551_v43 = vld [vmem:[#allocation158_spill] sm:$0xff]  ;;  %6570 = vst [vmem:[#allocation283_spill] sm:$0xff] %v3936_v56  ;;  %v6581_v56 = vsub.f32 %v3384_v14, %v6580_v51  ;;  %v589_v51 = vsub.f32 %v3903_v53, %v3906_v33  ;;  %v3998_v33 = vld [vmem:[%s2758_s18 + $0x358] sm:$0xff] }
  0xe9   : > { %v6552_v59 = vsub.f32 %v6550_v44, %v6551_v43  ;;  %v3918_v43 = vand.u32 2147483647, %v6560_v54  ;;  %v6571_v54 = vld [vmem:[#allocation171_spill] sm:$0xff]  ;;  %6604 = vst [vmem:[#allocation297_spill] sm:$0xff] %v3998_v33  ;;  %v4018_v53 = vld [vmem:[%s2752_s6 + $0x360] sm:$0xff] }
  0xea   : > { %6613 = vst [vmem:[#allocation301_spill] sm:$0xff] %v4018_v53  ;;  %v6775_v14 = vld [vmem:[#allocation83_spill] sm:$0xff] }
  0xeb   : > { %v3900_v31 = vand.u32 2147483647, %v6552_v59  ;;  %6561 = vst [vmem:[#allocation279_spill] sm:$0xff] %v3918_v43  ;;  %v6562_v59 = vld [vmem:[#allocation148_spill] sm:$0xff]  ;;  %v6572_v43 = vsub.f32 %v3358_v17, %v6571_v54  ;;  %v3959_v54 = vand.u32 2147483647, %v6581_v56  ;;  %v6593_v56 = vsub.f32 %v3413_v15, %v3480_v45 }
  0xec   : > { %v590_v45 = vsub.f32 %v3926_v10, %v3929_v36  ;;  %v4021_v36 = vld [vmem:[%s2758_s18 + $0x360] sm:$0xff]  ;;  %v4041_v10 = vld [vmem:[%s2752_s6 + $0x368] sm:$0xff]  ;;  %v4248_v15 = vld [vmem:[%s2752_s6 + $0x390] sm:$0xff] }
  0xed   : > { %6553 = vst [vmem:[#allocation275_spill] sm:$0xff] %v3900_v31  ;;  %v6563_v31 = vld [vmem:[#allocation165_spill] sm:$0xff]  ;;  %6582 = vst [vmem:[#allocation288_spill] sm:$0xff] %v3959_v54  ;;  %v3982_v54 = vand.u32 2147483647, %v6593_v56  ;;  %v6605_v56 = vsub.f32 %v3442_v16, %v3509_v50  ;;  %v591_v50 = vsub.f32 %v3949_v8, %v3952_v29  ;;  %v4044_v29 = vld [vmem:[%s2758_s18 + $0x368] sm:$0xff] }
  0xee   : > { %v6564_v44 = vsub.f32 %v6562_v59, %v6563_v31  ;;  %v3941_v31 = vand.u32 2147483647, %v6572_v43  ;;  %v6583_v43 = vld [vmem:[#allocation161_spill] sm:$0xff]  ;;  %6614 = vst [vmem:[#allocation302_spill] sm:$0xff] %v4021_v36  ;;  %6623 = vst [vmem:[#allocation306_spill] sm:$0xff] %v4041_v10  ;;  %v6766_v16 = vld [vmem:[#allocation14_spill] sm:$0xff] }
  0xef   : > { %6594 = vst [vmem:[#allocation293_spill] sm:$0xff] %v3982_v54  ;;  %v4005_v54 = vand.u32 2147483647, %v6605_v56  ;;  %v6615_v56 = vsub.f32 %v3471_v18, %v3538_v3  ;;  %6624 = vst [vmem:[#allocation307_spill] sm:$0xff] %v4044_v29  ;;  %v592_v3 = vsub.f32 %v3972_v39, %v3975_v57  ;;  %v6761_v18 = vld [vmem:[#allocation13_spill] sm:$0xff] }
  0xf0   : > { %v3923_v60 = vand.u32 2147483647, %v6564_v44  ;;  %6573 = vst [vmem:[#allocation284_spill] sm:$0xff] %v3941_v31  ;;  %v6574_v44 = vld [vmem:[#allocation155_spill] sm:$0xff]  ;;  %v6584_v31 = vld [vmem:[#allocation178_spill] sm:$0xff]  ;;  %6719 = vst [vmem:[#allocation344_spill] sm:$0xff] %v4248_v15 }
  0xf1   : > { %v6585_v12 = vsub.f32 %v6583_v43, %v6584_v31  ;;  %v3995_v43 = vld [vmem:[%s2752_s6 + $0x358] sm:$0xff]  ;;  %6606 = vst [vmem:[#allocation298_spill] sm:$0xff] %v4005_v54  ;;  %v4028_v54 = vand.u32 2147483647, %v6615_v56  ;;  %v6625_v56 = vsub.f32 %v3500_v19, %v3561_v48  ;;  %v6758_v19 = vld [vmem:[#allocation68_spill] sm:$0xff] }
  0xf2   : > { %6565 = vst [vmem:[#allocation280_spill] sm:$0xff] %v3923_v60  ;;  %v6575_v60 = vld [vmem:[#allocation172_spill] sm:$0xff]  ;;  %6603 = vst [vmem:[#allocation296_spill] sm:$0xff] %v3995_v43  ;;  %v593_v57 = vsub.f32 %v3995_v43, %v3998_v33  ;;  %v594_v33 = vsub.f32 %v4018_v53, %v4021_v36  ;;  %v6654_v36 = vsub.f32 %v3627_v41, %v3630_v25  ;;  %v4302_v41 = vld [vmem:[%s2752_s6 + $0x3f8] sm:$0xff] }
  0xf3   : > { %v6576_v59 = vsub.f32 %v6574_v44, %v6575_v60  ;;  %v3964_v60 = vand.u32 2147483647, %v6585_v12  ;;  %v6595_v12 = vld [vmem:[#allocation168_spill] sm:$0xff]  ;;  %6616 = vst [vmem:[#allocation303_spill] sm:$0xff] %v4028_v54  ;;  %v4051_v54 = vand.u32 2147483647, %v6625_v56 }
  0xf4   : > { %v6636_v56 = vld [vmem:[#allocation208_spill] sm:$0xff]  ;;  %6738 = vst [vmem:[#allocation357_spill] sm:$0xff] %v4302_v41  ;;  %v6747_v41 = vld [vmem:[#allocation59_spill] sm:$0xff] }
  0xf5   : > { %v3946_v13 = vand.u32 2147483647, %v6576_v59  ;;  %6586 = vst [vmem:[#allocation289_spill] sm:$0xff] %v3964_v60  ;;  %v6587_v59 = vld [vmem:[#allocation162_spill] sm:$0xff]  ;;  %v6596_v60 = vld [vmem:[#allocation185_spill] sm:$0xff]  ;;  %6626 = vst [vmem:[#allocation308_spill] sm:$0xff] %v4051_v54  ;;  %v6637_v54 = vsub.f32 %v3529_v20, %v6636_v56 }
  0xf6   : > { %v6597_v31 = vsub.f32 %v6595_v12, %v6596_v60  ;;  %v6754_v20 = vld [vmem:[#allocation66_spill] sm:$0xff] }
  0xf7   : > { %6577 = vst [vmem:[#allocation285_spill] sm:$0xff] %v3946_v13  ;;  %v6588_v13 = vld [vmem:[#allocation179_spill] sm:$0xff]  ;;  %v4074_v48 = vand.u32 2147483647, %v6637_v54  ;;  %v6648_v54 = vsub.f32 %v3558_v22, %v3607_v24 }
  0xf8   : > { %v6589_v44 = vsub.f32 %v6587_v59, %v6588_v13  ;;  %v3987_v13 = vand.u32 2147483647, %v6597_v31  ;;  %v6607_v31 = vsub.f32 %v3445_v21, %v3512_v27  ;;  %v6765_v21 = vld [vmem:[#allocation75_spill] sm:$0xff] }
  0xf9   : > { %6638 = vst [vmem:[#allocation313_spill] sm:$0xff] %v4074_v48  ;;  %v4097_v48 = vand.u32 2147483647, %v6648_v54  ;;  %v6656_v54 = vsub.f32 %v3650_v5, %v3653_v32 }
  0xfa   : > { %v3969_v17 = vand.u32 2147483647, %v6589_v44  ;;  %6598 = vst [vmem:[#allocation294_spill] sm:$0xff] %v3987_v13  ;;  %v6599_v44 = vld [vmem:[#allocation169_spill] sm:$0xff]  ;;  %v4010_v13 = vand.u32 2147483647, %v6607_v31  ;;  %v6617_v31 = vsub.f32 %v3474_v26, %v3541_v28 }
  0xfb   : > { %v4067_v26 = vld [vmem:[%s2758_s18 + $0x370] sm:$0xff]  ;;  %6649 = vst [vmem:[#allocation318_spill] sm:$0xff] %v4097_v48  ;;  %v4119_v48 = vand.u32 2147483647, %v6656_v54  ;;  %v6664_v54 = vsub.f32 %v3742_v23, %v3745_v61 }
  0xfc   : > { %6590 = vst [vmem:[#allocation290_spill] sm:$0xff] %v3969_v17  ;;  %v6600_v17 = vld [vmem:[#allocation186_spill] sm:$0xff]  ;;  %6608 = vst [vmem:[#allocation299_spill] sm:$0xff] %v4010_v13  ;;  %v4033_v13 = vand.u32 2147483647, %v6617_v31  ;;  %v6627_v31 = vld [vmem:[#allocation204_spill] sm:$0xff] }
  0xfd   : > { %v6601_v9 = vsub.f32 %v6599_v44, %v6600_v17  ;;  %6635 = vst [vmem:[#allocation312_spill] sm:$0xff] %v4067_v26  ;;  %6657 = vst [vmem:[#allocation322_spill] sm:$0xff] %v4119_v48  ;;  %v4141_v48 = vand.u32 2147483647, %v6664_v54  ;;  %v6672_v54 = vsub.f32 %v3834_v42, %v3837_v49  ;;  %v4281_v23 = vld [vmem:[%s2752_s6 + $0x3d0] sm:$0xff] }
  0xfe   : > { %6618 = vst [vmem:[#allocation304_spill] sm:$0xff] %v4033_v13  ;;  %v6628_v13 = vsub.f32 %v3503_v7, %v6627_v31  ;;  %v4090_v7 = vld [vmem:[%s2758_s18 + $0x378] sm:$0xff]  ;;  %6733 = vst [vmem:[#allocation352_spill] sm:$0xff] %v4281_v23  ;;  %v2467_v23 = vld [vmem:[%s2758_s18 + $0x8] sm:$0xff] }
  0xff   : > { %v3992_v59 = vand.u32 2147483647, %v6601_v9  ;;  %v6609_v9 = vld [vmem:[#allocation176_spill] sm:$0xff]  ;;  %6647 = vst [vmem:[#allocation317_spill] sm:$0xff] %v4090_v7  ;;  %6665 = vst [vmem:[#allocation326_spill] sm:$0xff] %v4141_v48 }
 0x100   : > { %v4056_v28 = vand.u32 2147483647, %v6628_v13  ;;  %v6639_v13 = vld [vmem:[#allocation209_spill] sm:$0xff]  ;;  %v4163_v48 = vand.u32 2147483647, %v6672_v54 }
 0x101   : > { %6602 = vst [vmem:[#allocation295_spill] sm:$0xff] %v3992_v59  ;;  %v6610_v59 = vld [vmem:[#allocation193_spill] sm:$0xff]  ;;  %v871_v53 = vand.u32 2147483647, %v2467_v23  ;;  %v878_v23 = vand.u32 2147483647, %v6747_v41 }
 0x102   : > { %v6611_v17 = vsub.f32 %v6609_v9, %v6610_v59  ;;  %6629 = vst [vmem:[#allocation309_spill] sm:$0xff] %v4056_v28  ;;  %v6640_v28 = vsub.f32 %v3532_v6, %v6639_v13  ;;  %v4114_v13 = vand.u32 2147483647, %v6654_v36  ;;  %v6662_v36 = vsub.f32 %v3719_v37, %v3722_v52  ;;  %6673 = vst [vmem:[#allocation330_spill] sm:$0xff] %v4163_v48  ;;  %v4257_v37 = vld [vmem:[%s2752_s6 + $0x3a0] sm:$0xff]  ;;  %v6753_v6 = vld [vmem:[#allocation64_spill] sm:$0xff] }
 0x103   : > { %6721 = vst [vmem:[#allocation346_spill] sm:$0xff] %v4257_v37  ;;  %v6746_v37 = vld [vmem:[#allocation58_spill] sm:$0xff]  ;;  %v885_v41 = vand.u32 2147483647, %v6758_v19  ;;  %v6780_v48 = vld [vmem:[#allocation87_spill] sm:$0xff]  ;;  %v6900_v52 = vld [vmem:[#allocation41_spill] sm:$0xff] }
 0x104   : > { %v4015_v60 = vand.u32 2147483647, %v6611_v17  ;;  %v6619_v17 = vld [vmem:[#allocation183_spill] sm:$0xff]  ;;  %v4079_v31 = vand.u32 2147483647, %v6640_v28  ;;  %v6650_v28 = vsub.f32 %v3581_v63, %v3610_v4  ;;  %6655 = vst [vmem:[#allocation321_spill] sm:$0xff] %v4114_v13 }
 0x105   : > { %v4136_v13 = vand.u32 2147483647, %v6662_v36  ;;  %v6670_v36 = vsub.f32 %v3811_v35, %v3814_v62  ;;  %v4177_v62 = vand.u32 2147483647, %v593_v57  ;;  %v4296_v35 = vld [vmem:[%s2752_s6 + $0x3f0] sm:$0xff]  ;;  %v6769_v19 = vld [vmem:[#allocation78_spill] sm:$0xff] }
 0x106   : > { %6612 = vst [vmem:[#allocation300_spill] sm:$0xff] %v4015_v60  ;;  %v6620_v60 = vld [vmem:[#allocation200_spill] sm:$0xff]  ;;  %6641 = vst [vmem:[#allocation314_spill] sm:$0xff] %v4079_v31  ;;  %v4102_v31 = vand.u32 2147483647, %v6650_v28  ;;  %v6658_v28 = vsub.f32 %v3673_v47, %v3676_v40  ;;  %v4287_v47 = vld [vmem:[%s2752_s6 + $0x3e0] sm:$0xff] }
 0x107   : > { %v6621_v59 = vsub.f32 %v6619_v17, %v6620_v60  ;;  %v6630_v60 = vld [vmem:[#allocation190_spill] sm:$0xff]  ;;  %v4064_v17 = vld [vmem:[%s2752_s6 + $0x370] sm:$0xff]  ;;  %6663 = vst [vmem:[#allocation325_spill] sm:$0xff] %v4136_v13  ;;  %v4158_v13 = vand.u32 2147483647, %v6670_v36  ;;  %6680 = vst [vmem:[#allocation337_spill] sm:$0xff] %v4177_v62 }
 0x108   : > { %6634 = vst [vmem:[#allocation311_spill] sm:$0xff] %v4064_v17  ;;  %6651 = vst [vmem:[#allocation319_spill] sm:$0xff] %v4102_v31  ;;  %v4124_v31 = vand.u32 2147483647, %v6658_v28  ;;  %v4179_v36 = vand.u32 2147483647, %v594_v33 }
 0x109   : > { %v4038_v27 = vand.u32 2147483647, %v6621_v59  ;;  %v6631_v59 = vld [vmem:[#allocation205_spill] sm:$0xff]  ;;  %6671 = vst [vmem:[#allocation329_spill] sm:$0xff] %v4158_v13  ;;  %v4245_v62 = vld [vmem:[%s2752_s6 + $0x388] sm:$0xff]  ;;  %6735 = vst [vmem:[#allocation354_spill] sm:$0xff] %v4287_v47 }
 0x10a   : > { %6659 = vst [vmem:[#allocation323_spill] sm:$0xff] %v4124_v31  ;;  %v6666_v31 = vsub.f32 %v3765_v1, %v3768_v58  ;;  %v4167_v58 = vand.u32 2147483647, %v588_v34  ;;  %6681 = vst [vmem:[#allocation338_spill] sm:$0xff] %v4179_v36  ;;  %v4260_v36 = vld [vmem:[%s2752_s6 + $0x3a8] sm:$0xff]  ;;  %v4284_v1 = vld [vmem:[%s2752_s6 + $0x3d8] sm:$0xff] }
 0x10b   : > { %6622 = vst [vmem:[#allocation305_spill] sm:$0xff] %v4038_v27  ;;  %v6632_v27 = vsub.f32 %v6630_v60, %v6631_v59  ;;  %v6642_v59 = vld [vmem:[#allocation197_spill] sm:$0xff]  ;;  %6718 = vst [vmem:[#allocation343_spill] sm:$0xff] %v4245_v62  ;;  %v6748_v62 = vld [vmem:[#allocation60_spill] sm:$0xff] }
 0x10c   : > { %v4087_v60 = vld [vmem:[%s2752_s6 + $0x378] sm:$0xff]  ;;  %6675 = vst [vmem:[#allocation332_spill] sm:$0xff] %v4167_v58  ;;  %6722 = vst [vmem:[#allocation347_spill] sm:$0xff] %v4260_v36  ;;  %v6743_v36 = vld [vmem:[#allocation55_spill] sm:$0xff]  ;;  %v883_v58 = vand.u32 2147483647, %v6754_v20 }
 0x10d   : > { %v4061_v8 = vand.u32 2147483647, %v6632_v27  ;;  %v6643_v27 = vld [vmem:[#allocation210_spill] sm:$0xff]  ;;  %6646 = vst [vmem:[#allocation316_spill] sm:$0xff] %v4087_v60  ;;  %v597_v28 = vsub.f32 %v4087_v60, %v4090_v7  ;;  %v4165_v7 = vand.u32 2147483647, %v587_v38 }
 0x10e   : > { %6734 = vst [vmem:[#allocation353_spill] sm:$0xff] %v4284_v1  ;;  %6737 = vst [vmem:[#allocation356_spill] sm:$0xff] %v4296_v35  ;;  %v4314_v60 = vld [vmem:[%s2758_s18 + $0x388] sm:$0xff]  ;;  %v2468_v1 = vld [vmem:[%s2758_s18 + $0x10] sm:$0xff]  ;;  %v874_v63 = vand.u32 2147483647, %v6743_v36 }
 0x10f   : > { %6633 = vst [vmem:[#allocation310_spill] sm:$0xff] %v4061_v8  ;;  %v6644_v8 = vsub.f32 %v6642_v59, %v6643_v27  ;;  %v595_v27 = vsub.f32 %v4041_v10, %v4044_v29  ;;  %6674 = vst [vmem:[#allocation331_spill] sm:$0xff] %v4165_v7  ;;  %v4185_v38 = vand.u32 2147483647, %v597_v28  ;;  %v4293_v59 = vld [vmem:[%s2752_s6 + $0x3e8] sm:$0xff]  ;;  %v4308_v10 = vld [vmem:[%s2758_s18 + $0x380] sm:$0xff] }
 0x110   : > { %6736 = vst [vmem:[#allocation355_spill] sm:$0xff] %v4293_v59  ;;  %6739 = vst [vmem:[#allocation358_spill] sm:$0xff] %v4308_v10  ;;  %v872_v22 = vand.u32 2147483647, %v2468_v1  ;;  %v6744_v59 = vld [vmem:[#allocation56_spill] sm:$0xff]  ;;  %v6745_v35 = vld [vmem:[#allocation57_spill] sm:$0xff] }
 0x111   : > { %v4084_v39 = vand.u32 2147483647, %v6644_v8  ;;  %v6652_v8 = vsub.f32 %v3604_v55, %v3613_v2  ;;  %v4181_v13 = vand.u32 2147483647, %v595_v27  ;;  %6684 = vst [vmem:[#allocation341_spill] sm:$0xff] %v4185_v38  ;;  %6740 = vst [vmem:[#allocation359_spill] sm:$0xff] %v4314_v60 }
 0x112   : > { %v4326_v55 = vld [vmem:[%s2758_s18 + $0x398] sm:$0xff]  ;;  %v875_v57 = vand.u32 2147483647, %v6744_v59  ;;  %v879_v1 = vand.u32 2147483647, %v6748_v62  ;;  %v6750_v47 = vld [vmem:[#allocation63_spill] sm:$0xff] }
 0x113   : > { %6645 = vst [vmem:[#allocation315_spill] sm:$0xff] %v4084_v39  ;;  %v4107_v39 = vand.u32 2147483647, %v6652_v8  ;;  %v596_v8 = vsub.f32 %v4064_v17, %v4067_v26  ;;  %v4148_v26 = vand.u32 2147483647, %v6666_v31  ;;  %6682 = vst [vmem:[#allocation339_spill] sm:$0xff] %v4181_v13 }
 0x114   : > { %v4169_v31 = vand.u32 2147483647, %v589_v51  ;;  %6742 = vst [vmem:[#allocation361_spill] sm:$0xff] %v4326_v55  ;;  %v877_v17 = vand.u32 2147483647, %v6746_v37  ;;  %v6759_v13 = vld [vmem:[#allocation70_spill] sm:$0xff] }
 0x115   : > { %6653 = vst [vmem:[#allocation320_spill] sm:$0xff] %v4107_v39  ;;  %v6660_v39 = vsub.f32 %v3696_v30, %v3699_v46  ;;  %6667 = vst [vmem:[#allocation327_spill] sm:$0xff] %v4148_v26  ;;  %v4171_v26 = vand.u32 2147483647, %v590_v45  ;;  %v4183_v54 = vand.u32 2147483647, %v596_v8 }
 0x116   : > { %6676 = vst [vmem:[#allocation333_spill] sm:$0xff] %v4169_v31  ;;  %v4251_v31 = vld [vmem:[%s2752_s6 + $0x398] sm:$0xff]  ;;  %v4320_v30 = vld [vmem:[%s2758_s18 + $0x390] sm:$0xff]  ;;  %v881_v15 = vand.u32 2147483647, %v6750_v47  ;;  %v6779_v51 = vld [vmem:[#allocation86_spill] sm:$0xff] }
 0x117   : > { %v4131_v29 = vand.u32 2147483647, %v6660_v39  ;;  %v6668_v39 = vsub.f32 %v3788_v11, %v3791_v0  ;;  %6677 = vst [vmem:[#allocation334_spill] sm:$0xff] %v4171_v26  ;;  %6683 = vst [vmem:[#allocation340_spill] sm:$0xff] %v4183_v54  ;;  %v4263_v54 = vld [vmem:[%s2752_s6 + $0x3b0] sm:$0xff]  ;;  %v4269_v11 = vld [vmem:[%s2752_s6 + $0x3b8] sm:$0xff] }
 0x118   : > { %6720 = vst [vmem:[#allocation345_spill] sm:$0xff] %v4251_v31  ;;  %6723 = vst [vmem:[#allocation348_spill] sm:$0xff] %v4263_v54  ;;  %v4272_v26 = vld [vmem:[%s2752_s6 + $0x3c0] sm:$0xff]  ;;  %v882_v59 = vand.u32 2147483647, %v6753_v6  ;;  %v6776_v45 = vld [vmem:[#allocation16_spill] sm:$0xff] }
 0x119   : > { %6661 = vst [vmem:[#allocation324_spill] sm:$0xff] %v4131_v29  ;;  %v4153_v29 = vand.u32 2147483647, %v6668_v39  ;;  %v4173_v39 = vand.u32 2147483647, %v591_v50  ;;  %6727 = vst [vmem:[#allocation349_spill] sm:$0xff] %v4269_v11 }
 0x11a   : > { %6728 = vst [vmem:[#allocation350_spill] sm:$0xff] %v4272_v26  ;;  %6741 = vst [vmem:[#allocation360_spill] sm:$0xff] %v4320_v30  ;;  %v2466_v26 = vld [vmem:[%s2758_s18] sm:$0xff]  ;;  %v2469_v11 = vld [vmem:[%s2758_s18 + $0x18] sm:$0xff]  ;;  %v886_v62 = vand.u32 2147483647, %v6759_v13 }
 0x11b   : > { %6669 = vst [vmem:[#allocation328_spill] sm:$0xff] %v4153_v29  ;;  %6678 = vst [vmem:[#allocation335_spill] sm:$0xff] %v4173_v39  ;;  %v4175_v29 = vand.u32 2147483647, %v592_v3  ;;  %v4275_v39 = vld [vmem:[%s2752_s6 + $0x3c8] sm:$0xff]  ;;  %v6781_v7 = vld [vmem:[#allocation17_spill] sm:$0xff] }
 0x11c   : > { %6729 = vst [vmem:[#allocation351_spill] sm:$0xff] %v4275_v39  ;;  %v870_v5 = vand.u32 2147483647, %v2466_v26  ;;  %v873_v54 = vand.u32 2147483647, %v2469_v11  ;;  %v6751_v11 = vld [vmem:[#allocation11_spill] sm:$0xff] }
 0x11d   : > { %6679 = vst [vmem:[#allocation336_spill] sm:$0xff] %v4175_v29  ;;  %v4239_v29 = vld [vmem:[%s2752_s6 + $0x380] sm:$0xff]  ;;  %v876_v39 = vand.u32 2147483647, %v6745_v35  ;;  %v6752_v42 = vand.u32 2147483647, %v6751_v11 }
 0x11e   : > { %6717 = vst [vmem:[#allocation342_spill] sm:$0xff] %v4239_v29  ;;  %v6749_v29 = vld [vmem:[#allocation62_spill] sm:$0xff]  ;;  %v6755_v26 = vld [vmem:[#allocation67_spill] sm:$0xff]  ;;  %v6756_v35 = vld [vmem:[#allocation12_spill] sm:$0xff]  ;;  %v6762_v47 = vand.u32 2147483647, %v6761_v18 }
 0x11f   : > { %v880_v43 = vand.u32 2147483647, %v6749_v29  ;;  %v998_v36 = vadd.f32 %v870_v5, %v6752_v42  ;;  %v884_v31 = vand.u32 2147483647, %v6755_v26  ;;  %v6757_v38 = vand.u32 2147483647, %v6756_v35 }
 0x120   : > { %v6760_v50 = vld [vmem:[#allocation71_spill] sm:$0xff]  ;;  %v1000_v9 = vadd.f32 %v872_v22, %v6762_v47  ;;  %v6763_v11 = vld [vmem:[#allocation72_spill] sm:$0xff]  ;;  %v6764_v42 = vld [vmem:[#allocation74_spill] sm:$0xff]  ;;  %v6767_v26 = vand.u32 2147483647, %v6766_v16 }
 0x121   : > { %v999_v37 = vadd.f32 %v871_v53, %v6757_v38  ;;  %v887_v29 = vand.u32 2147483647, %v6760_v50  ;;  %v6768_v53 = vld [vmem:[#allocation76_spill] sm:$0xff]  ;;  %v6770_v13 = vld [vmem:[#allocation79_spill] sm:$0xff]  ;;  %v6774_v5 = vld [vmem:[#allocation82_spill] sm:$0xff] }
 0x122   : > { %v4368_v44 = vadd.f32 %v873_v54, %v6767_v26  ;;  %v6771_v50 = vld [vmem:[#allocation15_spill] sm:$0xff]  ;;  %v6773_v22 = vld [vmem:[#allocation80_spill] sm:$0xff]  ;;  %v6777_v16 = vand.u32 2147483647, %v6776_v45  ;;  %v6784_v28 = vld [vmem:[#allocation90_spill] sm:$0xff] }
 0x123   : > { %v6772_v33 = vand.u32 2147483647, %v6771_v50  ;;  %v6778_v26 = vld [vmem:[#allocation84_spill] sm:$0xff]  ;;  %v6782_v50 = vand.u32 2147483647, %v6781_v7  ;;  %v6785_v8 = vld [vmem:[#allocation91_spill] sm:$0xff] }
 0x124   : > { %v4382_v54 = vadd.f32 %v875_v57, %v6777_v16  ;;  %v6786_v27 = vld [vmem:[#allocation18_spill] sm:$0xff]  ;;  %v6791_v55 = vld [vmem:[#allocation19_spill] sm:$0xff]  ;;  %v6796_v10 = vld [vmem:[#allocation20_spill] sm:$0xff]  ;;  %v6841_v6 = vand.u32 2147483647, %v6763_v11 }
 0x125   : > { %v4375_v18 = vadd.f32 %v874_v63, %v6772_v33  ;;  %v4389_v63 = vadd.f32 %v876_v39, %v6782_v50  ;;  %v6783_v33 = vld [vmem:[#allocation88_spill] sm:$0xff]  ;;  %v6787_v45 = vand.u32 2147483647, %v6786_v27  ;;  %v6792_v7 = vand.u32 2147483647, %v6791_v55  ;;  %v6801_v34 = vld [vmem:[#allocation21_spill] sm:$0xff] }
 0x126   : > { %v6797_v27 = vand.u32 2147483647, %v6796_v10  ;;  %v6802_v55 = vand.u32 2147483647, %v6801_v34  ;;  %v6806_v60 = vld [vmem:[#allocation22_spill] sm:$0xff]  ;;  %v6811_v3 = vld [vmem:[#allocation23_spill] sm:$0xff] }
 0x127   : > { %v4396_v57 = vadd.f32 %v877_v17, %v6787_v45  ;;  %v4403_v39 = vadd.f32 %v878_v23, %v6792_v7  ;;  %v6807_v10 = vand.u32 2147483647, %v6806_v60  ;;  %v6812_v34 = vand.u32 2147483647, %v6811_v3  ;;  %v6816_v30 = vld [vmem:[#allocation24_spill] sm:$0xff]  ;;  %v6820_v45 = vld [vmem:[#allocation25_spill] sm:$0xff] }
 0x128   : > { %v4410_v17 = vadd.f32 %v879_v1, %v6797_v27  ;;  %v4417_v23 = vadd.f32 %v880_v43, %v6802_v55  ;;  %v6813_v55 = vld [vmem:[#allocation123_spill] sm:$0xff]  ;;  %v6817_v60 = vand.u32 2147483647, %v6816_v30  ;;  %v6821_v12 = vand.u32 2147483647, %v6820_v45  ;;  %v6824_v7 = vld [vmem:[#allocation26_spill] sm:$0xff] }
 0x129   : > { %v4424_v1 = vadd.f32 %v881_v15, %v6807_v10  ;;  %v4431_v43 = vadd.f32 %v882_v59, %v6812_v34  ;;  %v4446_v3 = vadd.f32 1e-08, %v998_v36  ;;  %v6825_v20 = vand.u32 2147483647, %v6824_v7  ;;  %v6828_v27 = vld [vmem:[#allocation144_spill] sm:$0xff]  ;;  %v6831_v10 = vld [vmem:[#allocation149_spill] sm:$0xff] }
 0x12a   : > { %v4438_v15 = vadd.f32 %v883_v58, %v6817_v60  ;;  %v4444_v16 = vadd.f32 %v884_v31, %v6821_v12  ;;  %v4454_v58 = vadd.f32 1e-08, %v999_v37  ;;  %v6829_v12 = vld [vmem:[#allocation27_spill] sm:$0xff]  ;;  %v6833_v47 = vld [vmem:[#allocation28_spill] sm:$0xff]  ;;  %v4469_v37 = vadd.f32 1e-08, %v1000_v9 }
 0x12b   : > { %v4452_v50 = vadd.f32 %v885_v41, %v6825_v20  ;;  %v6830_v31 = vand.u32 2147483647, %v6829_v12  ;;  %v6834_v7 = vand.u32 2147483647, %v6833_v47  ;;  %2210 = vrcp.f32 %v4446_v3  ;;  %v6845_v38 = vld [vmem:[#allocation30_spill] sm:$0xff] }
 0x12c   : > { %2212 = vrcp.f32 %v4454_v58  ;;  %v6846_v30 = vand.u32 2147483647, %v6845_v38  ;;  %v6847_v12 = vand.u32 2147483647, %v6764_v42  ;;  %v6853_v38 = vld [vmem:[#allocation31_spill] sm:$0xff]  ;;  %v6904_v0 = vld [vmem:[#allocation42_spill] sm:$0xff] }
 0x12d   : > { %v4461_v36 = vadd.f32 %v886_v62, %v6830_v31  ;;  %v4467_v41 = vadd.f32 %v887_v29, %v6834_v7  ;;  %v6839_v31 = vld [vmem:[#allocation29_spill] sm:$0xff]  ;;  %v4483_v29 = vadd.f32 1e-08, %v4368_v44  ;;  %v4498_v44 = vadd.f32 1e-08, %v4375_v18  ;;  %v6857_v62 = vld [vmem:[#allocation32_spill] sm:$0xff] }
 0x12e   : > { %v6840_v34 = vand.u32 2147483647, %v6839_v31  ;;  %v4493_v31 = vadd.f32 %v6847_v12, %v6846_v30  ;;  %2214 = vrcp.f32 %v4469_v37  ;;  %v6854_v20 = vand.u32 2147483647, %v6853_v38 }
 0x12f   : > { %v6855_v42 = vand.u32 2147483647, %v6765_v21  ;;  %v6859_v18 = vand.u32 2147483647, %v6768_v53  ;;  %v4518_v9 = vadd.f32 1e-08, %v4382_v54  ;;  %2216 = vrcp.f32 %v4483_v29 }
 0x130   : > { %v4480_v59 = vadd.f32 %v6841_v6, %v6840_v34  ;;  %v6858_v34 = vand.u32 2147483647, %v6857_v62  ;;  %v6865_v6 = vand.u32 2147483647, %v6769_v19  ;;  %v4533_v54 = vadd.f32 1e-08, %v4389_v63 }
 0x131   : > { %v4508_v30 = vadd.f32 %v6855_v42, %v6854_v20  ;;  %v6863_v42 = vld [vmem:[#allocation33_spill] sm:$0xff]  ;;  %2218 = vrcp.f32 %v4498_v44  ;;  %v6870_v20 = vld [vmem:[#allocation34_spill] sm:$0xff]  ;;  %v6877_v47 = vand.u32 2147483647, %v6773_v22  ;;  %v6883_v12 = vand.u32 2147483647, %v6774_v5 }
 0x132   : > { %v4515_v11 = vadd.f32 %v6859_v18, %v6858_v34  ;;  %v6864_v35 = vand.u32 2147483647, %v6863_v42  ;;  %v6871_v21 = vand.u32 2147483647, %v6870_v20  ;;  %v6872_v42 = vand.u32 2147483647, %v6770_v13 }
 0x133   : > { %v6874_v34 = vld [vmem:[#allocation200_spill] sm:$0xff]  ;;  %v6875_v18 = vld [vmem:[#allocation35_spill] sm:$0xff]  ;;  %2220 = vrcp.f32 %v4518_v9  ;;  %v6888_v60 = vand.u32 2147483647, %v6775_v14  ;;  %v4579_v5 = vadd.f32 1e-08, %v4410_v17 }
 0x134   : > { %v4528_v62 = vadd.f32 %v6865_v6, %v6864_v35  ;;  %v4542_v19 = vadd.f32 %v6872_v42, %v6871_v21  ;;  %v4545_v35 = vadd.f32 1e-08, %v4396_v57  ;;  %v6876_v53 = vand.u32 2147483647, %v6875_v18  ;;  %v6878_v20 = vld [vmem:[#allocation203_spill] sm:$0xff]  ;;  %v6880_v42 = vld [vmem:[#allocation205_spill] sm:$0xff] }
 0x135   : > { %v6881_v57 = vld [vmem:[#allocation36_spill] sm:$0xff]  ;;  %2222 = vrcp.f32 %v4533_v54  ;;  %v6886_v21 = vld [vmem:[#allocation37_spill] sm:$0xff]  ;;  %v6889_v18 = vld [vmem:[#allocation38_spill] sm:$0xff]  ;;  %v6894_v56 = vand.u32 2147483647, %v6779_v51 }
 0x136   : > { %v4553_v45 = vadd.f32 %v6877_v47, %v6876_v53  ;;  %v6882_v7 = vand.u32 2147483647, %v6881_v57  ;;  %v4568_v47 = vadd.f32 1e-08, %v4403_v39  ;;  %v6887_v13 = vand.u32 2147483647, %v6886_v21 }
 0x137   : > { %2224 = vrcp.f32 %v4545_v35  ;;  %v6890_v38 = vand.u32 2147483647, %v6889_v18  ;;  %v6891_v21 = vand.u32 2147483647, %v6778_v26  ;;  %v4600_v39 = vadd.f32 1e-08, %v4417_v23 }
 0x138   : > { %v4563_v6 = vadd.f32 %v6883_v12, %v6882_v7  ;;  %v4576_v57 = vadd.f32 %v6888_v60, %v6887_v13  ;;  %v2211_v7 = vpop.eup %2210  ;;  %v6892_v13 = vld [vmem:[#allocation39_spill] sm:$0xff]  ;;  %2226 = vrcp.f32 %v4568_v47  ;;  %v6895_v60 = vld [vmem:[#allocation40_spill] sm:$0xff]  ;;  %v6897_v51 = vand.u32 2147483647, %v6780_v48 }
 0x139   : > { %v4589_v53 = vadd.f32 %v6891_v21, %v6890_v38  ;;  %v2213_v14 = vpop.eup %2212  ;;  %v6893_v63 = vand.u32 2147483647, %v6892_v13  ;;  %v6896_v13 = vand.u32 2147483647, %v6895_v60  ;;  %v4614_v23 = vadd.f32 1e-08, %v4424_v1 }
 0x13a   : > { %2228 = vrcp.f32 %v4579_v5  ;;  %v1382_v18 = vmul.f32 %v2211_v7, %v4446_v3  ;;  %v1383_v22 = vmul.f32 %v2213_v14, %v4454_v58  ;;  %v6901_v48 = vand.u32 2147483647, %v6900_v52 }
 0x13b   : > { %v4597_v12 = vadd.f32 %v6894_v56, %v6893_v63  ;;  %v2215_v21 = vpop.eup %2214  ;;  %v4611_v56 = vadd.f32 %v6897_v51, %v6896_v13  ;;  %v6902_v13 = vand.u32 2147483647, %v6783_v33  ;;  %v4629_v1 = vadd.f32 1e-08, %v4431_v43 }
 0x13c   : > { %v2217_v17 = vpop.eup %2216  ;;  %2230 = vrcp.f32 %v4600_v39  ;;  %v6905_v58 = vand.u32 2147483647, %v6904_v0  ;;  %v6906_v63 = vand.u32 2147483647, %v6784_v28  ;;  %v1384_v52 = vmul.f32 %v2215_v21, %v4469_v37  ;;  %v6911_v37 = vld [vmem:[#allocation43_spill] sm:$0xff] }
 0x13d   : > { %v4626_v51 = vadd.f32 %v6902_v13, %v6901_v48  ;;  %v4644_v46 = vadd.f32 1e-08, %v4438_v15  ;;  %2232 = vrcp.f32 %v4614_v23  ;;  %v1385_v0 = vmul.f32 %v2217_v17, %v4483_v29 }
 0x13e   : > { %v4638_v60 = vadd.f32 %v6906_v63, %v6905_v58  ;;  %v2219_v33 = vpop.eup %2218  ;;  %v1510_v26 = vsub.f32 2.0, %v1382_v18  ;;  %v1511_v28 = vsub.f32 2.0, %v1383_v22  ;;  %v6912_v40 = vand.u32 2147483647, %v6911_v37  ;;  %v6917_v37 = vld [vmem:[#allocation44_spill] sm:$0xff] }
 0x13f   : > { %v6913_v13 = vand.u32 2147483647, %v6785_v8  ;;  %v4657_v15 = vadd.f32 1e-08, %v4444_v16  ;;  %2234 = vrcp.f32 %v4629_v1  ;;  %v1386_v22 = vmul.f32 %v2219_v33, %v4498_v44  ;;  %v6919_v8 = vld [vmem:[#allocation92_spill] sm:$0xff] }
 0x140   : > { %v2221_v63 = vpop.eup %2220  ;;  %v1512_v18 = vsub.f32 2.0, %v1384_v52  ;;  %v6918_v32 = vand.u32 2147483647, %v6917_v37  ;;  %v4671_v16 = vadd.f32 1e-08, %v4452_v50  ;;  %2236 = vrcp.f32 %v4644_v46 }
 0x141   : > { %v4654_v48 = vadd.f32 %v6913_v13, %v6912_v40  ;;  %v6920_v40 = vand.u32 2147483647, %v6919_v8  ;;  %v1387_v29 = vmul.f32 %v2221_v63, %v4518_v9  ;;  %v1513_v38 = vsub.f32 2.0, %v1385_v0  ;;  %v6925_v8 = vld [vmem:[#allocation94_spill] sm:$0xff] }
 0x142   : > { %v2223_v61 = vpop.eup %2222  ;;  %v1638_v44 = vmul.f32 %v2211_v7, %v1510_v26  ;;  %v1639_v52 = vmul.f32 %v2213_v14, %v1511_v28  ;;  %v4678_v37 = vadd.f32 1e-08, %v4461_v36  ;;  %2238 = vrcp.f32 %v4657_v15 }
 0x143   : > { %v4668_v13 = vadd.f32 %v6920_v40, %v6918_v32  ;;  %v6923_v32 = vld [vmem:[#allocation45_spill] sm:$0xff]  ;;  %v6926_v40 = vand.u32 2147483647, %v6925_v8  ;;  %v1388_v9 = vmul.f32 %v2223_v61, %v4533_v54  ;;  %v1514_v0 = vsub.f32 2.0, %v1386_v22 }
 0x144   : > { %v2225_v3 = vpop.eup %2224  ;;  %v6924_v50 = vand.u32 2147483647, %v6923_v32  ;;  %v1640_v7 = vmul.f32 %v2215_v21, %v1512_v18  ;;  %v4690_v49 = vadd.f32 1e-08, %v4467_v41  ;;  %2240 = vrcp.f32 %v4671_v16  ;;  %v6928_v8 = vld [vmem:[#allocation61_spill] sm:$0xff] }
 0x145   : > { %v2227_v14 = vpop.eup %2226  ;;  %v1389_v36 = vmul.f32 %v2225_v3, %v4545_v35  ;;  %v1515_v32 = vsub.f32 2.0, %v1387_v29  ;;  %v1641_v58 = vmul.f32 %v2217_v17, %v1513_v38  ;;  %v4699_v28 = vadd.f32 1e-08, %v4480_v59  ;;  %v6932_v29 = vld [vmem:[#allocation69_spill] sm:$0xff]  ;;  %v6933_v38 = vld [vmem:[#allocation46_spill] sm:$0xff] }
 0x146   : > { %v4685_v2 = vadd.f32 %v6926_v40, %v6924_v50  ;;  %v1766_v50 = vmul.f32 %v1638_v44, %v6928_v8  ;;  %v6929_v40 = vld [vmem:[#allocation65_spill] sm:$0xff]  ;;  %2242 = vrcp.f32 %v4678_v37  ;;  %v1390_v26 = vmul.f32 %v2227_v14, %v4568_v47 }
 0x147   : > { %v2229_v25 = vpop.eup %2228  ;;  %v1767_v43 = vmul.f32 %v1639_v52, %v6929_v40  ;;  %v1516_v35 = vsub.f32 2.0, %v1388_v9  ;;  %v1642_v4 = vmul.f32 %v2219_v33, %v1514_v0  ;;  %v1768_v17 = vmul.f32 %v1640_v7, %v6932_v29  ;;  %v6935_v52 = vld [vmem:[#allocation95_spill] sm:$0xff]  ;;  %v6937_v33 = vld [vmem:[#allocation73_spill] sm:$0xff] }
 0x148   : > { %v6934_v44 = vand.u32 2147483647, %v6933_v38  ;;  %v6936_v8 = vand.u32 2147483647, %v6935_v52  ;;  %v4711_v18 = vadd.f32 1e-08, %v4493_v31  ;;  %2244 = vrcp.f32 %v4690_v49 }
 0x149   : > { %v2231_v41 = vpop.eup %2230  ;;  %v1391_v59 = vmul.f32 %v2229_v25, %v4579_v5  ;;  %v1517_v47 = vsub.f32 2.0, %v1389_v36  ;;  %v1643_v9 = vmul.f32 %v2221_v63, %v1515_v32  ;;  %v1769_v0 = vmul.f32 %v1641_v58, %v6937_v33  ;;  %v4723_v52 = vld [vmem:[%s2758_s18 + $0x3a0] sm:$0xff]  ;;  %v6939_v54 = vld [vmem:[#allocation77_spill] sm:$0xff] }
 0x14a   : > { %v4708_v40 = vadd.f32 %v6936_v8, %v6934_v44  ;;  %v2233_v22 = vpop.eup %2232  ;;  %v1895_v21 = vadd.f32 %v1767_v43, %v1766_v50  ;;  %v4718_v38 = vadd.f32 1e-08, %v4508_v30  ;;  %2246 = vrcp.f32 %v4699_v28  ;;  %v6940_v58 = vld [vmem:[#allocation361_spill] sm:$0xff] }
 0x14b   : > { %v1392_v31 = vmul.f32 %v2231_v41, %v4600_v39  ;;  %v1518_v8 = vsub.f32 2.0, %v1390_v26  ;;  %v1644_v5 = vmul.f32 %v2223_v61, %v1516_v35  ;;  %v1770_v36 = vmul.f32 %v1642_v4, %v6939_v54  ;;  %v6941_v29 = vld [vmem:[#allocation81_spill] sm:$0xff] }
 0x14c   : > { %v2235_v44 = vpop.eup %2234  ;;  %v1896_v63 = vadd.f32 %v1895_v21, %v1768_v17  ;;  %v4728_v32 = vadd.f32 1e-08, %v4515_v11  ;;  %2248 = vrcp.f32 %v4711_v18  ;;  %v1393_v30 = vmul.f32 %v2233_v22, %v4614_v23  ;;  %v4740_v21 = vld [vmem:[%s2758_s18 + $0x3a8] sm:$0xff]  ;;  %v6942_v17 = vld [vmem:[#allocation85_spill] sm:$0xff] }
 0x14d   : > { %v2237_v50 = vpop.eup %2236  ;;  %v1519_v39 = vsub.f32 2.0, %v1391_v59  ;;  %v1645_v33 = vmul.f32 %v2225_v3, %v1517_v47  ;;  %v1771_v7 = vmul.f32 %v1643_v9, %v6941_v29  ;;  %v4735_v61 = vadd.f32 1e-08, %v4528_v62  ;;  %v6943_v47 = vld [vmem:[#allocation47_spill] sm:$0xff]  ;;  %v6948_v43 = vld [vmem:[#allocation93_spill] sm:$0xff] }
 0x14e   : > { %v1897_v26 = vadd.f32 %v1896_v63, %v1769_v0  ;;  %2250 = vrcp.f32 %v4718_v38  ;;  %v1394_v11 = vmul.f32 %v2235_v44, %v4629_v1  ;;  %v1520_v23 = vsub.f32 2.0, %v1392_v31  ;;  %v6945_v0 = vld [vmem:[#allocation96_spill] sm:$0xff] }
 0x14f   : > { %v2239_v54 = vpop.eup %2238  ;;  %v1646_v35 = vmul.f32 %v2227_v14, %v1518_v8  ;;  %v1772_v3 = vmul.f32 %v1644_v5, %v6942_v17  ;;  %v6944_v9 = vand.u32 2147483647, %v6943_v47  ;;  %v6946_v29 = vand.u32 2147483647, %v6945_v0  ;;  %v4755_v31 = vld [vmem:[%s2758_s18 + $0x3b0] sm:$0xff]  ;;  %v6947_v5 = vld [vmem:[#allocation89_spill] sm:$0xff] }
 0x150   : > { %v1898_v59 = vadd.f32 %v1897_v26, %v1770_v36  ;;  %v4750_v62 = vadd.f32 1e-08, %v4542_v19  ;;  %2252 = vrcp.f32 %v4728_v32  ;;  %v1395_v1 = vmul.f32 %v2237_v50, %v4644_v46  ;;  %v4765_v0 = vld [vmem:[%s2758_s18 + $0x3b8] sm:$0xff] }
 0x151   : > { %v4747_v63 = vadd.f32 %v6946_v29, %v6944_v9  ;;  %v2241_v4 = vpop.eup %2240  ;;  %v1521_v14 = vsub.f32 2.0, %v1393_v30  ;;  %v1647_v8 = vmul.f32 %v2229_v25, %v1519_v39  ;;  %v1773_v36 = vmul.f32 %v1645_v33, %v6947_v5  ;;  %v6949_v5 = vld [vmem:[#allocation97_spill] sm:$0xff] }
 0x152   : > { %v1899_v26 = vadd.f32 %v1898_v59, %v1771_v7  ;;  %v4760_v47 = vadd.f32 1e-08, %v4553_v45  ;;  %2254 = vrcp.f32 %v4735_v61  ;;  %v1396_v19 = vmul.f32 %v2239_v54, %v4657_v15  ;;  %v6956_v7 = vld [vmem:[#allocation117_spill] sm:$0xff] }
 0x153   : > { %v2243_v9 = vpop.eup %2242  ;;  %v1522_v46 = vsub.f32 2.0, %v1394_v11  ;;  %v1648_v29 = vmul.f32 %v2231_v41, %v1520_v23  ;;  %v1774_v30 = vmul.f32 %v1646_v35, %v6948_v43  ;;  %v4770_v39 = vadd.f32 1e-08, %v4563_v6  ;;  %v4782_v35 = vld [vmem:[%s2758_s18 + $0x3c0] sm:$0xff] }
 0x154   : > { %v1900_v25 = vadd.f32 %v1899_v26, %v1772_v3  ;;  %2256 = vrcp.f32 %v4750_v62  ;;  %v1397_v45 = vmul.f32 %v2241_v4, %v4671_v16  ;;  %v1523_v15 = vsub.f32 2.0, %v1395_v1  ;;  %v6950_v1 = vld [vmem:[#allocation103_spill] sm:$0xff]  ;;  %v6953_v26 = vld [vmem:[#allocation100_spill] sm:$0xff] }
 0x155   : > { %v2245_v33 = vpop.eup %2244  ;;  %v1649_v59 = vmul.f32 %v2233_v22, %v1521_v14  ;;  %v1775_v17 = vmul.f32 %v1647_v8, %v6949_v5  ;;  %v4777_v43 = vadd.f32 1e-08, %v4576_v57  ;;  %2258 = vrcp.f32 %v4760_v47  ;;  %v6951_v8 = vld [vmem:[#allocation48_spill] sm:$0xff] }
 0x156   : > { %v1901_v11 = vadd.f32 %v1900_v25, %v1773_v36  ;;  %v1398_v6 = vmul.f32 %v2243_v9, %v4678_v37  ;;  %v1524_v16 = vsub.f32 2.0, %v1396_v19  ;;  %v1650_v3 = vmul.f32 %v2235_v44, %v1522_v46  ;;  %v4797_v19 = vld [vmem:[%s2758_s18 + $0x3c8] sm:$0xff] }
 0x157   : > { %v2247_v23 = vpop.eup %2246  ;;  %v1776_v22 = vmul.f32 %v1648_v29, %v6950_v1  ;;  %v6952_v36 = vand.u32 2147483647, %v6951_v8  ;;  %v6954_v25 = vand.u32 2147483647, %v6953_v26  ;;  %v4792_v57 = vadd.f32 1e-08, %v4589_v53 }
 0x158   : > { %v1902_v14 = vadd.f32 %v1901_v11, %v1774_v30  ;;  %2260 = vrcp.f32 %v4770_v39  ;;  %v1399_v37 = vmul.f32 %v2245_v33, %v4690_v49  ;;  %v1525_v44 = vsub.f32 2.0, %v1397_v45  ;;  %v6955_v29 = vld [vmem:[#allocation110_spill] sm:$0xff]  ;;  %v4807_v26 = vld [vmem:[%s2758_s18 + $0x3d0] sm:$0xff] }
 0x159   : > { %v4789_v5 = vadd.f32 %v6954_v25, %v6952_v36  ;;  %v2249_v41 = vpop.eup %2248  ;;  %v1651_v46 = vmul.f32 %v2237_v50, %v1523_v15  ;;  %v1777_v30 = vmul.f32 %v1649_v59, %v6955_v29  ;;  %v4802_v8 = vadd.f32 1e-08, %v4597_v12  ;;  %v6957_v29 = vld [vmem:[#allocation124_spill] sm:$0xff] }
 0x15a   : > { %v1903_v11 = vadd.f32 %v1902_v14, %v1775_v17  ;;  %2262 = vrcp.f32 %v4777_v43  ;;  %v1400_v53 = vmul.f32 %v2247_v23, %v4699_v28  ;;  %v1526_v49 = vsub.f32 2.0, %v1398_v6  ;;  %v6965_v17 = vld [vmem:[#allocation145_spill] sm:$0xff] }
 0x15b   : > { %v2251_v36 = vpop.eup %2250  ;;  %v1652_v25 = vmul.f32 %v2239_v54, %v1524_v16  ;;  %v1778_v45 = vmul.f32 %v1650_v3, %v6956_v7  ;;  %v4812_v15 = vadd.f32 1e-08, %v4611_v56  ;;  %2264 = vrcp.f32 %v4792_v57  ;;  %v4824_v3 = vld [vmem:[%s2758_s18 + $0x3d8] sm:$0xff] }
 0x15c   : > { %v1904_v50 = vadd.f32 %v1903_v11, %v1776_v22  ;;  %v1401_v12 = vmul.f32 %v2249_v41, %v4711_v18  ;;  %v1527_v28 = vsub.f32 2.0, %v1399_v37  ;;  %v1653_v14 = vmul.f32 %v2241_v4, %v1525_v44  ;;  %v6958_v37 = vld [vmem:[#allocation131_spill] sm:$0xff]  ;;  %v6961_v11 = vld [vmem:[#allocation101_spill] sm:$0xff] }
 0x15d   : > { %v2253_v59 = vpop.eup %2252  ;;  %v1779_v1 = vmul.f32 %v1651_v46, %v6957_v29  ;;  %v4819_v7 = vadd.f32 1e-08, %v4626_v51  ;;  %2266 = vrcp.f32 %v4802_v8  ;;  %v1402_v56 = vmul.f32 %v2251_v36, %v4718_v38  ;;  %v6959_v46 = vld [vmem:[#allocation49_spill] sm:$0xff] }
 0x15e   : > { %v1905_v6 = vadd.f32 %v1904_v50, %v1777_v30  ;;  %v1528_v18 = vsub.f32 2.0, %v1400_v53  ;;  %v1654_v22 = vmul.f32 %v2243_v9, %v1526_v49  ;;  %v1780_v4 = vmul.f32 %v1652_v25, %v6958_v37  ;;  %v4839_v53 = vld [vmem:[%s2758_s18 + $0x3e0] sm:$0xff] }
 0x15f   : > { %v2255_v16 = vpop.eup %2254  ;;  %v6960_v30 = vand.u32 2147483647, %v6959_v46  ;;  %v6962_v50 = vand.u32 2147483647, %v6961_v11  ;;  %v4834_v51 = vadd.f32 1e-08, %v4638_v60  ;;  %2268 = vrcp.f32 %v4812_v15 }
 0x160   : > { %v1906_v44 = vadd.f32 %v1905_v6, %v1778_v45  ;;  %v1403_v38 = vmul.f32 %v2253_v59, %v4728_v32  ;;  %v1529_v9 = vsub.f32 2.0, %v1401_v12  ;;  %v1655_v49 = vmul.f32 %v2245_v33, %v1527_v28  ;;  %v6963_v25 = vld [vmem:[#allocation138_spill] sm:$0xff]  ;;  %v4849_v11 = vld [vmem:[%s2758_s18 + $0x3e8] sm:$0xff] }
 0x161   : > { %v4831_v29 = vadd.f32 %v6962_v50, %v6960_v30  ;;  %v2257_v54 = vpop.eup %2256  ;;  %v1781_v45 = vmul.f32 %v1653_v14, %v6963_v25  ;;  %v4844_v46 = vadd.f32 1e-08, %v4654_v48  ;;  %2270 = vrcp.f32 %v4819_v7  ;;  %6964 = vst [vmem:[#allocation55_spill] sm:$0xff] %v4849_v11  ;;  %v6966_v25 = vld [vmem:[#allocation152_spill] sm:$0xff] }
 0x162   : > { %v1907_v6 = vadd.f32 %v1906_v44, %v1779_v1  ;;  %v1404_v60 = vmul.f32 %v2255_v16, %v4735_v61  ;;  %v2259_v30 = vpop.eup %2258  ;;  %v1530_v32 = vsub.f32 2.0, %v1402_v56  ;;  %v1656_v50 = vmul.f32 %v2247_v23, %v1528_v18  ;;  %v4879_v1 = vld [vmem:[%s2758_s18 + $0x3f8] sm:$0xff] }
 0x163   : > { %v1782_v12 = vmul.f32 %v1654_v22, %v6965_v17  ;;  %v4854_v28 = vadd.f32 1e-08, %v4668_v13  ;;  %2272 = vrcp.f32 %v4834_v51  ;;  %v1405_v48 = vmul.f32 %v2257_v54, %v4750_v62  ;;  %v4866_v22 = vld [vmem:[%s2758_s18 + $0x3f0] sm:$0xff] }
 0x164   : > { %v1908_v33 = vadd.f32 %v1907_v6, %v1780_v4  ;;  %v1531_v61 = vsub.f32 2.0, %v1403_v38  ;;  %v1657_v44 = vmul.f32 %v2249_v41, %v1529_v9  ;;  %v1783_v37 = vmul.f32 %v1655_v49, %v6966_v25  ;;  %v6967_v38 = vld [vmem:[#allocation159_spill] sm:$0xff]  ;;  %v6968_v49 = vld [vmem:[#allocation50_spill] sm:$0xff] }
 0x165   : > { %v2261_v14 = vpop.eup %2260  ;;  %v4861_v17 = vadd.f32 1e-08, %v4685_v2  ;;  %2274 = vrcp.f32 %v4844_v46  ;;  %v1406_v13 = vmul.f32 %v2259_v30, %v4760_v47  ;;  %v1532_v62 = vsub.f32 2.0, %v1404_v60  ;;  %v6970_v6 = vld [vmem:[#allocation102_spill] sm:$0xff] }
 0x166   : > { %v1909_v56 = vadd.f32 %v1908_v33, %v1781_v45  ;;  %v1658_v4 = vmul.f32 %v2251_v36, %v1530_v32  ;;  %v1784_v41 = vmul.f32 %v1656_v50, %v6967_v38  ;;  %v6969_v45 = vand.u32 2147483647, %v6968_v49  ;;  %v6972_v32 = vld [vmem:[#allocation166_spill] sm:$0xff] }
 0x167   : > { %v2263_v18 = vpop.eup %2262  ;;  %v6971_v33 = vand.u32 2147483647, %v6970_v6  ;;  %v4874_v2 = vadd.f32 1e-08, %v4708_v40  ;;  %2276 = vrcp.f32 %v4854_v28  ;;  %v1407_v47 = vmul.f32 %v2261_v14, %v4770_v39  ;;  %v6973_v6 = vld [vmem:[#allocation173_spill] sm:$0xff] }
 0x168   : > { %v1910_v9 = vadd.f32 %v1909_v56, %v1782_v12  ;;  %v2265_v23 = vpop.eup %2264  ;;  %v1533_v60 = vsub.f32 2.0, %v1405_v48  ;;  %v1659_v36 = vmul.f32 %v2253_v59, %v1531_v61  ;;  %v1785_v50 = vmul.f32 %v1657_v44, %v6972_v32  ;;  %v6984_v56 = vld [vmem:[#allocation194_spill] sm:$0xff] }
 0x169   : > { %v1037_v25 = vadd.f32 %v6971_v33, %v6969_v45  ;;  %v4884_v38 = vadd.f32 1e-08, %v4747_v63  ;;  %2278 = vrcp.f32 %v4861_v17  ;;  %v1408_v40 = vmul.f32 %v2263_v18, %v4777_v43 }
 0x16a   : > { %v1911_v12 = vadd.f32 %v1910_v9, %v1783_v37  ;;  %v2267_v49 = vpop.eup %2266  ;;  %v1534_v45 = vsub.f32 2.0, %v1406_v13  ;;  %v1660_v39 = vmul.f32 %v2255_v16, %v1532_v62  ;;  %v1786_v33 = vmul.f32 %v1658_v4, %v6973_v6  ;;  %v6974_v9 = vld [vmem:[#allocation180_spill] sm:$0xff]  ;;  %v6975_v13 = vld [vmem:[#allocation51_spill] sm:$0xff] }
 0x16b   : > { %v4891_v48 = vadd.f32 1e-08, %v4789_v5  ;;  %2280 = vrcp.f32 %v4874_v2  ;;  %v1409_v63 = vmul.f32 %v2265_v23, %v4792_v57  ;;  %v1535_v61 = vsub.f32 2.0, %v1407_v47  ;;  %v6977_v62 = vld [vmem:[#allocation107_spill] sm:$0xff] }
 0x16c   : > { %v1912_v11 = vadd.f32 %v1911_v12, %v1784_v41  ;;  %v2269_v37 = vpop.eup %2268  ;;  %v1661_v44 = vmul.f32 %v2257_v54, %v1533_v60  ;;  %v1787_v43 = vmul.f32 %v1659_v36, %v6974_v9  ;;  %v6976_v16 = vand.u32 2147483647, %v6975_v13  ;;  %v6979_v47 = vld [vmem:[#allocation187_spill] sm:$0xff]  ;;  %v6980_v36 = vld [vmem:[#allocation52_spill] sm:$0xff] }
 0x16d   : > { %v6978_v4 = vand.u32 2147483647, %v6977_v62  ;;  %v4901_v12 = vadd.f32 1e-08, %v4831_v29  ;;  %2282 = vrcp.f32 %v4884_v38  ;;  %v1410_v5 = vmul.f32 %v2267_v49, %v4802_v8 }
 0x16e   : > { %v1913_v32 = vadd.f32 %v1912_v11, %v1785_v50  ;;  %v2271_v6 = vpop.eup %2270  ;;  %v1536_v57 = vsub.f32 2.0, %v1408_v40  ;;  %v1662_v59 = vmul.f32 %v2259_v30, %v1534_v45  ;;  %v1788_v54 = vmul.f32 %v1660_v39, %v6979_v47  ;;  %v6982_v50 = vld [vmem:[#allocation108_spill] sm:$0xff]  ;;  %v6985_v45 = vld [vmem:[#allocation53_spill] sm:$0xff] }
 0x16f   : > { %v1038_v41 = vadd.f32 %v6978_v4, %v6976_v16  ;;  %v6981_v11 = vand.u32 2147483647, %v6980_v36  ;;  %v6983_v9 = vand.u32 2147483647, %v6982_v50  ;;  %v4910_v62 = vadd.f32 1e-08, %v1037_v25 }
 0x170   : > { %v1914_v60 = vadd.f32 %v1913_v32, %v1786_v33  ;;  %2284 = vrcp.f32 %v4891_v48  ;;  %v1411_v29 = vmul.f32 %v2269_v37, %v4812_v15  ;;  %v2273_v16 = vpop.eup %2272  ;;  %v1537_v4 = vsub.f32 2.0, %v1409_v63  ;;  %v6987_v33 = vld [vmem:[#allocation109_spill] sm:$0xff] }
 0x171   : > { %v1039_v13 = vadd.f32 %v6983_v9, %v6981_v11  ;;  %v1663_v8 = vmul.f32 %v2261_v14, %v1535_v61  ;;  %v1789_v40 = vmul.f32 %v1661_v44, %v6984_v56  ;;  %v6986_v39 = vand.u32 2147483647, %v6985_v45  ;;  %v6989_v9 = vld [vmem:[#allocation201_spill] sm:$0xff]  ;;  %v6990_v61 = vld [vmem:[#allocation54_spill] sm:$0xff] }
 0x172   : > { %v1915_v30 = vadd.f32 %v1914_v60, %v1787_v43  ;;  %v6988_v32 = vand.u32 2147483647, %v6987_v33  ;;  %v4919_v36 = vadd.f32 1e-08, %v1038_v41  ;;  %2286 = vrcp.f32 %v4901_v12  ;;  %v2275_v11 = vpop.eup %2274  ;;  %v6992_v44 = vld [vmem:[#allocation114_spill] sm:$0xff] }
 0x173   : > { %v1412_v25 = vmul.f32 %v2271_v6, %v4819_v7  ;;  %v1538_v50 = vsub.f32 2.0, %v1410_v5  ;;  %v1664_v15 = vmul.f32 %v2263_v18, %v1536_v57  ;;  %v1790_v63 = vmul.f32 %v1662_v59, %v6989_v9  ;;  %v6995_v57 = vld [vmem:[#allocation98_spill] sm:$0xff] }
 0x174   : > { %v1040_v47 = vadd.f32 %v6988_v32, %v6986_v39  ;;  %v1916_v14 = vadd.f32 %v1915_v30, %v1788_v54  ;;  %v6991_v56 = vand.u32 2147483647, %v6990_v61  ;;  %v6993_v43 = vand.u32 2147483647, %v6992_v44  ;;  %v2277_v39 = vpop.eup %2276  ;;  %v6994_v32 = vld [vmem:[#allocation206_spill] sm:$0xff]  ;;  %v6997_v54 = vld [vmem:[#allocation115_spill] sm:$0xff] }
 0x175   : > { %v4928_v45 = vadd.f32 1e-08, %v1039_v13  ;;  %2288 = vrcp.f32 %v4910_v62  ;;  %v1413_v41 = vmul.f32 %v2273_v16, %v4834_v51  ;;  %v1539_v33 = vsub.f32 2.0, %v1411_v29 }
 0x176   : > { %v1041_v60 = vadd.f32 %v6993_v43, %v6991_v56  ;;  %v1665_v7 = vmul.f32 %v2265_v23, %v1537_v4  ;;  %v1791_v5 = vmul.f32 %v1663_v8, %v6994_v32  ;;  %v1917_v18 = vadd.f32 %v1916_v14, %v1789_v40  ;;  %v2279_v56 = vpop.eup %2278  ;;  %v6999_v43 = vld [vmem:[#allocation211_spill] sm:$0xff]  ;;  %v7002_v40 = vld [vmem:[#allocation116_spill] sm:$0xff] }
 0x177   : > { %v6996_v59 = vand.u32 2147483647, %v6995_v57  ;;  %v6998_v30 = vand.u32 2147483647, %v6997_v54  ;;  %v4937_v61 = vadd.f32 1e-08, %v1040_v47  ;;  %2290 = vrcp.f32 %v4919_v36 }
 0x178   : > { %v1414_v13 = vmul.f32 %v2275_v11, %v4844_v46  ;;  %v1540_v44 = vsub.f32 2.0, %v1412_v25  ;;  %v1666_v51 = vmul.f32 %v2267_v49, %v1538_v50  ;;  %v1792_v29 = vmul.f32 %v1664_v15, %v6999_v43  ;;  %v7000_v4 = vld [vmem:[#allocation99_spill] sm:$0xff]  ;;  %v7005_v50 = vld [vmem:[#allocation104_spill] sm:$0xff] }
 0x179   : > { %v1042_v9 = vadd.f32 %v6998_v30, %v6996_v59  ;;  %v1918_v23 = vadd.f32 %v1917_v18, %v1790_v63  ;;  %v7001_v8 = vand.u32 2147483647, %v7000_v4  ;;  %v7003_v14 = vand.u32 2147483647, %v7002_v40  ;;  %v2281_v59 = vpop.eup %2280  ;;  %v7004_v30 = vld [vmem:[#allocation215_spill] sm:$0xff]  ;;  %v7007_v63 = vld [vmem:[#allocation121_spill] sm:$0xff] }
 0x17a   : > { %v4946_v57 = vadd.f32 1e-08, %v1041_v60  ;;  %2292 = vrcp.f32 %v4928_v45  ;;  %v1415_v47 = vmul.f32 %v2277_v39, %v4854_v28  ;;  %v1541_v54 = vsub.f32 2.0, %v1413_v41 }
 0x17b   : > { %v1043_v32 = vadd.f32 %v7003_v14, %v7001_v8  ;;  %v1667_v46 = vmul.f32 %v2269_v37, %v1539_v33  ;;  %v1793_v25 = vmul.f32 %v1665_v7, %v7004_v30  ;;  %v1919_v49 = vadd.f32 %v1918_v23, %v1791_v5  ;;  %v2283_v8 = vpop.eup %2282  ;;  %v7009_v14 = vld [vmem:[#allocation218_spill] sm:$0xff]  ;;  %v7010_v33 = vld [vmem:[#allocation105_spill] sm:$0xff] }
 0x17c   : > { %v7006_v15 = vand.u32 2147483647, %v7005_v50  ;;  %v7008_v18 = vand.u32 2147483647, %v7007_v63  ;;  %v4955_v4 = vadd.f32 1e-08, %v1042_v9  ;;  %2294 = vrcp.f32 %v4937_v61 }
 0x17d   : > { %v1416_v60 = vmul.f32 %v2279_v56, %v4861_v17  ;;  %v1542_v40 = vsub.f32 2.0, %v1414_v13  ;;  %v1668_v28 = vmul.f32 %v2271_v6, %v1540_v44  ;;  %v1794_v41 = vmul.f32 %v1666_v51, %v7009_v14  ;;  %v7012_v5 = vld [vmem:[#allocation122_spill] sm:$0xff] }
 0x17e   : > { %v1044_v43 = vadd.f32 %v7008_v18, %v7006_v15  ;;  %v1920_v37 = vadd.f32 %v1919_v49, %v1792_v29  ;;  %v7011_v7 = vand.u32 2147483647, %v7010_v33  ;;  %v7013_v23 = vand.u32 2147483647, %v7012_v5  ;;  %v2285_v15 = vpop.eup %2284  ;;  %v7014_v18 = vld [vmem:[#allocation219_spill] sm:$0xff]  ;;  %v7015_v44 = vld [vmem:[#allocation106_spill] sm:$0xff] }
 0x17f   : > { %v4964_v50 = vadd.f32 1e-08, %v1043_v32  ;;  %2296 = vrcp.f32 %v4946_v57  ;;  %v1417_v9 = vmul.f32 %v2281_v59, %v4874_v2  ;;  %v1543_v63 = vsub.f32 2.0, %v1415_v47  ;;  %v2287_v33 = vpop.eup %2286  ;;  %v7018_v5 = vld [vmem:[#allocation220_spill] sm:$0xff] }
 0x180   : > { %v1045_v30 = vadd.f32 %v7013_v23, %v7011_v7  ;;  %v1669_v17 = vmul.f32 %v2273_v16, %v1541_v54  ;;  %v1795_v13 = vmul.f32 %v1667_v46, %v7014_v18  ;;  %v1921_v6 = vadd.f32 %v1920_v37, %v1793_v25  ;;  %v7019_v54 = vld [vmem:[#allocation111_spill] sm:$0xff]  ;;  %v7021_v25 = vld [vmem:[#allocation128_spill] sm:$0xff] }
 0x181   : > { %v7016_v51 = vand.u32 2147483647, %v7015_v44  ;;  %v7017_v29 = vand.u32 2147483647, %v6813_v55  ;;  %v4973_v14 = vadd.f32 1e-08, %v1044_v43  ;;  %2298 = vrcp.f32 %v4955_v4 }
 0x182   : > { %v1418_v32 = vmul.f32 %v2283_v8, %v4884_v38  ;;  %v1544_v7 = vsub.f32 2.0, %v1416_v60  ;;  %v1670_v2 = vmul.f32 %v2275_v11, %v1542_v40  ;;  %v1796_v47 = vmul.f32 %v1668_v28, %v7018_v5  ;;  %v2289_v43 = vpop.eup %2288  ;;  %v7024_v40 = vld [vmem:[#allocation112_spill] sm:$0xff] }
 0x183   : > { %v1046_v49 = vadd.f32 %v7017_v29, %v7016_v51  ;;  %v1922_v16 = vadd.f32 %v1921_v6, %v1794_v41  ;;  %v7020_v46 = vand.u32 2147483647, %v7019_v54  ;;  %v7022_v37 = vand.u32 2147483647, %v7021_v25  ;;  %v7023_v51 = vld [vmem:[#allocation223_spill] sm:$0xff]  ;;  %v7026_v41 = vld [vmem:[#allocation129_spill] sm:$0xff] }
 0x184   : > { %v4982_v18 = vadd.f32 1e-08, %v1045_v30  ;;  %2300 = vrcp.f32 %v4964_v50  ;;  %v1419_v55 = vmul.f32 %v2285_v15, %v4891_v48  ;;  %v1545_v44 = vsub.f32 2.0, %v1417_v9  ;;  %v2291_v54 = vpop.eup %2290  ;;  %v7028_v25 = vld [vmem:[#allocation224_spill] sm:$0xff] }
 0x185   : > { %v1047_v23 = vadd.f32 %v7022_v37, %v7020_v46  ;;  %v1671_v38 = vmul.f32 %v2277_v39, %v1543_v63  ;;  %v1797_v60 = vmul.f32 %v1669_v17, %v7023_v51  ;;  %v1923_v11 = vadd.f32 %v1922_v16, %v1795_v13  ;;  %v7029_v63 = vld [vmem:[#allocation113_spill] sm:$0xff]  ;;  %v7031_v13 = vld [vmem:[#allocation130_spill] sm:$0xff] }
 0x186   : > { %v7025_v28 = vand.u32 2147483647, %v7024_v40  ;;  %v7027_v6 = vand.u32 2147483647, %v7026_v41  ;;  %v4991_v5 = vadd.f32 1e-08, %v1046_v49  ;;  %2302 = vrcp.f32 %v4973_v14 }
 0x187   : > { %v1420_v30 = vmul.f32 %v2287_v33, %v4901_v12  ;;  %v1546_v46 = vsub.f32 2.0, %v1418_v32  ;;  %v1672_v48 = vmul.f32 %v2279_v56, %v1544_v7  ;;  %v1798_v9 = vmul.f32 %v1670_v2, %v7028_v25  ;;  %v2293_v40 = vpop.eup %2292  ;;  %v7033_v41 = vld [vmem:[#allocation225_spill] sm:$0xff]  ;;  %v7034_v7 = vld [vmem:[#allocation118_spill] sm:$0xff] }
 0x188   : > { %v1048_v29 = vadd.f32 %v7027_v6, %v7025_v28  ;;  %v1924_v39 = vadd.f32 %v1923_v11, %v1796_v47  ;;  %v7030_v17 = vand.u32 2147483647, %v7029_v63  ;;  %v7032_v16 = vand.u32 2147483647, %v7031_v13  ;;  %v7036_v47 = vld [vmem:[#allocation135_spill] sm:$0xff]  ;;  %v7038_v13 = vld [vmem:[#allocation228_spill] sm:$0xff] }
 0x189   : > { %v5000_v51 = vadd.f32 1e-08, %v1047_v23  ;;  %2304 = vrcp.f32 %v4982_v18  ;;  %v1421_v49 = vmul.f32 %v2289_v43, %v4910_v62  ;;  %v1547_v28 = vsub.f32 2.0, %v1419_v55  ;;  %v2295_v63 = vpop.eup %2294 }
 0x18a   : > { %v1049_v37 = vadd.f32 %v7032_v16, %v7030_v17  ;;  %v1673_v12 = vmul.f32 %v2281_v59, %v1545_v44  ;;  %v1799_v32 = vmul.f32 %v1671_v38, %v7033_v41  ;;  %v1925_v56 = vadd.f32 %v1924_v39, %v1797_v60  ;;  %v7039_v44 = vld [vmem:[#allocation119_spill] sm:$0xff]  ;;  %v7041_v60 = vld [vmem:[#allocation136_spill] sm:$0xff] }
 0x18b   : > { %v7035_v2 = vand.u32 2147483647, %v7034_v7  ;;  %v7037_v11 = vand.u32 2147483647, %v7036_v47  ;;  %v5009_v25 = vadd.f32 1e-08, %v1048_v29  ;;  %2306 = vrcp.f32 %v4991_v5 }
 0x18c   : > { %v1422_v23 = vmul.f32 %v2291_v54, %v4919_v36  ;;  %v1548_v17 = vsub.f32 2.0, %v1420_v30  ;;  %v1674_v62 = vmul.f32 %v2283_v8, %v1546_v46  ;;  %v1800_v55 = vmul.f32 %v1672_v48, %v7038_v13  ;;  %v2297_v7 = vpop.eup %2296  ;;  %v7043_v47 = vld [vmem:[#allocation229_spill] sm:$0xff]  ;;  %v7044_v46 = vld [vmem:[#allocation120_spill] sm:$0xff] }
 0x18d   : > { %v1050_v6 = vadd.f32 %v7037_v11, %v7035_v2  ;;  %v1926_v59 = vadd.f32 %v1925_v56, %v1798_v9  ;;  %v7040_v38 = vand.u32 2147483647, %v7039_v44  ;;  %v7042_v39 = vand.u32 2147483647, %v7041_v60  ;;  %v7046_v9 = vld [vmem:[#allocation137_spill] sm:$0xff]  ;;  %v7048_v60 = vld [vmem:[#allocation230_spill] sm:$0xff] }
 0x18e   : > { %v5018_v41 = vadd.f32 1e-08, %v1049_v37  ;;  %2308 = vrcp.f32 %v5000_v51  ;;  %v1423_v29 = vmul.f32 %v2293_v40, %v4928_v45  ;;  %v1549_v2 = vsub.f32 2.0, %v1421_v49  ;;  %v2299_v44 = vpop.eup %2298 }
 0x18f   : > { %v1051_v16 = vadd.f32 %v7042_v39, %v7040_v38  ;;  %v1675_v36 = vmul.f32 %v2285_v15, %v1547_v28  ;;  %v1801_v30 = vmul.f32 %v1673_v12, %v7043_v47  ;;  %v1927_v8 = vadd.f32 %v1926_v59, %v1799_v32  ;;  %v7049_v28 = vld [vmem:[#allocation125_spill] sm:$0xff]  ;;  %v7051_v32 = vld [vmem:[#allocation142_spill] sm:$0xff] }
 0x190   : > { %v7045_v48 = vand.u32 2147483647, %v7044_v46  ;;  %v7047_v56 = vand.u32 2147483647, %v7046_v9  ;;  %v5027_v13 = vadd.f32 1e-08, %v1050_v6  ;;  %2310 = vrcp.f32 %v5009_v25 }
 0x191   : > { %v1424_v37 = vmul.f32 %v2295_v63, %v4937_v61  ;;  %v1550_v38 = vsub.f32 2.0, %v1422_v23  ;;  %v1676_v45 = vmul.f32 %v2287_v33, %v1548_v17  ;;  %v1802_v49 = vmul.f32 %v1674_v62, %v7048_v60  ;;  %v2301_v46 = vpop.eup %2300  ;;  %v7053_v9 = vld [vmem:[#allocation233_spill] sm:$0xff]  ;;  %v7054_v17 = vld [vmem:[#allocation126_spill] sm:$0xff] }
 0x192   : > { %v1052_v11 = vadd.f32 %v7047_v56, %v7045_v48  ;;  %v1928_v15 = vadd.f32 %v1927_v8, %v1800_v55  ;;  %v7050_v12 = vand.u32 2147483647, %v7049_v28  ;;  %v7052_v59 = vand.u32 2147483647, %v7051_v32  ;;  %v7056_v55 = vld [vmem:[#allocation143_spill] sm:$0xff]  ;;  %v7058_v32 = vld [vmem:[#allocation234_spill] sm:$0xff] }
 0x193   : > { %v5036_v47 = vadd.f32 1e-08, %v1051_v16  ;;  %2312 = vrcp.f32 %v5018_v41  ;;  %v1425_v6 = vmul.f32 %v2297_v7, %v4946_v57  ;;  %v1551_v48 = vsub.f32 2.0, %v1423_v29  ;;  %v2303_v28 = vpop.eup %2302 }
 0x194   : > { %v1053_v39 = vadd.f32 %v7052_v59, %v7050_v12  ;;  %v1677_v61 = vmul.f32 %v2289_v43, %v1549_v2  ;;  %v1803_v23 = vmul.f32 %v1675_v36, %v7053_v9  ;;  %v1929_v33 = vadd.f32 %v1928_v15, %v1801_v30  ;;  %v7059_v2 = vld [vmem:[#allocation127_spill] sm:$0xff] }
 0x195   : > { %v7055_v62 = vand.u32 2147483647, %v7054_v17  ;;  %v7057_v8 = vand.u32 2147483647, %v7056_v55  ;;  %v5045_v60 = vadd.f32 1e-08, %v1052_v11  ;;  %2314 = vrcp.f32 %v5027_v13 }
 0x196   : > { %v1426_v16 = vmul.f32 %v2299_v44, %v4955_v4  ;;  %v1552_v12 = vsub.f32 2.0, %v1424_v37  ;;  %v1678_v57 = vmul.f32 %v2291_v54, %v1550_v38  ;;  %v1804_v29 = vmul.f32 %v1676_v45, %v7058_v32  ;;  %v2305_v9 = vpop.eup %2304  ;;  %v7063_v38 = vld [vmem:[#allocation132_spill] sm:$0xff]  ;;  %v7066_v32 = vld [vmem:[#allocation238_spill] sm:$0xff] }
 0x197   : > { %v1054_v56 = vadd.f32 %v7057_v8, %v7055_v62  ;;  %v1930_v43 = vadd.f32 %v1929_v33, %v1802_v49  ;;  %v7060_v36 = vand.u32 2147483647, %v7059_v2  ;;  %v7061_v30 = vand.u32 2147483647, %v6828_v27  ;;  %v7062_v62 = vld [vmem:[#allocation235_spill] sm:$0xff] }
 0x198   : > { %v5054_v59 = vadd.f32 1e-08, %v1053_v39  ;;  %2316 = vrcp.f32 %v5036_v47  ;;  %v1427_v11 = vmul.f32 %v2301_v46, %v4964_v50  ;;  %v1553_v17 = vsub.f32 2.0, %v1425_v6  ;;  %v2307_v39 = vpop.eup %2306 }
 0x199   : > { %v1055_v15 = vadd.f32 %v7061_v30, %v7060_v36  ;;  %v1679_v4 = vmul.f32 %v2293_v40, %v1551_v48  ;;  %v1805_v37 = vmul.f32 %v1677_v61, %v7062_v62  ;;  %v1931_v54 = vadd.f32 %v1930_v43, %v1803_v23  ;;  %v7067_v48 = vld [vmem:[#allocation133_spill] sm:$0xff]  ;;  %v7069_v23 = vld [vmem:[#allocation150_spill] sm:$0xff]  ;;  %v7071_v62 = vld [vmem:[#allocation239_spill] sm:$0xff] }
 0x19a   : > { %v7064_v45 = vand.u32 2147483647, %v7063_v38  ;;  %v7065_v49 = vand.u32 2147483647, %v6831_v10  ;;  %v5063_v55 = vadd.f32 1e-08, %v1054_v56  ;;  %2318 = vrcp.f32 %v5045_v60 }
 0x19b   : > { %v1428_v27 = vmul.f32 %v2303_v28, %v4973_v14  ;;  %v1554_v8 = vsub.f32 2.0, %v1426_v16  ;;  %v1680_v50 = vmul.f32 %v2295_v63, %v1552_v12  ;;  %v1806_v6 = vmul.f32 %v1678_v57, %v7066_v32  ;;  %v2309_v56 = vpop.eup %2308  ;;  %v7072_v12 = vld [vmem:[#allocation134_spill] sm:$0xff] }
 0x19c   : > { %v1056_v33 = vadd.f32 %v7065_v49, %v7064_v45  ;;  %v1932_v40 = vadd.f32 %v1931_v54, %v1804_v29  ;;  %v7068_v61 = vand.u32 2147483647, %v7067_v48  ;;  %v7070_v43 = vand.u32 2147483647, %v7069_v23  ;;  %v7074_v29 = vld [vmem:[#allocation151_spill] sm:$0xff]  ;;  %v7076_v48 = vld [vmem:[#allocation240_spill] sm:$0xff] }
 0x19d   : > { %v5072_v36 = vadd.f32 1e-08, %v1055_v15  ;;  %2320 = vrcp.f32 %v5054_v59  ;;  %v1429_v10 = vmul.f32 %v2305_v9, %v4982_v18  ;;  %v1555_v30 = vsub.f32 2.0, %v1427_v11  ;;  %v2311_v49 = vpop.eup %2310 }
 0x19e   : > { %v1057_v2 = vadd.f32 %v7070_v43, %v7068_v61  ;;  %v1681_v14 = vmul.f32 %v2297_v7, %v1553_v17  ;;  %v1807_v16 = vmul.f32 %v1679_v4, %v7071_v62  ;;  %v1933_v63 = vadd.f32 %v1932_v40, %v1805_v37  ;;  %v7077_v17 = vld [vmem:[#allocation139_spill] sm:$0xff]  ;;  %v7079_v37 = vld [vmem:[#allocation156_spill] sm:$0xff] }
 0x19f   : > { %v7073_v57 = vand.u32 2147483647, %v7072_v12  ;;  %v7075_v54 = vand.u32 2147483647, %v7074_v29  ;;  %v5081_v45 = vadd.f32 1e-08, %v1056_v33  ;;  %2322 = vrcp.f32 %v5063_v55 }
 0x1a0   : > { %v1430_v15 = vmul.f32 %v2307_v39, %v4991_v5  ;;  %v1556_v32 = vsub.f32 2.0, %v1428_v27  ;;  %v1682_v18 = vmul.f32 %v2299_v44, %v1554_v8  ;;  %v1808_v11 = vmul.f32 %v1680_v50, %v7076_v48  ;;  %v2313_v43 = vpop.eup %2312  ;;  %v7081_v12 = vld [vmem:[#allocation243_spill] sm:$0xff]  ;;  %v7082_v8 = vld [vmem:[#allocation140_spill] sm:$0xff] }
 0x1a1   : > { %v1058_v38 = vadd.f32 %v7075_v54, %v7073_v57  ;;  %v1934_v7 = vadd.f32 %v1933_v63, %v1806_v6  ;;  %v7078_v4 = vand.u32 2147483647, %v7077_v17  ;;  %v7080_v40 = vand.u32 2147483647, %v7079_v37  ;;  %v7084_v6 = vld [vmem:[#allocation157_spill] sm:$0xff]  ;;  %v7086_v17 = vld [vmem:[#allocation244_spill] sm:$0xff] }
 0x1a2   : > { %v5090_v23 = vadd.f32 1e-08, %v1057_v2  ;;  %2324 = vrcp.f32 %v5072_v36  ;;  %v1431_v33 = vmul.f32 %v2309_v56, %v5000_v51  ;;  %v1557_v62 = vsub.f32 2.0, %v1429_v10  ;;  %v2315_v54 = vpop.eup %2314 }
 0x1a3   : > { %v1059_v61 = vadd.f32 %v7080_v40, %v7078_v4  ;;  %v1683_v5 = vmul.f32 %v2301_v46, %v1555_v30  ;;  %v1809_v27 = vmul.f32 %v1681_v14, %v7081_v12  ;;  %v1935_v44 = vadd.f32 %v1934_v7, %v1807_v16  ;;  %v7087_v30 = vld [vmem:[#allocation141_spill] sm:$0xff]  ;;  %v7089_v16 = vld [vmem:[#allocation158_spill] sm:$0xff] }
 0x1a4   : > { %v7083_v50 = vand.u32 2147483647, %v7082_v8  ;;  %v7085_v63 = vand.u32 2147483647, %v7084_v6  ;;  %v5099_v29 = vadd.f32 1e-08, %v1058_v38  ;;  %2326 = vrcp.f32 %v5081_v45 }
 0x1a5   : > { %v1432_v2 = vmul.f32 %v2311_v49, %v5009_v25  ;;  %v1558_v48 = vsub.f32 2.0, %v1430_v15  ;;  %v1684_v51 = vmul.f32 %v2303_v28, %v1556_v32  ;;  %v1810_v10 = vmul.f32 %v1682_v18, %v7086_v17  ;;  %v2317_v40 = vpop.eup %2316  ;;  %v7091_v8 = vld [vmem:[#allocation245_spill] sm:$0xff]  ;;  %v7092_v32 = vld [vmem:[#allocation146_spill] sm:$0xff] }
 0x1a6   : > { %v1060_v57 = vadd.f32 %v7085_v63, %v7083_v50  ;;  %v1936_v46 = vadd.f32 %v1935_v44, %v1808_v11  ;;  %v7088_v14 = vand.u32 2147483647, %v7087_v30  ;;  %v7090_v7 = vand.u32 2147483647, %v7089_v16  ;;  %v7094_v11 = vld [vmem:[#allocation163_spill] sm:$0xff]  ;;  %v7096_v30 = vld [vmem:[#allocation248_spill] sm:$0xff] }
 0x1a7   : > { %v5108_v37 = vadd.f32 1e-08, %v1059_v61  ;;  %2328 = vrcp.f32 %v5090_v23  ;;  %v1433_v38 = vmul.f32 %v2313_v43, %v5018_v41  ;;  %v1559_v12 = vsub.f32 2.0, %v1431_v33  ;;  %v2319_v63 = vpop.eup %2318 }
 0x1a8   : > { %v1061_v4 = vadd.f32 %v7090_v7, %v7088_v14  ;;  %v1685_v25 = vmul.f32 %v2305_v9, %v1557_v62  ;;  %v1811_v15 = vmul.f32 %v1683_v5, %v7091_v8  ;;  %v1937_v28 = vadd.f32 %v1936_v46, %v1809_v27  ;;  %v7097_v62 = vld [vmem:[#allocation147_spill] sm:$0xff]  ;;  %v7099_v27 = vld [vmem:[#allocation164_spill] sm:$0xff] }
 0x1a9   : > { %v7093_v18 = vand.u32 2147483647, %v7092_v32  ;;  %v7095_v44 = vand.u32 2147483647, %v7094_v11  ;;  %v5117_v6 = vadd.f32 1e-08, %v1060_v57  ;;  %2330 = vrcp.f32 %v5099_v29 }
 0x1aa   : > { %v1434_v61 = vmul.f32 %v2315_v54, %v5027_v13  ;;  %v1560_v17 = vsub.f32 2.0, %v1432_v2  ;;  %v1686_v41 = vmul.f32 %v2307_v39, %v1558_v48  ;;  %v1812_v33 = vmul.f32 %v1684_v51, %v7096_v30  ;;  %v2321_v7 = vpop.eup %2320  ;;  %v7101_v32 = vld [vmem:[#allocation249_spill] sm:$0xff]  ;;  %v7102_v48 = vld [vmem:[#allocation148_spill] sm:$0xff] }
 0x1ab   : > { %v1062_v50 = vadd.f32 %v7095_v44, %v7093_v18  ;;  %v1938_v9 = vadd.f32 %v1937_v28, %v1810_v10  ;;  %v7098_v5 = vand.u32 2147483647, %v7097_v62  ;;  %v7100_v46 = vand.u32 2147483647, %v7099_v27  ;;  %v7104_v10 = vld [vmem:[#allocation165_spill] sm:$0xff]  ;;  %v7106_v62 = vld [vmem:[#allocation250_spill] sm:$0xff] }
 0x1ac   : > { %v5126_v16 = vadd.f32 1e-08, %v1061_v4  ;;  %2332 = vrcp.f32 %v5108_v37  ;;  %v1435_v57 = vmul.f32 %v2317_v40, %v5036_v47  ;;  %v1561_v8 = vsub.f32 2.0, %v1433_v38  ;;  %v2323_v44 = vpop.eup %2322 }
 0x1ad   : > { %v1063_v14 = vadd.f32 %v7100_v46, %v7098_v5  ;;  %v1687_v13 = vmul.f32 %v2309_v56, %v1559_v12  ;;  %v1813_v2 = vmul.f32 %v1685_v25, %v7101_v32  ;;  %v1939_v39 = vadd.f32 %v1938_v9, %v1811_v15  ;;  %v7107_v12 = vld [vmem:[#allocation153_spill] sm:$0xff]  ;;  %v7109_v15 = vld [vmem:[#allocation170_spill] sm:$0xff] }
 0x1ae   : > { %v7103_v51 = vand.u32 2147483647, %v7102_v48  ;;  %v7105_v28 = vand.u32 2147483647, %v7104_v10  ;;  %v5135_v11 = vadd.f32 1e-08, %v1062_v50  ;;  %2334 = vrcp.f32 %v5117_v6 }
 0x1af   : > { %v1436_v4 = vmul.f32 %v2319_v63, %v5045_v60  ;;  %v1562_v30 = vsub.f32 2.0, %v1434_v61  ;;  %v1688_v47 = vmul.f32 %v2311_v49, %v1560_v17  ;;  %v1814_v38 = vmul.f32 %v1686_v41, %v7106_v62  ;;  %v2325_v46 = vpop.eup %2324  ;;  %v7111_v48 = vld [vmem:[#allocation253_spill] sm:$0xff]  ;;  %v7112_v17 = vld [vmem:[#allocation154_spill] sm:$0xff] }
 0x1b0   : > { %v1064_v18 = vadd.f32 %v7105_v28, %v7103_v51  ;;  %v1940_v56 = vadd.f32 %v1939_v39, %v1812_v33  ;;  %v7108_v25 = vand.u32 2147483647, %v7107_v12  ;;  %v7110_v9 = vand.u32 2147483647, %v7109_v15  ;;  %v7114_v33 = vld [vmem:[#allocation171_spill] sm:$0xff]  ;;  %v7116_v12 = vld [vmem:[#allocation254_spill] sm:$0xff] }
 0x1b1   : > { %v5144_v27 = vadd.f32 1e-08, %v1063_v14  ;;  %2336 = vrcp.f32 %v5126_v16  ;;  %v1437_v50 = vmul.f32 %v2321_v7, %v5054_v59  ;;  %v1563_v32 = vsub.f32 2.0, %v1435_v57  ;;  %v2327_v28 = vpop.eup %2326 }
 0x1b2   : > { %v1065_v5 = vadd.f32 %v7110_v9, %v7108_v25  ;;  %v1689_v60 = vmul.f32 %v2313_v43, %v1561_v8  ;;  %v1815_v61 = vmul.f32 %v1687_v13, %v7111_v48  ;;  %v1941_v49 = vadd.f32 %v1940_v56, %v1813_v2  ;;  %v7117_v8 = vld [vmem:[#allocation155_spill] sm:$0xff]  ;;  %v7119_v2 = vld [vmem:[#allocation172_spill] sm:$0xff] }
 0x1b3   : > { %v7113_v41 = vand.u32 2147483647, %v7112_v17  ;;  %v7115_v39 = vand.u32 2147483647, %v7114_v33  ;;  %v5153_v10 = vadd.f32 1e-08, %v1064_v18  ;;  %2338 = vrcp.f32 %v5135_v11 }
 0x1b4   : > { %v1438_v14 = vmul.f32 %v2323_v44, %v5063_v55  ;;  %v1564_v62 = vsub.f32 2.0, %v1436_v4  ;;  %v1690_v59 = vmul.f32 %v2315_v54, %v1562_v30  ;;  %v1816_v57 = vmul.f32 %v1688_v47, %v7116_v12  ;;  %v2329_v9 = vpop.eup %2328  ;;  %v7121_v17 = vld [vmem:[#allocation255_spill] sm:$0xff]  ;;  %v7122_v30 = vld [vmem:[#allocation160_spill] sm:$0xff] }
 0x1b5   : > { %v1066_v51 = vadd.f32 %v7115_v39, %v7113_v41  ;;  %v1942_v43 = vadd.f32 %v1941_v49, %v1814_v38  ;;  %v7118_v13 = vand.u32 2147483647, %v7117_v8  ;;  %v7120_v56 = vand.u32 2147483647, %v7119_v2  ;;  %v7124_v38 = vld [vmem:[#allocation177_spill] sm:$0xff]  ;;  %v7126_v8 = vld [vmem:[#allocation258_spill] sm:$0xff] }
 0x1b6   : > { %v5162_v15 = vadd.f32 1e-08, %v1065_v5  ;;  %2340 = vrcp.f32 %v5144_v27  ;;  %v1439_v18 = vmul.f32 %v2325_v46, %v5072_v36  ;;  %v1565_v48 = vsub.f32 2.0, %v1437_v50  ;;  %v2331_v39 = vpop.eup %2330 }
 0x1b7   : > { %v1067_v25 = vadd.f32 %v7120_v56, %v7118_v13  ;;  %v1691_v55 = vmul.f32 %v2317_v40, %v1563_v32  ;;  %v1817_v4 = vmul.f32 %v1689_v60, %v7121_v17  ;;  %v1943_v54 = vadd.f32 %v1942_v43, %v1815_v61  ;;  %v7127_v32 = vld [vmem:[#allocation161_spill] sm:$0xff]  ;;  %v7129_v61 = vld [vmem:[#allocation178_spill] sm:$0xff] }
 0x1b8   : > { %v7123_v47 = vand.u32 2147483647, %v7122_v30  ;;  %v7125_v49 = vand.u32 2147483647, %v7124_v38  ;;  %v5171_v33 = vadd.f32 1e-08, %v1066_v51  ;;  %2342 = vrcp.f32 %v5153_v10 }
 0x1b9   : > { %v1440_v5 = vmul.f32 %v2327_v28, %v5081_v45  ;;  %v1566_v12 = vsub.f32 2.0, %v1438_v14  ;;  %v1692_v36 = vmul.f32 %v2319_v63, %v1564_v62  ;;  %v1818_v50 = vmul.f32 %v1690_v59, %v7126_v8  ;;  %v2333_v56 = vpop.eup %2332  ;;  %v7131_v30 = vld [vmem:[#allocation259_spill] sm:$0xff]  ;;  %v7132_v62 = vld [vmem:[#allocation162_spill] sm:$0xff] }
 0x1ba   : > { %v1068_v41 = vadd.f32 %v7125_v49, %v7123_v47  ;;  %v1944_v40 = vadd.f32 %v1943_v54, %v1816_v57  ;;  %v7128_v60 = vand.u32 2147483647, %v7127_v32  ;;  %v7130_v43 = vand.u32 2147483647, %v7129_v61  ;;  %v7134_v57 = vld [vmem:[#allocation179_spill] sm:$0xff]  ;;  %v7136_v32 = vld [vmem:[#allocation260_spill] sm:$0xff] }
 0x1bb   : > { %v5180_v2 = vadd.f32 1e-08, %v1067_v25  ;;  %2344 = vrcp.f32 %v5162_v15  ;;  %v1441_v51 = vmul.f32 %v2329_v9, %v5090_v23  ;;  %v1567_v17 = vsub.f32 2.0, %v1439_v18  ;;  %v2335_v49 = vpop.eup %2334 }
 0x1bc   : > { %v1069_v13 = vadd.f32 %v7130_v43, %v7128_v60  ;;  %v1693_v45 = vmul.f32 %v2321_v7, %v1565_v48  ;;  %v1819_v14 = vmul.f32 %v1691_v55, %v7131_v30  ;;  %v1945_v63 = vadd.f32 %v1944_v40, %v1817_v4  ;;  %v7137_v48 = vld [vmem:[#allocation167_spill] sm:$0xff]  ;;  %v7139_v4 = vld [vmem:[#allocation184_spill] sm:$0xff] }
 0x1bd   : > { %v7133_v59 = vand.u32 2147483647, %v7132_v62  ;;  %v7135_v54 = vand.u32 2147483647, %v7134_v57  ;;  %v5189_v38 = vadd.f32 1e-08, %v1068_v41  ;;  %2346 = vrcp.f32 %v5171_v33 }
 0x1be   : > { %v1442_v25 = vmul.f32 %v2331_v39, %v5099_v29  ;;  %v1568_v8 = vsub.f32 2.0, %v1440_v5  ;;  %v1694_v23 = vmul.f32 %v2323_v44, %v1566_v12  ;;  %v1820_v18 = vmul.f32 %v1692_v36, %v7136_v32  ;;  %v2337_v43 = vpop.eup %2336  ;;  %v7141_v62 = vld [vmem:[#allocation263_spill] sm:$0xff]  ;;  %v7142_v12 = vld [vmem:[#allocation168_spill] sm:$0xff] }
 0x1bf   : > { %v1070_v47 = vadd.f32 %v7135_v54, %v7133_v59  ;;  %v1946_v7 = vadd.f32 %v1945_v63, %v1818_v50  ;;  %v7138_v55 = vand.u32 2147483647, %v7137_v48  ;;  %v7140_v40 = vand.u32 2147483647, %v7139_v4  ;;  %v7144_v50 = vld [vmem:[#allocation185_spill] sm:$0xff]  ;;  %v7146_v48 = vld [vmem:[#allocation264_spill] sm:$0xff] }
 0x1c0   : > { %v5198_v61 = vadd.f32 1e-08, %v1069_v13  ;;  %2348 = vrcp.f32 %v5180_v2  ;;  %v1443_v41 = vmul.f32 %v2333_v56, %v5108_v37  ;;  %v1569_v30 = vsub.f32 2.0, %v1441_v51  ;;  %v2339_v54 = vpop.eup %2338 }
 0x1c1   : > { %v1071_v60 = vadd.f32 %v7140_v40, %v7138_v55  ;;  %v1695_v29 = vmul.f32 %v2325_v46, %v1567_v17  ;;  %v1821_v5 = vmul.f32 %v1693_v45, %v7141_v62  ;;  %v1947_v44 = vadd.f32 %v1946_v7, %v1819_v14  ;;  %v7147_v17 = vld [vmem:[#allocation169_spill] sm:$0xff]  ;;  %v7149_v14 = vld [vmem:[#allocation186_spill] sm:$0xff] }
 0x1c2   : > { %v7143_v36 = vand.u32 2147483647, %v7142_v12  ;;  %v7145_v63 = vand.u32 2147483647, %v7144_v50  ;;  %v5207_v57 = vadd.f32 1e-08, %v1070_v47  ;;  %2350 = vrcp.f32 %v5189_v38 }
 0x1c3   : > { %v1444_v13 = vmul.f32 %v2335_v49, %v5117_v6  ;;  %v1570_v32 = vsub.f32 2.0, %v1442_v25  ;;  %v1696_v37 = vmul.f32 %v2327_v28, %v1568_v8  ;;  %v1822_v51 = vmul.f32 %v1694_v23, %v7146_v48  ;;  %v2341_v40 = vpop.eup %2340  ;;  %v7151_v12 = vld [vmem:[#allocation265_spill] sm:$0xff]  ;;  %v7152_v8 = vld [vmem:[#allocation174_spill] sm:$0xff] }
 0x1c4   : > { %v1072_v59 = vadd.f32 %v7145_v63, %v7143_v36  ;;  %v1948_v46 = vadd.f32 %v1947_v44, %v1820_v18  ;;  %v7148_v45 = vand.u32 2147483647, %v7147_v17  ;;  %v7150_v7 = vand.u32 2147483647, %v7149_v14  ;;  %v7154_v18 = vld [vmem:[#allocation191_spill] sm:$0xff]  ;;  %v7156_v17 = vld [vmem:[#allocation268_spill] sm:$0xff] }
 0x1c5   : > { %v5216_v4 = vadd.f32 1e-08, %v1071_v60  ;;  %2352 = vrcp.f32 %v5198_v61  ;;  %v1445_v47 = vmul.f32 %v2337_v43, %v5126_v16  ;;  %v1571_v62 = vsub.f32 2.0, %v1443_v41  ;;  %v2343_v63 = vpop.eup %2342 }
 0x1c6   : > { %v1073_v55 = vadd.f32 %v7150_v7, %v7148_v45  ;;  %v1697_v6 = vmul.f32 %v2329_v9, %v1569_v30  ;;  %v1823_v25 = vmul.f32 %v1695_v29, %v7151_v12  ;;  %v1949_v28 = vadd.f32 %v1948_v46, %v1821_v5  ;;  %v7157_v30 = vld [vmem:[#allocation175_spill] sm:$0xff]  ;;  %v7159_v5 = vld [vmem:[#allocation192_spill] sm:$0xff] }
 0x1c7   : > { %v7153_v23 = vand.u32 2147483647, %v7152_v8  ;;  %v7155_v44 = vand.u32 2147483647, %v7154_v18  ;;  %v5225_v50 = vadd.f32 1e-08, %v1072_v59  ;;  %2354 = vrcp.f32 %v5207_v57 }
 0x1c8   : > { %v1446_v60 = vmul.f32 %v2339_v54, %v5135_v11  ;;  %v1572_v48 = vsub.f32 2.0, %v1444_v13  ;;  %v1698_v16 = vmul.f32 %v2331_v39, %v1570_v32  ;;  %v1824_v41 = vmul.f32 %v1696_v37, %v7156_v17  ;;  %v2345_v7 = vpop.eup %2344  ;;  %v7161_v8 = vld [vmem:[#allocation269_spill] sm:$0xff]  ;;  %v7162_v32 = vld [vmem:[#allocation176_spill] sm:$0xff] }
 0x1c9   : > { %v1074_v36 = vadd.f32 %v7155_v44, %v7153_v23  ;;  %v1950_v9 = vadd.f32 %v1949_v28, %v1822_v51  ;;  %v7158_v29 = vand.u32 2147483647, %v7157_v30  ;;  %v7160_v46 = vand.u32 2147483647, %v7159_v5  ;;  %v7164_v51 = vld [vmem:[#allocation193_spill] sm:$0xff]  ;;  %v7166_v30 = vld [vmem:[#allocation270_spill] sm:$0xff] }
 0x1ca   : > { %v5234_v14 = vadd.f32 1e-08, %v1073_v55  ;;  %2356 = vrcp.f32 %v5216_v4  ;;  %v1447_v59 = vmul.f32 %v2341_v40, %v5144_v27  ;;  %v1573_v12 = vsub.f32 2.0, %v1445_v47  ;;  %v2347_v44 = vpop.eup %2346 }
 0x1cb   : > { %v1075_v45 = vadd.f32 %v7160_v46, %v7158_v29  ;;  %v1699_v11 = vmul.f32 %v2333_v56, %v1571_v62  ;;  %v1825_v13 = vmul.f32 %v1697_v6, %v7161_v8  ;;  %v1951_v39 = vadd.f32 %v1950_v9, %v1823_v25  ;;  %v7167_v62 = vld [vmem:[#allocation181_spill] sm:$0xff]  ;;  %v7169_v25 = vld [vmem:[#allocation198_spill] sm:$0xff] }
 0x1cc   : > { %v7163_v37 = vand.u32 2147483647, %v7162_v32  ;;  %v7165_v28 = vand.u32 2147483647, %v7164_v51  ;;  %v5243_v18 = vadd.f32 1e-08, %v1074_v36  ;;  %2358 = vrcp.f32 %v5225_v50 }
 0x1cd   : > { %v1448_v55 = vmul.f32 %v2343_v63, %v5153_v10  ;;  %v1574_v17 = vsub.f32 2.0, %v1446_v60  ;;  %v1700_v27 = vmul.f32 %v2335_v49, %v1572_v48  ;;  %v1826_v47 = vmul.f32 %v1698_v16, %v7166_v30  ;;  %v2349_v46 = vpop.eup %2348  ;;  %v7171_v32 = vld [vmem:[#allocation273_spill] sm:$0xff]  ;;  %v7172_v48 = vld [vmem:[#allocation182_spill] sm:$0xff] }
 0x1ce   : > { %v1076_v23 = vadd.f32 %v7165_v28, %v7163_v37  ;;  %v1952_v56 = vadd.f32 %v1951_v39, %v1824_v41  ;;  %v7168_v6 = vand.u32 2147483647, %v7167_v62  ;;  %v7170_v9 = vand.u32 2147483647, %v7169_v25  ;;  %v7174_v41 = vld [vmem:[#allocation199_spill] sm:$0xff]  ;;  %v7176_v62 = vld [vmem:[#allocation274_spill] sm:$0xff] }
 0x1cf   : > { %v5252_v5 = vadd.f32 1e-08, %v1075_v45  ;;  %2360 = vrcp.f32 %v5234_v14  ;;  %v1449_v36 = vmul.f32 %v2345_v7, %v5162_v15  ;;  %v1575_v8 = vsub.f32 2.0, %v1447_v59  ;;  %v2351_v28 = vpop.eup %2350 }
 0x1d0   : > { %v1077_v29 = vadd.f32 %v7170_v9, %v7168_v6  ;;  %v1701_v10 = vmul.f32 %v2337_v43, %v1573_v12  ;;  %v1827_v60 = vmul.f32 %v1699_v11, %v7171_v32  ;;  %v1953_v49 = vadd.f32 %v1952_v56, %v1825_v13  ;;  %v7177_v12 = vld [vmem:[#allocation183_spill] sm:$0xff] }
 0x1d1   : > { %v7173_v16 = vand.u32 2147483647, %v7172_v48  ;;  %v7175_v39 = vand.u32 2147483647, %v7174_v41  ;;  %v5261_v51 = vadd.f32 1e-08, %v1076_v23  ;;  %2362 = vrcp.f32 %v5243_v18 }
 0x1d2   : > { %v1450_v45 = vmul.f32 %v2347_v44, %v5171_v33  ;;  %v1576_v30 = vsub.f32 2.0, %v1448_v55  ;;  %v1702_v15 = vmul.f32 %v2339_v54, %v1574_v17  ;;  %v1828_v59 = vmul.f32 %v1700_v27, %v7176_v62  ;;  %v2353_v25 = vpop.eup %2352  ;;  %v7180_v32 = vld [vmem:[#allocation275_spill] sm:$0xff]  ;;  %v7181_v17 = vld [vmem:[#allocation188_spill] sm:$0xff]  ;;  %v7184_v41 = vld [vmem:[#allocation278_spill] sm:$0xff] }
 0x1d3   : > { %v1078_v37 = vadd.f32 %v7175_v39, %v7173_v16  ;;  %v1954_v43 = vadd.f32 %v1953_v49, %v1826_v47  ;;  %v7178_v11 = vand.u32 2147483647, %v7177_v12  ;;  %v7179_v13 = vand.u32 2147483647, %v6874_v34 }
 0x1d4   : > { %v5270_v6 = vadd.f32 1e-08, %v1077_v29  ;;  %2364 = vrcp.f32 %v5252_v5  ;;  %v1451_v23 = vmul.f32 %v2349_v46, %v5180_v2  ;;  %v1577_v9 = vsub.f32 2.0, %v1449_v36  ;;  %v2355_v29 = vpop.eup %2354 }
 0x1d5   : > { %v1079_v56 = vadd.f32 %v7179_v13, %v7178_v11  ;;  %v1703_v33 = vmul.f32 %v2341_v40, %v1575_v8  ;;  %v1829_v55 = vmul.f32 %v1701_v10, %v7180_v32  ;;  %v1955_v54 = vadd.f32 %v1954_v43, %v1827_v60  ;;  %v7185_v8 = vld [vmem:[#allocation189_spill] sm:$0xff]  ;;  %v7187_v60 = vld [vmem:[#allocation204_spill] sm:$0xff]  ;;  %v7189_v11 = vld [vmem:[#allocation279_spill] sm:$0xff] }
 0x1d6   : > { %v7182_v27 = vand.u32 2147483647, %v7181_v17  ;;  %v7183_v47 = vand.u32 2147483647, %v6878_v20  ;;  %v5279_v48 = vadd.f32 1e-08, %v1078_v37  ;;  %2366 = vrcp.f32 %v5261_v51 }
 0x1d7   : > { %v1452_v34 = vmul.f32 %v2351_v28, %v5189_v38  ;;  %v1578_v16 = vsub.f32 2.0, %v1450_v45  ;;  %v1704_v2 = vmul.f32 %v2343_v63, %v1576_v30  ;;  %v1830_v36 = vmul.f32 %v1702_v15, %v7184_v41  ;;  %v2357_v37 = vpop.eup %2356  ;;  %v7190_v30 = vld [vmem:[#allocation190_spill] sm:$0xff] }
 0x1d8   : > { %v1080_v49 = vadd.f32 %v7183_v47, %v7182_v27  ;;  %v1956_v40 = vadd.f32 %v1955_v54, %v1828_v59  ;;  %v7186_v10 = vand.u32 2147483647, %v7185_v8  ;;  %v7188_v39 = vand.u32 2147483647, %v7187_v60  ;;  %v7193_v27 = vld [vmem:[#allocation280_spill] sm:$0xff] }
 0x1d9   : > { %v5288_v43 = vadd.f32 1e-08, %v1079_v56  ;;  %2368 = vrcp.f32 %v5270_v6  ;;  %v1453_v20 = vmul.f32 %v2353_v25, %v5198_v61  ;;  %v1579_v12 = vsub.f32 2.0, %v1451_v23  ;;  %v2359_v54 = vpop.eup %2358 }
 0x1da   : > { %v1081_v62 = vadd.f32 %v7188_v39, %v7186_v10  ;;  %v1705_v38 = vmul.f32 %v2345_v7, %v1577_v9  ;;  %v1831_v45 = vmul.f32 %v1703_v33, %v7189_v11  ;;  %v1957_v63 = vadd.f32 %v1956_v40, %v1829_v55  ;;  %v7194_v9 = vld [vmem:[#allocation195_spill] sm:$0xff]  ;;  %v7196_v55 = vld [vmem:[#allocation208_spill] sm:$0xff] }
 0x1db   : > { %v7191_v15 = vand.u32 2147483647, %v7190_v30  ;;  %v7192_v59 = vand.u32 2147483647, %v6880_v42  ;;  %v5297_v32 = vadd.f32 1e-08, %v1080_v49  ;;  %2370 = vrcp.f32 %v5279_v48 }
 0x1dc   : > { %v1454_v56 = vmul.f32 %v2355_v29, %v5207_v57  ;;  %v1580_v17 = vsub.f32 2.0, %v1452_v34  ;;  %v1706_v61 = vmul.f32 %v2347_v44, %v1578_v16  ;;  %v1832_v23 = vmul.f32 %v1704_v2, %v7193_v27  ;;  %v2361_v49 = vpop.eup %2360  ;;  %v7198_v10 = vld [vmem:[#allocation283_spill] sm:$0xff]  ;;  %v7199_v16 = vld [vmem:[#allocation196_spill] sm:$0xff] }
 0x1dd   : > { %v1082_v13 = vadd.f32 %v7192_v59, %v7191_v15  ;;  %v1958_v7 = vadd.f32 %v1957_v63, %v1830_v36  ;;  %v7195_v33 = vand.u32 2147483647, %v7194_v9  ;;  %v7197_v47 = vand.u32 2147483647, %v7196_v55  ;;  %v7201_v36 = vld [vmem:[#allocation209_spill] sm:$0xff]  ;;  %v7203_v15 = vld [vmem:[#allocation284_spill] sm:$0xff] }
 0x1de   : > { %v5306_v40 = vadd.f32 1e-08, %v1081_v62  ;;  %2372 = vrcp.f32 %v5288_v43  ;;  %v1455_v42 = vmul.f32 %v2357_v37, %v5216_v4  ;;  %v1581_v8 = vsub.f32 2.0, %v1453_v20  ;;  %v2363_v63 = vpop.eup %2362  ;;  %v7208_v55 = vld [vmem:[#allocation285_spill] sm:$0xff] }
 0x1df   : > { %v1083_v41 = vadd.f32 %v7197_v47, %v7195_v33  ;;  %v1707_v57 = vmul.f32 %v2349_v46, %v1579_v12  ;;  %v1833_v34 = vmul.f32 %v1705_v38, %v7198_v10  ;;  %v1959_v44 = vadd.f32 %v1958_v7, %v1831_v45  ;;  %v7204_v12 = vld [vmem:[#allocation197_spill] sm:$0xff]  ;;  %v7206_v45 = vld [vmem:[#allocation210_spill] sm:$0xff] }
 0x1e0   : > { %v7200_v2 = vand.u32 2147483647, %v7199_v16  ;;  %v7202_v60 = vand.u32 2147483647, %v7201_v36  ;;  %v5315_v11 = vadd.f32 1e-08, %v1082_v13  ;;  %2374 = vrcp.f32 %v5297_v32 }
 0x1e1   : > { %v1456_v62 = vmul.f32 %v2359_v54, %v5225_v50  ;;  %v1582_v30 = vsub.f32 2.0, %v1454_v56  ;;  %v1708_v4 = vmul.f32 %v2351_v28, %v1580_v17  ;;  %v1834_v20 = vmul.f32 %v1706_v61, %v7203_v15  ;;  %v2365_v9 = vpop.eup %2364  ;;  %v7209_v17 = vld [vmem:[#allocation202_spill] sm:$0xff] }
 0x1e2   : > { %v1084_v39 = vadd.f32 %v7202_v60, %v7200_v2  ;;  %v1960_v46 = vadd.f32 %v1959_v44, %v1832_v23  ;;  %v7205_v38 = vand.u32 2147483647, %v7204_v12  ;;  %v7207_v59 = vand.u32 2147483647, %v7206_v45  ;;  %v7212_v2 = vld [vmem:[#allocation288_spill] sm:$0xff]  ;;  %v7217_v12 = vld [vmem:[#allocation289_spill] sm:$0xff] }
 0x1e3   : > { %v5324_v7 = vadd.f32 1e-08, %v1083_v41  ;;  %2376 = vrcp.f32 %v5306_v40  ;;  %v1457_v13 = vmul.f32 %v2361_v49, %v5234_v14  ;;  %v1583_v33 = vsub.f32 2.0, %v1455_v42  ;;  %v2367_v44 = vpop.eup %2366 }
 0x1e4   : > { %v1085_v27 = vadd.f32 %v7207_v59, %v7205_v38  ;;  %v1709_v50 = vmul.f32 %v2353_v25, %v1581_v8  ;;  %v1835_v56 = vmul.f32 %v1707_v57, %v7208_v55  ;;  %v1961_v28 = vadd.f32 %v1960_v46, %v1833_v34  ;;  %v7213_v8 = vld [vmem:[#allocation207_spill] sm:$0xff]  ;;  %v7215_v34 = vld [vmem:[#allocation213_spill] sm:$0xff] }
 0x1e5   : > { %v7210_v61 = vand.u32 2147483647, %v7209_v17  ;;  %v7211_v23 = vand.u32 2147483647, %v3607_v24  ;;  %v5333_v10 = vadd.f32 1e-08, %v1084_v39  ;;  %2378 = vrcp.f32 %v5315_v11 }
 0x1e6   : > { %v1458_v41 = vmul.f32 %v2363_v63, %v5243_v18  ;;  %v1584_v16 = vsub.f32 2.0, %v1456_v62  ;;  %v1710_v14 = vmul.f32 %v2355_v29, %v1582_v30  ;;  %v1836_v42 = vmul.f32 %v1708_v4, %v7212_v2  ;;  %v2369_v39 = vpop.eup %2368  ;;  %v7218_v30 = vld [vmem:[#allocation212_spill] sm:$0xff]  ;;  %v7222_v17 = vld [vmem:[#allocation290_spill] sm:$0xff] }
 0x1e7   : > { %v1086_v47 = vadd.f32 %v7211_v23, %v7210_v61  ;;  %v1962_v25 = vadd.f32 %v1961_v28, %v1834_v20  ;;  %v7214_v57 = vand.u32 2147483647, %v7213_v8  ;;  %v7216_v36 = vand.u32 2147483647, %v7215_v34  ;;  %v7220_v20 = vld [vmem:[#allocation214_spill] sm:$0xff] }
 0x1e8   : > { %v5342_v15 = vadd.f32 1e-08, %v1085_v27  ;;  %2380 = vrcp.f32 %v5324_v7  ;;  %v1459_v24 = vmul.f32 %v2365_v9, %v5252_v5  ;;  %v1585_v46 = vsub.f32 2.0, %v1457_v13  ;;  %v2371_v55 = vpop.eup %2370 }
 0x1e9   : > { %v1087_v60 = vadd.f32 %v7216_v36, %v7214_v57  ;;  %v1711_v18 = vmul.f32 %v2357_v37, %v1583_v33  ;;  %v1837_v62 = vmul.f32 %v1709_v50, %v7217_v12  ;;  %v1963_v29 = vadd.f32 %v1962_v25, %v1835_v56  ;;  %v7223_v33 = vld [vmem:[#allocation216_spill] sm:$0xff]  ;;  %v7225_v56 = vld [vmem:[#allocation217_spill] sm:$0xff] }
 0x1ea   : > { %v7219_v4 = vand.u32 2147483647, %v7218_v30  ;;  %v7221_v38 = vand.u32 2147483647, %v7220_v20  ;;  %v5351_v59 = vadd.f32 1e-08, %v1086_v47  ;;  %2382 = vrcp.f32 %v5333_v10 }
 0x1eb   : > { %v1460_v27 = vmul.f32 %v2367_v44, %v5261_v51  ;;  %v1586_v28 = vsub.f32 2.0, %v1458_v41  ;;  %v1712_v5 = vmul.f32 %v2359_v54, %v1584_v16  ;;  %v1838_v13 = vmul.f32 %v1710_v14, %v7222_v17  ;;  %v2373_v25 = vpop.eup %2372  ;;  %v7227_v57 = vld [vmem:[#allocation293_spill] sm:$0xff] }
 0x1ec   : > { %v1088_v45 = vadd.f32 %v7221_v38, %v7219_v4  ;;  %v1964_v37 = vadd.f32 %v1963_v29, %v1836_v42  ;;  %v7224_v50 = vand.u32 2147483647, %v7223_v33  ;;  %v7226_v61 = vand.u32 2147483647, %v7225_v56  ;;  %v7228_v16 = vld [vmem:[#allocation221_spill] sm:$0xff]  ;;  %v7230_v42 = vld [vmem:[#allocation222_spill] sm:$0xff] }
 0x1ed   : > { %v5360_v2 = vadd.f32 1e-08, %v1087_v60  ;;  %2384 = vrcp.f32 %v5342_v15  ;;  %v1461_v47 = vmul.f32 %v2369_v39, %v5270_v6  ;;  %v1587_v8 = vsub.f32 2.0, %v1459_v24  ;;  %v2375_v29 = vpop.eup %2374  ;;  %v7232_v4 = vld [vmem:[#allocation294_spill] sm:$0xff] }
 0x1ee   : > { %v1089_v23 = vadd.f32 %v7226_v61, %v7224_v50  ;;  %v1713_v51 = vmul.f32 %v2361_v49, %v1585_v46  ;;  %v1839_v41 = vmul.f32 %v1711_v18, %v7227_v57  ;;  %v1965_v54 = vadd.f32 %v1964_v37, %v1837_v62  ;;  %v7233_v46 = vld [vmem:[#allocation226_spill] sm:$0xff]  ;;  %v7235_v62 = vld [vmem:[#allocation227_spill] sm:$0xff] }
 0x1ef   : > { %v7229_v14 = vand.u32 2147483647, %v7228_v16  ;;  %v7231_v34 = vand.u32 2147483647, %v7230_v42  ;;  %v5369_v12 = vadd.f32 1e-08, %v1088_v45  ;;  %2386 = vrcp.f32 %v5351_v59 }
 0x1f0   : > { %v1462_v60 = vmul.f32 %v2371_v55, %v5279_v48  ;;  %v1588_v30 = vsub.f32 2.0, %v1460_v27  ;;  %v1714_v6 = vmul.f32 %v2363_v63, %v1586_v28  ;;  %v1840_v24 = vmul.f32 %v1712_v5, %v7232_v4  ;;  %v2377_v37 = vpop.eup %2376  ;;  %v7237_v50 = vld [vmem:[#allocation295_spill] sm:$0xff] }
 0x1f1   : > { %v1090_v36 = vadd.f32 %v7231_v34, %v7229_v14  ;;  %v1966_v49 = vadd.f32 %v1965_v54, %v1838_v13  ;;  %v7234_v18 = vand.u32 2147483647, %v7233_v46  ;;  %v7236_v20 = vand.u32 2147483647, %v7235_v62  ;;  %v7238_v28 = vld [vmem:[#allocation231_spill] sm:$0xff]  ;;  %v7240_v13 = vld [vmem:[#allocation232_spill] sm:$0xff] }
 0x1f2   : > { %v5378_v17 = vadd.f32 1e-08, %v1089_v23  ;;  %2388 = vrcp.f32 %v5360_v2  ;;  %v1463_v45 = vmul.f32 %v2373_v25, %v5288_v43  ;;  %v1589_v33 = vsub.f32 2.0, %v1461_v47  ;;  %v2379_v54 = vpop.eup %2378  ;;  %v7242_v14 = vld [vmem:[#allocation298_spill] sm:$0xff] }
 0x1f3   : > { %v1091_v38 = vadd.f32 %v7236_v20, %v7234_v18  ;;  %v1715_v48 = vmul.f32 %v2365_v9, %v1587_v8  ;;  %v1841_v27 = vmul.f32 %v1713_v51, %v7237_v50  ;;  %v1967_v63 = vadd.f32 %v1966_v49, %v1839_v41  ;;  %v7243_v8 = vld [vmem:[#allocation236_spill] sm:$0xff]  ;;  %v7245_v41 = vld [vmem:[#allocation237_spill] sm:$0xff]  ;;  %v7247_v18 = vld [vmem:[#allocation299_spill] sm:$0xff] }
 0x1f4   : > { %v7239_v5 = vand.u32 2147483647, %v7238_v28  ;;  %v7241_v56 = vand.u32 2147483647, %v7240_v13  ;;  %v5387_v57 = vadd.f32 1e-08, %v1090_v36  ;;  %2390 = vrcp.f32 %v5369_v12 }
 0x1f5   : > { %v1464_v23 = vmul.f32 %v2375_v29, %v5297_v32  ;;  %v1590_v16 = vsub.f32 2.0, %v1462_v60  ;;  %v1716_v43 = vmul.f32 %v2367_v44, %v1588_v30  ;;  %v1842_v47 = vmul.f32 %v1714_v6, %v7242_v14  ;;  %v2381_v49 = vpop.eup %2380  ;;  %v7248_v30 = vld [vmem:[#allocation241_spill] sm:$0xff] }
 0x1f6   : > { %v1092_v61 = vadd.f32 %v7241_v56, %v7239_v5  ;;  %v1968_v9 = vadd.f32 %v1967_v63, %v1840_v24  ;;  %v7244_v51 = vand.u32 2147483647, %v7243_v8  ;;  %v7246_v42 = vand.u32 2147483647, %v7245_v41  ;;  %v7250_v24 = vld [vmem:[#allocation242_spill] sm:$0xff]  ;;  %v7252_v5 = vld [vmem:[#allocation300_spill] sm:$0xff] }
 0x1f7   : > { %v5396_v4 = vadd.f32 1e-08, %v1091_v38  ;;  %2392 = vrcp.f32 %v5378_v17  ;;  %v1465_v36 = vmul.f32 %v2377_v37, %v5306_v40  ;;  %v1591_v46 = vsub.f32 2.0, %v1463_v45  ;;  %v2383_v63 = vpop.eup %2382 }
 0x1f8   : > { %v1093_v34 = vadd.f32 %v7246_v42, %v7244_v51  ;;  %v1717_v32 = vmul.f32 %v2369_v39, %v1589_v33  ;;  %v1843_v60 = vmul.f32 %v1715_v48, %v7247_v18  ;;  %v1969_v44 = vadd.f32 %v1968_v9, %v1841_v27  ;;  %v7253_v33 = vld [vmem:[#allocation246_spill] sm:$0xff]  ;;  %v7255_v27 = vld [vmem:[#allocation247_spill] sm:$0xff] }
 0x1f9   : > { %v7249_v6 = vand.u32 2147483647, %v7248_v30  ;;  %v7251_v62 = vand.u32 2147483647, %v7250_v24  ;;  %v5405_v50 = vadd.f32 1e-08, %v1092_v61  ;;  %2394 = vrcp.f32 %v5387_v57 }
 0x1fa   : > { %v1466_v38 = vmul.f32 %v2379_v54, %v5315_v11  ;;  %v1592_v28 = vsub.f32 2.0, %v1464_v23  ;;  %v1718_v40 = vmul.f32 %v2371_v55, %v1590_v16  ;;  %v1844_v45 = vmul.f32 %v1716_v43, %v7252_v5  ;;  %v2385_v9 = vpop.eup %2384  ;;  %v7257_v51 = vld [vmem:[#allocation303_spill] sm:$0xff] }
 0x1fb   : > { %v1094_v20 = vadd.f32 %v7251_v62, %v7249_v6  ;;  %v1970_v39 = vadd.f32 %v1969_v44, %v1842_v47  ;;  %v7254_v48 = vand.u32 2147483647, %v7253_v33  ;;  %v7256_v13 = vand.u32 2147483647, %v7255_v27  ;;  %v7258_v16 = vld [vmem:[#allocation251_spill] sm:$0xff]  ;;  %v7260_v47 = vld [vmem:[#allocation252_spill] sm:$0xff] }
 0x1fc   : > { %v5414_v14 = vadd.f32 1e-08, %v1093_v34  ;;  %2396 = vrcp.f32 %v5396_v4  ;;  %v1467_v61 = vmul.f32 %v2381_v49, %v5324_v7  ;;  %v1593_v8 = vsub.f32 2.0, %v1465_v36  ;;  %v2387_v44 = vpop.eup %2386  ;;  %v7262_v6 = vld [vmem:[#allocation304_spill] sm:$0xff] }
 0x1fd   : > { %v1095_v56 = vadd.f32 %v7256_v13, %v7254_v48  ;;  %v1719_v11 = vmul.f32 %v2373_v25, %v1591_v46  ;;  %v1845_v23 = vmul.f32 %v1717_v32, %v7257_v51  ;;  %v1971_v55 = vadd.f32 %v1970_v39, %v1843_v60  ;;  %v7263_v46 = vld [vmem:[#allocation256_spill] sm:$0xff]  ;;  %v7265_v60 = vld [vmem:[#allocation257_spill] sm:$0xff] }
 0x1fe   : > { %v7259_v43 = vand.u32 2147483647, %v7258_v16  ;;  %v7261_v41 = vand.u32 2147483647, %v7260_v47  ;;  %v5423_v18 = vadd.f32 1e-08, %v1094_v20  ;;  %2398 = vrcp.f32 %v5405_v50 }
 0x1ff   : > { %v1468_v34 = vmul.f32 %v2383_v63, %v5333_v10  ;;  %v1594_v30 = vsub.f32 2.0, %v1466_v38  ;;  %v1720_v7 = vmul.f32 %v2375_v29, %v1592_v28  ;;  %v1846_v36 = vmul.f32 %v1718_v40, %v7262_v6  ;;  %v2389_v39 = vpop.eup %2388  ;;  %v7267_v48 = vld [vmem:[#allocation305_spill] sm:$0xff] }
 0x200   : > { %v1096_v42 = vadd.f32 %v7261_v41, %v7259_v43  ;;  %v1972_v25 = vadd.f32 %v1971_v55, %v1844_v45  ;;  %v7264_v32 = vand.u32 2147483647, %v7263_v46  ;;  %v7266_v24 = vand.u32 2147483647, %v7265_v60  ;;  %v7268_v28 = vld [vmem:[#allocation261_spill] sm:$0xff]  ;;  %v7270_v45 = vld [vmem:[#allocation262_spill] sm:$0xff] }
 0x201   : > { %v5432_v5 = vadd.f32 1e-08, %v1095_v56  ;;  %2400 = vrcp.f32 %v5414_v14  ;;  %v1469_v20 = vmul.f32 %v2385_v9, %v5342_v15  ;;  %v1595_v33 = vsub.f32 2.0, %v1467_v61  ;;  %v2391_v55 = vpop.eup %2390  ;;  %v7272_v43 = vld [vmem:[#allocation308_spill] sm:$0xff] }
 0x202   : > { %v1097_v62 = vadd.f32 %v7266_v24, %v7264_v32  ;;  %v1721_v10 = vmul.f32 %v2377_v37, %v1593_v8  ;;  %v1847_v38 = vmul.f32 %v1719_v11, %v7267_v48  ;;  %v1973_v29 = vadd.f32 %v1972_v25, %v1845_v23  ;;  %v7273_v8 = vld [vmem:[#allocation266_spill] sm:$0xff]  ;;  %v7275_v23 = vld [vmem:[#allocation267_spill] sm:$0xff]  ;;  %v7277_v32 = vld [vmem:[#allocation309_spill] sm:$0xff] }
 0x203   : > { %v7269_v40 = vand.u32 2147483647, %v7268_v28  ;;  %v7271_v27 = vand.u32 2147483647, %v7270_v45  ;;  %v5441_v51 = vadd.f32 1e-08, %v1096_v42  ;;  %2402 = vrcp.f32 %v5423_v18 }
 0x204   : > { %v1470_v56 = vmul.f32 %v2387_v44, %v5351_v59  ;;  %v1596_v16 = vsub.f32 2.0, %v1468_v34  ;;  %v1722_v15 = vmul.f32 %v2379_v54, %v1594_v30  ;;  %v1848_v61 = vmul.f32 %v1720_v7, %v7272_v43  ;;  %v2393_v25 = vpop.eup %2392  ;;  %v7278_v30 = vld [vmem:[#allocation271_spill] sm:$0xff] }
 0x205   : > { %v1098_v13 = vadd.f32 %v7271_v27, %v7269_v40  ;;  %v1974_v37 = vadd.f32 %v1973_v29, %v1846_v36  ;;  %v7274_v11 = vand.u32 2147483647, %v7273_v8  ;;  %v7276_v47 = vand.u32 2147483647, %v7275_v23  ;;  %v7280_v36 = vld [vmem:[#allocation272_spill] sm:$0xff]  ;;  %v7282_v40 = vld [vmem:[#allocation310_spill] sm:$0xff] }
 0x206   : > { %v5450_v6 = vadd.f32 1e-08, %v1097_v62  ;;  %2404 = vrcp.f32 %v5432_v5  ;;  %v1471_v42 = vmul.f32 %v2389_v39, %v5360_v2  ;;  %v1597_v46 = vsub.f32 2.0, %v1469_v20  ;;  %v2395_v29 = vpop.eup %2394 }
 0x207   : > { %v1099_v41 = vadd.f32 %v7276_v47, %v7274_v11  ;;  %v1723_v59 = vmul.f32 %v2381_v49, %v1595_v33  ;;  %v1849_v34 = vmul.f32 %v1721_v10, %v7277_v32  ;;  %v1975_v54 = vadd.f32 %v1974_v37, %v1847_v38  ;;  %v7283_v33 = vld [vmem:[#allocation276_spill] sm:$0xff]  ;;  %v7285_v38 = vld [vmem:[#allocation277_spill] sm:$0xff] }
 0x208   : > { %v7279_v7 = vand.u32 2147483647, %v7278_v30  ;;  %v7281_v60 = vand.u32 2147483647, %v7280_v36  ;;  %v5459_v48 = vadd.f32 1e-08, %v1098_v13  ;;  %2406 = vrcp.f32 %v5441_v51 }
 0x209   : > { %v1472_v62 = vmul.f32 %v2391_v55, %v5369_v12  ;;  %v1598_v28 = vsub.f32 2.0, %v1470_v56  ;;  %v1724_v2 = vmul.f32 %v2383_v63, %v1596_v16  ;;  %v1850_v20 = vmul.f32 %v1722_v15, %v7282_v40  ;;  %v2397_v37 = vpop.eup %2396  ;;  %v7287_v11 = vld [vmem:[#allocation313_spill] sm:$0xff] }
 0x20a   : > { %v1100_v24 = vadd.f32 %v7281_v60, %v7279_v7  ;;  %v1976_v49 = vadd.f32 %v1975_v54, %v1848_v61  ;;  %v7284_v10 = vand.u32 2147483647, %v7283_v33  ;;  %v7286_v45 = vand.u32 2147483647, %v7285_v38  ;;  %v7288_v16 = vld [vmem:[#allocation281_spill] sm:$0xff]  ;;  %v7290_v61 = vld [vmem:[#allocation282_spill] sm:$0xff] }
 0x20b   : > { %v5468_v43 = vadd.f32 1e-08, %v1099_v41  ;;  %2408 = vrcp.f32 %v5450_v6  ;;  %v1473_v13 = vmul.f32 %v2393_v25, %v5378_v17  ;;  %v1599_v8 = vsub.f32 2.0, %v1471_v42  ;;  %v2399_v54 = vpop.eup %2398  ;;  %v7292_v7 = vld [vmem:[#allocation314_spill] sm:$0xff] }
 0x20c   : > { %v1101_v27 = vadd.f32 %v7286_v45, %v7284_v10  ;;  %v1725_v12 = vmul.f32 %v2385_v9, %v1597_v46  ;;  %v1851_v56 = vmul.f32 %v1723_v59, %v7287_v11  ;;  %v1977_v63 = vadd.f32 %v1976_v49, %v1849_v34  ;;  %v7293_v46 = vld [vmem:[#allocation286_spill] sm:$0xff]  ;;  %v7295_v34 = vld [vmem:[#allocation287_spill] sm:$0xff] }
 0x20d   : > { %v7289_v15 = vand.u32 2147483647, %v7288_v16  ;;  %v7291_v23 = vand.u32 2147483647, %v7290_v61  ;;  %v5477_v32 = vadd.f32 1e-08, %v1100_v24  ;;  %2410 = vrcp.f32 %v5459_v48 }
 0x20e   : > { %v1474_v41 = vmul.f32 %v2395_v29, %v5387_v57  ;;  %v1600_v30 = vsub.f32 2.0, %v1472_v62  ;;  %v1726_v17 = vmul.f32 %v2387_v44, %v1598_v28  ;;  %v1852_v42 = vmul.f32 %v1724_v2, %v7292_v7  ;;  %v2401_v49 = vpop.eup %2400  ;;  %v7297_v10 = vld [vmem:[#allocation315_spill] sm:$0xff] }
 0x20f   : > { %v1102_v47 = vadd.f32 %v7291_v23, %v7289_v15  ;;  %v1978_v9 = vadd.f32 %v1977_v63, %v1850_v20  ;;  %v7294_v59 = vand.u32 2147483647, %v7293_v46  ;;  %v7296_v36 = vand.u32 2147483647, %v7295_v34  ;;  %v7298_v28 = vld [vmem:[#allocation291_spill] sm:$0xff]  ;;  %v7300_v20 = vld [vmem:[#allocation292_spill] sm:$0xff] }
 0x210   : > { %v5486_v40 = vadd.f32 1e-08, %v1101_v27  ;;  %2412 = vrcp.f32 %v5468_v43  ;;  %v1475_v24 = vmul.f32 %v2397_v37, %v5396_v4  ;;  %v1601_v33 = vsub.f32 2.0, %v1473_v13  ;;  %v2403_v63 = vpop.eup %2402  ;;  %v7302_v15 = vld [vmem:[#allocation318_spill] sm:$0xff] }
 0x211   : > { %v1103_v60 = vadd.f32 %v7296_v36, %v7294_v59  ;;  %v1727_v57 = vmul.f32 %v2389_v39, %v1599_v8  ;;  %v1853_v62 = vmul.f32 %v1725_v12, %v7297_v10  ;;  %v1979_v44 = vadd.f32 %v1978_v9, %v1851_v56  ;;  %v7303_v8 = vld [vmem:[#allocation296_spill] sm:$0xff]  ;;  %v7305_v56 = vld [vmem:[#allocation297_spill] sm:$0xff]  ;;  %v7307_v59 = vld [vmem:[#allocation319_spill] sm:$0xff] }
 0x212   : > { %v7299_v2 = vand.u32 2147483647, %v7298_v28  ;;  %v7301_v38 = vand.u32 2147483647, %v7300_v20  ;;  %v5495_v11 = vadd.f32 1e-08, %v1102_v47  ;;  %2414 = vrcp.f32 %v5477_v32 }
 0x213   : > { %v1476_v27 = vmul.f32 %v2399_v54, %v5405_v50  ;;  %v1602_v16 = vsub.f32 2.0, %v1474_v41  ;;  %v1728_v4 = vmul.f32 %v2391_v55, %v1600_v30  ;;  %v1854_v13 = vmul.f32 %v1726_v17, %v7302_v15  ;;  %v2405_v9 = vpop.eup %2404  ;;  %v7308_v30 = vld [vmem:[#allocation301_spill] sm:$0xff] }
 0x214   : > { %v1104_v45 = vadd.f32 %v7301_v38, %v7299_v2  ;;  %v1980_v39 = vadd.f32 %v1979_v44, %v1852_v42  ;;  %v7304_v12 = vand.u32 2147483647, %v7303_v8  ;;  %v7306_v61 = vand.u32 2147483647, %v7305_v56  ;;  %v7310_v42 = vld [vmem:[#allocation302_spill] sm:$0xff]  ;;  %v7312_v2 = vld [vmem:[#allocation320_spill] sm:$0xff] }
 0x215   : > { %v5504_v7 = vadd.f32 1e-08, %v1103_v60  ;;  %2416 = vrcp.f32 %v5486_v40  ;;  %v1477_v47 = vmul.f32 %v2401_v49, %v5414_v14  ;;  %v1603_v46 = vsub.f32 2.0, %v1475_v24  ;;  %v2407_v44 = vpop.eup %2406 }
 0x216   : > { %v1105_v23 = vadd.f32 %v7306_v61, %v7304_v12  ;;  %v1729_v50 = vmul.f32 %v2393_v25, %v1601_v33  ;;  %v1855_v41 = vmul.f32 %v1727_v57, %v7307_v59  ;;  %v1981_v55 = vadd.f32 %v1980_v39, %v1853_v62  ;;  %v7313_v33 = vld [vmem:[#allocation306_spill] sm:$0xff]  ;;  %v7315_v62 = vld [vmem:[#allocation307_spill] sm:$0xff]  ;;  %v7317_v12 = vld [vmem:[#allocation321_spill] sm:$0xff] }
 0x217   : > { %v7309_v17 = vand.u32 2147483647, %v7308_v30  ;;  %v7311_v34 = vand.u32 2147483647, %v7310_v42  ;;  %v5513_v10 = vadd.f32 1e-08, %v1104_v45  ;;  %2418 = vrcp.f32 %v5495_v11 }
 0x218   : > { %v1478_v60 = vmul.f32 %v2403_v63, %v5423_v18  ;;  %v1604_v28 = vsub.f32 2.0, %v1476_v27  ;;  %v1730_v14 = vmul.f32 %v2395_v29, %v1602_v16  ;;  %v1856_v24 = vmul.f32 %v1728_v4, %v7312_v2  ;;  %v2409_v39 = vpop.eup %2408  ;;  %v7318_v16 = vld [vmem:[#allocation311_spill] sm:$0xff] }
 0x219   : > { %v1106_v36 = vadd.f32 %v7311_v34, %v7309_v17  ;;  %v1982_v25 = vadd.f32 %v1981_v55, %v1854_v13  ;;  %v7314_v57 = vand.u32 2147483647, %v7313_v33  ;;  %v7316_v20 = vand.u32 2147483647, %v7315_v62  ;;  %v7320_v13 = vld [vmem:[#allocation312_spill] sm:$0xff]  ;;  %v7322_v17 = vld [vmem:[#allocation322_spill] sm:$0xff] }
 0x21a   : > { %v5522_v15 = vadd.f32 1e-08, %v1105_v23  ;;  %2420 = vrcp.f32 %v5504_v7  ;;  %v1479_v45 = vmul.f32 %v2405_v9, %v5432_v5  ;;  %v1605_v8 = vsub.f32 2.0, %v1477_v47  ;;  %v2411_v55 = vpop.eup %2410 }
 0x21b   : > { %v1107_v38 = vadd.f32 %v7316_v20, %v7314_v57  ;;  %v1731_v18 = vmul.f32 %v2397_v37, %v1603_v46  ;;  %v1857_v27 = vmul.f32 %v1729_v50, %v7317_v12  ;;  %v1983_v29 = vadd.f32 %v1982_v25, %v1855_v41  ;;  %v7323_v46 = vld [vmem:[#allocation316_spill] sm:$0xff]  ;;  %v7325_v41 = vld [vmem:[#allocation317_spill] sm:$0xff]  ;;  %v7327_v57 = vld [vmem:[#allocation323_spill] sm:$0xff] }
 0x21c   : > { %v7319_v4 = vand.u32 2147483647, %v7318_v16  ;;  %v7321_v56 = vand.u32 2147483647, %v7320_v13  ;;  %v5531_v59 = vadd.f32 1e-08, %v1106_v36  ;;  %2422 = vrcp.f32 %v5513_v10 }
 0x21d   : > { %v1480_v23 = vmul.f32 %v2407_v44, %v5441_v51  ;;  %v1606_v30 = vsub.f32 2.0, %v1478_v60  ;;  %v1732_v5 = vmul.f32 %v2399_v54, %v1604_v28  ;;  %v1858_v47 = vmul.f32 %v1730_v14, %v7322_v17  ;;  %v2413_v25 = vpop.eup %2412  ;;  %v7328_v28 = vld [vmem:[#allocation342_spill] sm:$0xff] }
 0x21e   : > { %v1108_v61 = vadd.f32 %v7321_v56, %v7319_v4  ;;  %v1984_v37 = vadd.f32 %v1983_v29, %v1856_v24  ;;  %v7324_v50 = vand.u32 2147483647, %v7323_v46  ;;  %v7326_v42 = vand.u32 2147483647, %v7325_v41  ;;  %v7330_v24 = vld [vmem:[#allocation358_spill] sm:$0xff]  ;;  %v7332_v4 = vld [vmem:[#allocation324_spill] sm:$0xff] }
 0x21f   : > { %v5540_v2 = vadd.f32 1e-08, %v1107_v38  ;;  %2424 = vrcp.f32 %v5522_v15  ;;  %v1481_v36 = vmul.f32 %v2409_v39, %v5450_v6  ;;  %v1607_v33 = vsub.f32 2.0, %v1479_v45  ;;  %v2415_v29 = vpop.eup %2414 }
 0x220   : > { %v1109_v34 = vadd.f32 %v7326_v42, %v7324_v50  ;;  %v1733_v51 = vmul.f32 %v2401_v49, %v1605_v8  ;;  %v1859_v60 = vmul.f32 %v1731_v18, %v7327_v57  ;;  %v1985_v54 = vadd.f32 %v1984_v37, %v1857_v27  ;;  %v7333_v8 = vld [vmem:[#allocation343_spill] sm:$0xff]  ;;  %v7337_v50 = vld [vmem:[#allocation325_spill] sm:$0xff] }
 0x221   : > { %v7329_v14 = vand.u32 2147483647, %v7328_v28  ;;  %v7331_v62 = vand.u32 2147483647, %v7330_v24  ;;  %v5549_v12 = vadd.f32 1e-08, %v1108_v61  ;;  %2426 = vrcp.f32 %v5531_v59 }
 0x222   : > { %v1482_v38 = vmul.f32 %v2411_v55, %v5459_v48  ;;  %v1608_v16 = vsub.f32 2.0, %v1480_v23  ;;  %v1734_v6 = vmul.f32 %v2403_v63, %v1606_v30  ;;  %v1860_v45 = vmul.f32 %v1732_v5, %v7332_v4  ;;  %v7335_v27 = vld [vmem:[#allocation359_spill] sm:$0xff]  ;;  %v2417_v37 = vpop.eup %2416  ;;  %v7338_v30 = vld [vmem:[#allocation344_spill] sm:$0xff] }
 0x223   : > { %v1110_v20 = vadd.f32 %v7331_v62, %v7329_v14  ;;  %v1986_v49 = vadd.f32 %v1985_v54, %v1858_v47  ;;  %v7334_v18 = vand.u32 2147483647, %v7333_v8  ;;  %v7336_v13 = vand.u32 2147483647, %v7335_v27  ;;  %v7340_v47 = vld [vmem:[#allocation360_spill] sm:$0xff]  ;;  %v7342_v62 = vld [vmem:[#allocation326_spill] sm:$0xff] }
 0x224   : > { %v5558_v17 = vadd.f32 1e-08, %v1109_v34  ;;  %2428 = vrcp.f32 %v5540_v2  ;;  %v1483_v61 = vmul.f32 %v2413_v25, %v5468_v43  ;;  %v1609_v46 = vsub.f32 2.0, %v1481_v36  ;;  %v2419_v54 = vpop.eup %2418 }
 0x225   : > { %v1111_v56 = vadd.f32 %v7336_v13, %v7334_v18  ;;  %v1735_v48 = vmul.f32 %v2405_v9, %v1607_v33  ;;  %v1861_v23 = vmul.f32 %v1733_v51, %v7337_v50  ;;  %v1987_v63 = vadd.f32 %v1986_v49, %v1859_v60  ;;  %v7343_v33 = vld [vmem:[#allocation345_spill] sm:$0xff]  ;;  %v7346_v50 = vld [vmem:[#allocation327_spill] sm:$0xff] }
 0x226   : > { %v7339_v5 = vand.u32 2147483647, %v7338_v30  ;;  %v7341_v41 = vand.u32 2147483647, %v7340_v47  ;;  %v5567_v57 = vadd.f32 1e-08, %v1110_v20  ;;  %2430 = vrcp.f32 %v5549_v12 }
 0x227   : > { %v1484_v34 = vmul.f32 %v2415_v29, %v5477_v32  ;;  %v1610_v14 = vsub.f32 2.0, %v1482_v38  ;;  %v1736_v43 = vmul.f32 %v2407_v44, %v1608_v16  ;;  %v1862_v36 = vmul.f32 %v1734_v6, %v7342_v62  ;;  %v2421_v18 = vpop.eup %2420  ;;  %v7347_v16 = vld [vmem:[#allocation346_spill] sm:$0xff] }
 0x228   : > { %v1112_v42 = vadd.f32 %v7341_v41, %v7339_v5  ;;  %v1988_v9 = vadd.f32 %v1987_v63, %v1860_v45  ;;  %v7344_v51 = vand.u32 2147483647, %v7343_v33  ;;  %v7345_v60 = vand.u32 2147483647, %v6940_v58 }
 0x229   : > { %v5576_v49 = vadd.f32 1e-08, %v1111_v56  ;;  %2432 = vrcp.f32 %v5558_v17  ;;  %v1485_v20 = vmul.f32 %v2417_v37, %v5486_v40  ;;  %v1611_v13 = vsub.f32 2.0, %v1483_v61  ;;  %v2423_v41 = vpop.eup %2422 }
 0x22a   : > { %v1113_v4 = vadd.f32 %v7345_v60, %v7344_v51  ;;  %v1737_v32 = vmul.f32 %v2409_v39, %v1609_v46  ;;  %v1863_v38 = vmul.f32 %v1735_v48, %v7346_v50  ;;  %v1989_v44 = vadd.f32 %v1988_v9, %v1861_v23  ;;  %v7350_v51 = vld [vmem:[#allocation328_spill] sm:$0xff]  ;;  %v7351_v46 = vld [vmem:[#allocation347_spill] sm:$0xff] }
 0x22b   : > { %v7348_v6 = vand.u32 2147483647, %v7347_v16  ;;  %v7349_v45 = vand.u32 2147483647, %v4723_v52  ;;  %v5585_v5 = vadd.f32 1e-08, %v1112_v42  ;;  %2434 = vrcp.f32 %v5567_v57 }
 0x22c   : > { %v1486_v56 = vmul.f32 %v2419_v54, %v5495_v11  ;;  %v1612_v62 = vsub.f32 2.0, %v1484_v34  ;;  %v1738_v40 = vmul.f32 %v2411_v55, %v1610_v14  ;;  %v1864_v61 = vmul.f32 %v1736_v43, %v7350_v51  ;;  %v2425_v42 = vpop.eup %2424  ;;  %v7354_v16 = vld [vmem:[#allocation329_spill] sm:$0xff]  ;;  %v7355_v14 = vld [vmem:[#allocation348_spill] sm:$0xff]  ;;  %v7358_v51 = vld [vmem:[#allocation330_spill] sm:$0xff] }
 0x22d   : > { %v1114_v63 = vadd.f32 %v7349_v45, %v7348_v6  ;;  %v1990_v39 = vadd.f32 %v1989_v44, %v1862_v36  ;;  %v7352_v48 = vand.u32 2147483647, %v7351_v46  ;;  %v7353_v23 = vand.u32 2147483647, %v4740_v21 }
 0x22e   : > { %v5594_v60 = vadd.f32 1e-08, %v1113_v4  ;;  %2436 = vrcp.f32 %v5576_v49  ;;  %v1487_v52 = vmul.f32 %v2421_v18, %v5504_v7  ;;  %v1613_v50 = vsub.f32 2.0, %v1485_v20  ;;  %v2427_v4 = vpop.eup %2426 }
 0x22f   : > { %v1115_v9 = vadd.f32 %v7353_v23, %v7352_v48  ;;  %v1739_v11 = vmul.f32 %v2413_v25, %v1611_v13  ;;  %v1865_v34 = vmul.f32 %v1737_v32, %v7354_v16  ;;  %v1991_v55 = vadd.f32 %v1990_v39, %v1863_v38  ;;  %v7359_v13 = vld [vmem:[#allocation349_spill] sm:$0xff]  ;;  %v7362_v23 = vld [vmem:[#allocation331_spill] sm:$0xff] }
 0x230   : > { %v7356_v43 = vand.u32 2147483647, %v7355_v14  ;;  %v7357_v36 = vand.u32 2147483647, %v4755_v31  ;;  %v5603_v6 = vadd.f32 1e-08, %v1114_v63  ;;  %2438 = vrcp.f32 %v5585_v5 }
 0x231   : > { %v1488_v21 = vmul.f32 %v2423_v41, %v5513_v10  ;;  %v1614_v45 = vsub.f32 2.0, %v1486_v56  ;;  %v1740_v7 = vmul.f32 %v2415_v29, %v1612_v62  ;;  %v1866_v20 = vmul.f32 %v1738_v40, %v7358_v51  ;;  %v2429_v63 = vpop.eup %2428  ;;  %v7363_v62 = vld [vmem:[#allocation350_spill] sm:$0xff] }
 0x232   : > { %v1116_v44 = vadd.f32 %v7357_v36, %v7356_v43  ;;  %v1992_v25 = vadd.f32 %v1991_v55, %v1864_v61  ;;  %v7360_v32 = vand.u32 2147483647, %v7359_v13  ;;  %v7361_v38 = vand.u32 2147483647, %v4765_v0  ;;  %v7366_v43 = vld [vmem:[#allocation332_spill] sm:$0xff]  ;;  %v7370_v13 = vld [vmem:[#allocation333_spill] sm:$0xff] }
 0x233   : > { %v5612_v46 = vadd.f32 1e-08, %v1115_v9  ;;  %2440 = vrcp.f32 %v5594_v60  ;;  %v1489_v31 = vmul.f32 %v2425_v42, %v5522_v15  ;;  %v1615_v48 = vsub.f32 2.0, %v1487_v52  ;;  %v2431_v9 = vpop.eup %2430 }
 0x234   : > { %v1117_v39 = vadd.f32 %v7361_v38, %v7360_v32  ;;  %v1741_v10 = vmul.f32 %v2417_v37, %v1613_v50  ;;  %v1867_v56 = vmul.f32 %v1739_v11, %v7362_v23  ;;  %v1993_v29 = vadd.f32 %v1992_v25, %v1865_v34  ;;  %v7367_v50 = vld [vmem:[#allocation351_spill] sm:$0xff] }
 0x235   : > { %v7364_v40 = vand.u32 2147483647, %v7363_v62  ;;  %v7365_v61 = vand.u32 2147483647, %v4782_v35  ;;  %v5621_v55 = vadd.f32 1e-08, %v1116_v44  ;;  %2442 = vrcp.f32 %v5603_v6 }
 0x236   : > { %v1490_v0 = vmul.f32 %v2427_v4, %v5531_v59  ;;  %v1616_v14 = vsub.f32 2.0, %v1488_v21  ;;  %v1742_v15 = vmul.f32 %v2419_v54, %v1614_v45  ;;  %v1868_v52 = vmul.f32 %v1740_v7, %v7366_v43  ;;  %v2433_v44 = vpop.eup %2432  ;;  %v7371_v45 = vld [vmem:[#allocation352_spill] sm:$0xff]  ;;  %v7378_v43 = vld [vmem:[#allocation335_spill] sm:$0xff] }
 0x237   : > { %v1118_v16 = vadd.f32 %v7365_v61, %v7364_v40  ;;  %v1994_v37 = vadd.f32 %v1993_v29, %v1866_v20  ;;  %v7368_v11 = vand.u32 2147483647, %v7367_v50  ;;  %v7369_v34 = vand.u32 2147483647, %v4797_v19  ;;  %v7374_v29 = vld [vmem:[#allocation334_spill] sm:$0xff] }
 0x238   : > { %v5630_v51 = vadd.f32 1e-08, %v1117_v39  ;;  %2444 = vrcp.f32 %v5612_v46  ;;  %v1491_v35 = vmul.f32 %v2429_v63, %v5540_v2  ;;  %v1617_v25 = vsub.f32 2.0, %v1489_v31  ;;  %v2435_v39 = vpop.eup %2434 }
 0x239   : > { %v1119_v36 = vadd.f32 %v7369_v34, %v7368_v11  ;;  %v1743_v59 = vmul.f32 %v2421_v18, %v1615_v48  ;;  %v1869_v21 = vmul.f32 %v1741_v10, %v7370_v13  ;;  %v1995_v54 = vadd.f32 %v1994_v37, %v1867_v56  ;;  %v7375_v48 = vld [vmem:[#allocation353_spill] sm:$0xff]  ;;  %v7385_v13 = vld [vmem:[#allocation55_spill] sm:$0xff] }
 0x23a   : > { %v7372_v7 = vand.u32 2147483647, %v7371_v45  ;;  %v7373_v20 = vand.u32 2147483647, %v4807_v26  ;;  %v5639_v38 = vadd.f32 1e-08, %v1118_v16  ;;  %2446 = vrcp.f32 %v5621_v55 }
 0x23b   : > { %v1492_v19 = vmul.f32 %v2431_v9, %v5549_v12  ;;  %v1618_v23 = vsub.f32 2.0, %v1490_v0  ;;  %v1744_v2 = vmul.f32 %v2423_v41, %v1616_v14  ;;  %v1870_v31 = vmul.f32 %v1742_v15, %v7374_v29  ;;  %v2437_v61 = vpop.eup %2436  ;;  %v7379_v14 = vld [vmem:[#allocation354_spill] sm:$0xff] }
 0x23c   : > { %v1120_v32 = vadd.f32 %v7373_v20, %v7372_v7  ;;  %v1996_v18 = vadd.f32 %v1995_v54, %v1868_v52  ;;  %v7376_v10 = vand.u32 2147483647, %v7375_v48  ;;  %v7377_v56 = vand.u32 2147483647, %v4824_v3 }
 0x23d   : > { %v5648_v40 = vadd.f32 1e-08, %v1119_v36  ;;  %2448 = vrcp.f32 %v5630_v51  ;;  %v1493_v26 = vmul.f32 %v2433_v44, %v5558_v17  ;;  %v1619_v16 = vsub.f32 2.0, %v1491_v35  ;;  %v2439_v11 = vpop.eup %2438  ;;  %v7382_v36 = vld [vmem:[#allocation336_spill] sm:$0xff] }
 0x23e   : > { %v1121_v62 = vadd.f32 %v7377_v56, %v7376_v10  ;;  %v1745_v12 = vmul.f32 %v2425_v42, %v1617_v25  ;;  %v1871_v0 = vmul.f32 %v1743_v59, %v7378_v43  ;;  %v1997_v41 = vadd.f32 %v1996_v18, %v1869_v21  ;;  %v7383_v25 = vld [vmem:[#allocation355_spill] sm:$0xff] }
 0x23f   : > { %v7380_v15 = vand.u32 2147483647, %v7379_v14  ;;  %v7381_v52 = vand.u32 2147483647, %v4839_v53  ;;  %v5657_v50 = vadd.f32 1e-08, %v1120_v32  ;;  %2450 = vrcp.f32 %v5639_v38 }
 0x240   : > { %v1494_v3 = vmul.f32 %v2435_v39, %v5567_v57  ;;  %v1620_v34 = vsub.f32 2.0, %v1492_v19  ;;  %v1746_v17 = vmul.f32 %v2427_v4, %v1618_v23  ;;  %v1872_v35 = vmul.f32 %v1744_v2, %v7382_v36  ;;  %v2441_v7 = vpop.eup %2440  ;;  %v7387_v32 = vld [vmem:[#allocation337_spill] sm:$0xff]  ;;  %v7388_v23 = vld [vmem:[#allocation356_spill] sm:$0xff] }
 0x241   : > { %v1122_v37 = vadd.f32 %v7381_v52, %v7380_v15  ;;  %v1998_v42 = vadd.f32 %v1997_v41, %v1870_v31  ;;  %v7384_v59 = vand.u32 2147483647, %v7383_v25  ;;  %v7386_v21 = vand.u32 2147483647, %v7385_v13  ;;  %v7395_v52 = vld [vmem:[#allocation339_spill] sm:$0xff] }
 0x242   : > { %v5666_v45 = vadd.f32 1e-08, %v1121_v62  ;;  %2452 = vrcp.f32 %v5648_v40  ;;  %v1495_v53 = vmul.f32 %v2437_v61, %v5576_v49  ;;  %v1621_v20 = vsub.f32 2.0, %v1493_v26  ;;  %v2443_v10 = vpop.eup %2442  ;;  %v7391_v62 = vld [vmem:[#allocation338_spill] sm:$0xff] }
 0x243   : > { %v1123_v54 = vadd.f32 %v7386_v21, %v7384_v59  ;;  %v1747_v57 = vmul.f32 %v2429_v63, %v1619_v16  ;;  %v1873_v19 = vmul.f32 %v1745_v12, %v7387_v32  ;;  %v1999_v4 = vadd.f32 %v1998_v42, %v1871_v0  ;;  %v7392_v16 = vld [vmem:[#allocation357_spill] sm:$0xff]  ;;  %v2471_v32 = vld [vmem:[%s2758_s18 + $0x3a0] sm:$0xff] }
 0x244   : > { %v7389_v2 = vand.u32 2147483647, %v7388_v23  ;;  %v7390_v29 = vand.u32 2147483647, %v4866_v22  ;;  %v5675_v18 = vadd.f32 1e-08, %v1122_v37  ;;  %2454 = vrcp.f32 %v5657_v50 }
 0x245   : > { %v1496_v48 = vmul.f32 %v2439_v11, %v5585_v5  ;;  %v1622_v56 = vsub.f32 2.0, %v1494_v3  ;;  %v1748_v49 = vmul.f32 %v2431_v9, %v1620_v34  ;;  %v1874_v26 = vmul.f32 %v1746_v17, %v7391_v62  ;;  %v2445_v14 = vpop.eup %2444 }
 0x246   : > { %v1124_v31 = vadd.f32 %v7390_v29, %v7389_v2  ;;  %v2000_v63 = vadd.f32 %v1999_v4, %v1872_v35  ;;  %v7393_v12 = vand.u32 2147483647, %v7392_v16  ;;  %v7394_v43 = vand.u32 2147483647, %v4879_v1  ;;  %v2474_v16 = vld [vmem:[%s2752_s6 + $0x3b0] sm:$0xff] }
 0x247   : > { %v5684_v41 = vadd.f32 1e-08, %v1123_v54  ;;  %2456 = vrcp.f32 %v5666_v45  ;;  %v1497_v22 = vmul.f32 %v2441_v7, %v5594_v60  ;;  %v1623_v15 = vsub.f32 2.0, %v1495_v53  ;;  %v5696_v36 = vpop.eup %2446 }
 0x248   : > { %v1125_v0 = vadd.f32 %v7394_v43, %v7393_v12  ;;  %v1749_v5 = vmul.f32 %v2433_v44, %v1621_v20  ;;  %v1875_v37 = vmul.f32 %v1747_v57, %v7395_v52  ;;  %v2001_v9 = vadd.f32 %v2000_v63, %v1873_v19  ;;  %v7397_v44 = vld [vmem:[#allocation340_spill] sm:$0xff]  ;;  %v2470_v57 = vld [vmem:[%s2752_s6 + $0x3a0] sm:$0xff]  ;;  %v2476_v52 = vld [vmem:[%s2752_s6 + $0x3b8] sm:$0xff] }
 0x249   : > { %v7396_v3 = vsub.f32 %v7328_v28, %v7330_v24  ;;  %v5692_v17 = vadd.f32 1e-08, %v1124_v31  ;;  %2458 = vrcp.f32 %v5675_v18  ;;  %v1498_v1 = vmul.f32 %v2443_v10, %v5603_v6  ;;  %v2472_v31 = vld [vmem:[%s2752_s6 + $0x3a8] sm:$0xff]  ;;  %v2475_v12 = vld [vmem:[%s2758_s18 + $0x3b0] sm:$0xff] }
 0x24a   : > { %v1624_v60 = vsub.f32 2.0, %v1496_v48  ;;  %v1750_v35 = vmul.f32 %v2435_v39, %v1622_v56  ;;  %v1876_v42 = vmul.f32 %v1748_v49, %v7397_v44  ;;  %v2002_v25 = vadd.f32 %v2001_v9, %v1874_v26  ;;  %v5706_v21 = vpop.eup %2448  ;;  %v7399_v39 = vld [vmem:[#allocation341_spill] sm:$0xff]  ;;  %v2473_v48 = vld [vmem:[%s2758_s18 + $0x3a8] sm:$0xff]  ;;  %v2478_v44 = vld [vmem:[%s2752_s6 + $0x3c0] sm:$0xff] }
 0x24b   : > { %v726_v34 = vand.u32 2147483647, %v7396_v3  ;;  %v7398_v59 = vsub.f32 %v7333_v8, %v7335_v27  ;;  %v5702_v24 = vadd.f32 1e-08, %v1125_v0  ;;  %2460 = vrcp.f32 %v5684_v41 }
 0x24c   : > { %v1499_v13 = vmul.f32 %v2445_v14, %v5612_v46  ;;  %v1625_v6 = vsub.f32 2.0, %v1497_v22  ;;  %v1751_v54 = vmul.f32 %v2437_v61, %v1623_v15  ;;  %v1877_v53 = vmul.f32 %v1749_v5, %v7399_v39  ;;  %v5717_v4 = vpop.eup %2450  ;;  %v2480_v39 = vld [vmem:[%s2752_s6 + $0x3c8] sm:$0xff] }
 0x24d   : > { %v727_v28 = vand.u32 2147483647, %v7398_v59  ;;  %v2003_v20 = vadd.f32 %v2002_v25, %v1875_v37  ;;  %v602_v19 = vsub.f32 %v2470_v57, %v2471_v32  ;;  %v7400_v8 = vsub.f32 %v7338_v30, %v7340_v47  ;;  %v2477_v37 = vld [vmem:[%s2758_s18 + $0x3b8] sm:$0xff] }
 0x24e   : > { %2462 = vrcp.f32 %v5692_v17  ;;  %v1500_v46 = vmul.f32 %v5696_v36, %v5621_v55  ;;  %v1626_v23 = vsub.f32 2.0, %v1498_v1  ;;  %v1752_v61 = vmul.f32 %v2439_v11, %v1624_v60 }
 0x24f   : > { %v728_v27 = vand.u32 2147483647, %v7400_v8  ;;  %v1878_v2 = vmul.f32 %v1750_v35, %v726_v34  ;;  %v2004_v29 = vadd.f32 %v2003_v20, %v1876_v42  ;;  %v603_v56 = vsub.f32 %v2472_v31, %v2473_v48  ;;  %v2453_v49 = vpop.eup %2452  ;;  %v2479_v42 = vld [vmem:[%s2758_s18 + $0x3c0] sm:$0xff] }
 0x250   : > { %v7401_v30 = vsub.f32 %v7343_v33, %v6940_v58  ;;  %2464 = vrcp.f32 %v5702_v24  ;;  %v1501_v55 = vmul.f32 %v5706_v21, %v5630_v51  ;;  %v1627_v62 = vsub.f32 2.0, %v1499_v13 }
 0x251   : > { %v1753_v26 = vmul.f32 %v2441_v7, %v1625_v6  ;;  %v1879_v11 = vmul.f32 %v1751_v54, %v727_v28  ;;  %v2005_v63 = vadd.f32 %v2004_v29, %v1877_v53  ;;  %v604_v43 = vsub.f32 %v2474_v16, %v2475_v12  ;;  %v2455_v33 = vpop.eup %2454  ;;  %v2481_v53 = vld [vmem:[%s2758_s18 + $0x3c8] sm:$0xff]  ;;  %v2486_v12 = vld [vmem:[%s2752_s6 + $0x3e0] sm:$0xff] }
 0x252   : > { %v729_v47 = vand.u32 2147483647, %v7401_v30  ;;  %v730_v0 = vand.u32 2147483647, %v602_v19  ;;  %v1502_v58 = vmul.f32 %v5717_v4, %v5639_v38  ;;  %v1628_v22 = vsub.f32 2.0, %v1500_v46  ;;  %v2482_v46 = vld [vmem:[%s2752_s6 + $0x3d0] sm:$0xff] }
 0x253   : > { %v1754_v15 = vmul.f32 %v2443_v10, %v1626_v23  ;;  %v1880_v51 = vmul.f32 %v1752_v61, %v728_v27  ;;  %v2006_v5 = vadd.f32 %v2005_v63, %v1878_v2  ;;  %v605_v9 = vsub.f32 %v2476_v52, %v2477_v37  ;;  %v2483_v23 = vld [vmem:[%s2758_s18 + $0x3d0] sm:$0xff]  ;;  %v2484_v30 = vld [vmem:[%s2752_s6 + $0x3d8] sm:$0xff]  ;;  %v2488_v52 = vld [vmem:[%s2752_s6 + $0x3e8] sm:$0xff] }
 0x254   : > { %v731_v7 = vand.u32 2147483647, %v603_v56  ;;  %v1503_v3 = vmul.f32 %v2453_v49, %v5648_v40  ;;  %v2457_v34 = vpop.eup %2456  ;;  %v1629_v1 = vsub.f32 2.0, %v1501_v55  ;;  %v1755_v60 = vmul.f32 %v2445_v14, %v1627_v62 }
 0x255   : > { %v1881_v35 = vmul.f32 %v1753_v26, %v729_v47  ;;  %v2007_v38 = vadd.f32 %v2006_v5, %v1879_v11  ;;  %v606_v25 = vsub.f32 %v2478_v44, %v2479_v42  ;;  %v732_v59 = vand.u32 2147483647, %v604_v43  ;;  %v2485_v47 = vld [vmem:[%s2758_s18 + $0x3d8] sm:$0xff]  ;;  %v2487_v43 = vld [vmem:[%s2758_s18 + $0x3e0] sm:$0xff] }
 0x256   : > { %v1504_v10 = vmul.f32 %v2455_v33, %v5657_v50  ;;  %v2459_v28 = vpop.eup %2458  ;;  %v1630_v13 = vsub.f32 2.0, %v1502_v58  ;;  %v1756_v6 = vmul.f32 %v5696_v36, %v1628_v22  ;;  %v1882_v40 = vmul.f32 %v1754_v15, %v730_v0 }
 0x257   : > { %v2008_v54 = vadd.f32 %v2007_v38, %v1880_v51  ;;  %v607_v20 = vsub.f32 %v2480_v39, %v2481_v53  ;;  %v733_v14 = vand.u32 2147483647, %v605_v9  ;;  %v1505_v57 = vmul.f32 %v2457_v34, %v5666_v45  ;;  %v2491_v38 = vld [vmem:[%s2758_s18 + $0x3f0] sm:$0xff] }
 0x258   : > { %v2461_v32 = vpop.eup %2460  ;;  %v1631_v19 = vsub.f32 2.0, %v1503_v3  ;;  %v1757_v50 = vmul.f32 %v5706_v21, %v1629_v1  ;;  %v1883_v8 = vmul.f32 %v1755_v60, %v731_v7  ;;  %v608_v61 = vsub.f32 %v2482_v46, %v2483_v23 }
 0x259   : > { %v2009_v27 = vadd.f32 %v2008_v54, %v1881_v35  ;;  %v734_v36 = vand.u32 2147483647, %v606_v25  ;;  %v1506_v2 = vmul.f32 %v2459_v28, %v5675_v18  ;;  %v1632_v31 = vsub.f32 2.0, %v1504_v10  ;;  %v2490_v35 = vld [vmem:[%s2752_s6 + $0x3f0] sm:$0xff]  ;;  %v2492_v10 = vld [vmem:[%s2752_s6 + $0x3f8] sm:$0xff] }
 0x25a   : > { %v1758_v45 = vmul.f32 %v5717_v4, %v1630_v13  ;;  %v1884_v48 = vmul.f32 %v1756_v6, %v732_v59  ;;  %v609_v55 = vsub.f32 %v2484_v30, %v2485_v47  ;;  %v735_v21 = vand.u32 2147483647, %v607_v20  ;;  %v2493_v13 = vld [vmem:[%s2758_s18 + $0x3f8] sm:$0xff] }
 0x25b   : > { %v2463_v29 = vpop.eup %2462  ;;  %v2010_v56 = vadd.f32 %v2009_v27, %v1882_v40  ;;  %v1507_v62 = vmul.f32 %v2461_v32, %v5684_v41  ;;  %v1633_v11 = vsub.f32 2.0, %v1505_v57  ;;  %v1759_v63 = vmul.f32 %v2453_v49, %v1631_v19  ;;  %v2489_v41 = vld [vmem:[%s2758_s18 + $0x3e8] sm:$0xff] }
 0x25c   : > { %v1885_v18 = vmul.f32 %v1757_v50, %v733_v14  ;;  %v610_v0 = vsub.f32 %v2486_v12, %v2487_v43  ;;  %v736_v4 = vand.u32 2147483647, %v608_v61  ;;  %v1508_v58 = vmul.f32 %v2463_v29, %v5692_v17 }
 0x25d   : > { %v2465_v26 = vpop.eup %2464  ;;  %v2011_v16 = vadd.f32 %v2010_v56, %v1883_v8  ;;  %v1634_v22 = vsub.f32 2.0, %v1506_v2  ;;  %v1760_v15 = vmul.f32 %v2455_v33, %v1632_v31  ;;  %v1886_v51 = vmul.f32 %v1758_v45, %v734_v36  ;;  %v1894_v2 = vld [vmem:[#allocation7] sm:$0xff] }
 0x25e   : > { %v611_v37 = vsub.f32 %v2488_v52, %v2489_v41  ;;  %v737_v49 = vand.u32 2147483647, %v609_v55  ;;  %v1509_v9 = vmul.f32 %v2465_v26, %v5702_v24  ;;  %v1635_v7 = vsub.f32 2.0, %v1507_v62 }
 0x25f   : > { %v2012_v5 = vadd.f32 %v2011_v16, %v1884_v48  ;;  %v1761_v3 = vmul.f32 %v2457_v34, %v1633_v11  ;;  %v1887_v1 = vmul.f32 %v1759_v63, %v735_v21  ;;  %v612_v44 = vsub.f32 %v2490_v35, %v2491_v38 }
 0x260   : > { %v738_v17 = vand.u32 2147483647, %v610_v0  ;;  %v1636_v42 = vsub.f32 2.0, %v1508_v58  ;;  %v1762_v33 = vmul.f32 %v2459_v28, %v1634_v22  ;;  %v1888_v25 = vmul.f32 %v1760_v15, %v736_v4 }
 0x261   : > { %v2013_v60 = vadd.f32 %v2012_v5, %v1885_v18  ;;  %v613_v6 = vsub.f32 %v2492_v10, %v2493_v13  ;;  %v739_v40 = vand.u32 2147483647, %v611_v37  ;;  %v1637_v54 = vsub.f32 2.0, %v1509_v9 }
 0x262   : > { %v1763_v39 = vmul.f32 %v2461_v32, %v1635_v7  ;;  %v1889_v53 = vmul.f32 %v1761_v3, %v737_v49  ;;  %v740_v20 = vand.u32 2147483647, %v612_v44  ;;  %v1764_v34 = vmul.f32 %v2463_v29, %v1636_v42 }
 0x263   : > { %v2014_v59 = vadd.f32 %v2013_v60, %v1886_v51  ;;  %v1890_v14 = vmul.f32 %v1762_v33, %v738_v17  ;;  %v741_v19 = vand.u32 2147483647, %v613_v6  ;;  %v1765_v50 = vmul.f32 %v2465_v26, %v1637_v54 }
 0x264   : > { %v1891_v8 = vmul.f32 %v1763_v39, %v739_v40  ;;  %v1892_v28 = vmul.f32 %v1764_v34, %v740_v20 }
 0x265   : > { %v2015_v24 = vadd.f32 %v2014_v59, %v1887_v1  ;;  %v1893_v23 = vmul.f32 %v1765_v50, %v741_v19 }
 0x267   : > { %v2016_v57 = vadd.f32 %v2015_v24, %v1888_v25 }
 0x269   : > { %v2017_v27 = vadd.f32 %v2016_v57, %v1889_v53 }
 0x26b   : > { %v2018_v46 = vadd.f32 %v2017_v27, %v1890_v14 }
 0x26d   : > { %v2019_v61 = vadd.f32 %v2018_v46, %v1891_v8 }
 0x26f   : > { %v2020_v36 = vadd.f32 %v2019_v61, %v1892_v28 }
 0x271   : > { %v2021_v32 = vadd.f32 %v2020_v36, %v1893_v23 }
 0x273   : > { %v2022_v29 = vadd.f32 %v2021_v32, %v1894_v2 }
 0x275   : > { %2023 = vst [vmem:[#allocation7] sm:$0xff] %v2022_v29 }
 0x276   : > { %2563 = shalt.err (!%p2560_p11)
}
 0x277   : > { %2145 = dma.vmem_to_hbm [thread:$0]  (%p5761_p7), %s2034_s20, 128, %s5796_s2, [#allocation4]  }
 0x278   : > { %2607 = dma.done.wait (%p5761_p7), [#allocation4], 128  }
 0x279   : > { %2609 = vsyncadd (%p5761_p7), [#allocation4], 4294967168 }
 0x27a PF: > { %s19_s14 = sadd.s32 1, %s2632_s14   ;;  %s7403_s9 = smov %s2616_s10 }
 0x27b   : > { %p16_p12 = scmp.ge.s32.totalorder %s19_s14, 10   ;;  %s7404_s10 = smov %s2620_s11 }
 0x27c   : > { %s7405_s11 = smov %s2706_s21  ;;  %s7406_s12 = smov %s2628_s13 }
 0x27d   : > { %s7407_s13 = smov %s7409_s16  ;;  %18 = sbr.rel (!%p16_p12) target bundleno = 7 (0x7), region = 83 }
 0x282   :  { %2046 = vsyncpa [#allocation3], 1 }
 0x283   :  { %2048 = vsyncpa [#allocation3 + $0x1], 1 }
 0x284   :  { %2049 = vsyncpa [#allocation6], 1 }
 0x285   :  { %2051 = vsyncpa [#allocation6 + $0x1], 1 }
 0x286   :  { %2052 = vsyncpa [#allocation4], 1 }
 0x287   :  { %2054 = vsyncpa [#allocation4 + $0x1], 1 }

</bundles_post_ra>
